<compile_context>
chip_gen: v6e
topology: v6e:2x2x1
jax: 0.10.0
libtpu: 0.0.40
codegen_flags: <defaults>
</compile_context>

<pallas_src>
import math
import functools

import jax
import jax.numpy as jnp
from jax.experimental import pallas as pl
from jax.experimental.pallas import tpu as pltpu


# ----------------------------------------------------------------------------
# Tile selection helper
# ----------------------------------------------------------------------------

def _pick_tile(dim, target, align):
    """Full dim if small, else the largest divisor of `dim` that is a multiple
    of `align` and <= target; falls back to the full dim.  Large non-divisible
    dims (the vocab) are padded at init so the fallback stays VMEM-safe."""
    if dim <= target:
        return dim
    t = (target // align) * align
    while t >= align:
        if dim % t == 0:
            return t
        t -= align
    return dim


def _round_up(x, m):
    return ((x + m - 1) // m) * m


# ----------------------------------------------------------------------------
# Tiled linear: bf16 MXU matmul, f32 accumulator, fused bias (+ optional SiLU)
# ----------------------------------------------------------------------------

def _linear_kernel(x_ref, w_ref, b_ref, o_ref, acc_ref, *, activation):
    @pl.when(pl.program_id(2) == 0)
    def _():
        acc_ref[...] = jnp.zeros_like(acc_ref)

    acc_ref[...] += jnp.dot(x_ref[...], w_ref[...],
                            preferred_element_type=jnp.float32)

    @pl.when(pl.program_id(2) == pl.num_programs(2) - 1)
    def _():
        y = acc_ref[...] + b_ref[...]          # bias broadcast once per tile
        if activation == "silu":
            y = y * jax.nn.sigmoid(y)          # EUP transcendental, f32
        o_ref[...] = y.astype(o_ref.dtype)


def linear_pallas(x, w, b, activation=None, *, out_dtype=jnp.bfloat16,
                  tm_target=256, tn_target=512, tk_target=512,
                  vmem_limit=32 * 1024 * 1024):
    """x: (M, K) bf16, w: (K, N) bf16, b: (N,) f32 -> (M, N) out_dtype."""
    M, K = x.shape
    N = w.shape[1]
    x = x.astype(jnp.bfloat16)
    w = w.astype(jnp.bfloat16)
    b = b.astype(jnp.float32).reshape(1, N)

    tm = _pick_tile(M, tm_target, 16)      # 16: bf16 sublane packing
    tk = _pick_tile(K, tk_target, 128)
    tn = _pick_tile(N, tn_target, 128)
    grid = (M // tm, N // tn, K // tk)

    kernel = functools.partial(_linear_kernel, activation=activation)
    return pl.pallas_call(
        kernel,
        out_shape=jax.ShapeDtypeStruct((M, N), out_dtype),
        grid=grid,
        in_specs=[
            pl.BlockSpec((tm, tk), lambda i, j, k: (i, k)),
            pl.BlockSpec((tk, tn), lambda i, j, k: (k, j)),
            pl.BlockSpec((1, tn), lambda i, j, k: (0, j)),
        ],
        out_specs=pl.BlockSpec((tm, tn), lambda i, j, k: (i, j)),
        scratch_shapes=[pltpu.VMEM((tm, tn), jnp.float32)],
        compiler_params=pltpu.CompilerParams(
            dimension_semantics=("parallel", "parallel", "arbitrary"),
            vmem_limit_bytes=vmem_limit),
    )(x, w, b)


# ----------------------------------------------------------------------------
# Attention: fused qkv/kv input, in-kernel mask/causal bias, f32 softmax,
# single lane-dense (Sq, D) output store per grid step.
# ----------------------------------------------------------------------------

def _mha_all_heads(q, k, v, bias, *, num_heads, head_dim, scale):
    """q: (Sq, D) bf16, k/v: (Sk, D) bf16, bias broadcastable to (Sq, Sk) f32.
    Returns (Sq, D) f32 — all heads concatenated (one lane-dense tile)."""
    outs = []
    # TODO(synk): for long sequences / many heads switch this static unroll to
    # lax.fori_loop + Sk-tiled online softmax to bound vreg/VMEM pressure.
    for h in range(num_heads):
        lo, hi = h * head_dim, (h + 1) * head_dim
        qh, kh, vh = q[:, lo:hi], k[:, lo:hi], v[:, lo:hi]
        # Contract on head_dim directly (no materialized k.T / XLU transpose).
        s = jax.lax.dot_general(qh, kh, (((1,), (1,)), ((), ())),
                                preferred_element_type=jnp.float32)
        s = s * scale + bias
        m = jnp.max(s, axis=-1, keepdims=True)
        p = jnp.exp(s - m)
        denom = jnp.sum(p, axis=-1, keepdims=True)
        p = p * pl.reciprocal(denom, approx=True)
        outs.append(jnp.dot(p.astype(jnp.bfloat16), vh,
                            preferred_element_type=jnp.float32))
    return jnp.concatenate(outs, axis=-1)        # (Sq, D) f32


def _self_attention_kernel(qkv_ref, kmask_ref, o_ref, *,
                           num_heads, head_dim, scale, causal):
    D = num_heads * head_dim
    S = qkv_ref.shape[1]
    qkv = qkv_ref[0]                              # (S, 3D) bf16
    q, k, v = qkv[:, 0:D], qkv[:, D:2 * D], qkv[:, 2 * D:3 * D]

    # Additive key-padding bias built in-kernel (kmask: 1=valid, 0=pad).
    bias = (kmask_ref[0] - 1.0) * 1e9             # (1, S) f32
    if causal:
        qi = jax.lax.broadcasted_iota(jnp.int32, (S, S), 0)
        ki = jax.lax.broadcasted_iota(jnp.int32, (S, S), 1)
        bias = bias + jnp.where(ki <= qi, 0.0, -1e9)

    o = _mha_all_heads(q, k, v, bias, num_heads=num_heads,
                       head_dim=head_dim, scale=scale)
    o_ref[0] = o.astype(o_ref.dtype)              # ONE full-width store


def _cross_attention_kernel(q_ref, kv_ref, kmask_ref, o_ref, *,
                            num_heads, head_dim, scale):
    D = num_heads * head_dim
    q = q_ref[0]                                  # (Sq, D) bf16
    kv = kv_ref[0]                                # (Sk, 2D) bf16
    k, v = kv[:, 0:D], kv[:, D:2 * D]
    bias = (kmask_ref[0] - 1.0) * 1e9             # (1, Sk) f32
    o = _mha_all_heads(q, k, v, bias, num_heads=num_heads,
                       head_dim=head_dim, scale=scale)
    o_ref[0] = o.astype(o_ref.dtype)


def self_attention_pallas(qkv, kmask, *, num_heads, head_dim, causal):
    """qkv: (B, S, 3D) bf16 fused projection, kmask: (B, 1, S) 1=valid."""
    B, S, D3 = qkv.shape
    D = num_heads * head_dim
    scale = 1.0 / math.sqrt(head_dim)
    kernel = functools.partial(_self_attention_kernel, num_heads=num_heads,
                               head_dim=head_dim, scale=scale, causal=causal)
    return pl.pallas_call(
        kernel,
        out_shape=jax.ShapeDtypeStruct((B, S, D), jnp.bfloat16),
        grid=(B,),
        in_specs=[
            pl.BlockSpec((1, S, D3), lambda b: (b, 0, 0)),
            pl.BlockSpec((1, 1, S), lambda b: (b, 0, 0)),
        ],
        out_specs=pl.BlockSpec((1, S, D), lambda b: (b, 0, 0)),
        compiler_params=pltpu.CompilerParams(
            dimension_semantics=("parallel",),
            vmem_limit_bytes=32 * 1024 * 1024),
    )(qkv.astype(jnp.bfloat16), kmask.astype(jnp.float32))


def cross_attention_pallas(q, kv, kmask, *, num_heads, head_dim):
    """q: (B, Sq, D) bf16, kv: (B, Sk, 2D) bf16 fused, kmask: (B, 1, Sk)."""
    B, Sq, D = q.shape
    Sk = kv.shape[1]
    scale = 1.0 / math.sqrt(head_dim)
    kernel = functools.partial(_cross_attention_kernel, num_heads=num_heads,
                               head_dim=head_dim, scale=scale)
    return pl.pallas_call(
        kernel,
        out_shape=jax.ShapeDtypeStruct((B, Sq, D), jnp.bfloat16),
        grid=(B,),
        in_specs=[
            pl.BlockSpec((1, Sq, D), lambda b: (b, 0, 0)),
            pl.BlockSpec((1, Sk, 2 * D), lambda b: (b, 0, 0)),
            pl.BlockSpec((1, 1, Sk), lambda b: (b, 0, 0)),
        ],
        out_specs=pl.BlockSpec((1, Sq, D), lambda b: (b, 0, 0)),
        compiler_params=pltpu.CompilerParams(
            dimension_semantics=("parallel",),
            vmem_limit_bytes=32 * 1024 * 1024),
    )(q.astype(jnp.bfloat16), kv.astype(jnp.bfloat16),
      kmask.astype(jnp.float32))


# ----------------------------------------------------------------------------
# Fused residual-add + LayerNorm, tiled over rows; bf16 in/out, f32 stats
# ----------------------------------------------------------------------------

def _add_layernorm_kernel(x_ref, r_ref, g_ref, b_ref, o_ref, *, eps):
    y = x_ref[...].astype(jnp.float32) + r_ref[...].astype(jnp.float32)
    mu = jnp.mean(y, axis=-1, keepdims=True)
    var = jnp.mean(jnp.square(y - mu), axis=-1, keepdims=True)
    o_ref[...] = ((y - mu) * jax.lax.rsqrt(var + eps) * g_ref[...]
                  + b_ref[...]).astype(o_ref.dtype)


def add_layernorm_pallas(x, residual, gamma, beta, eps=1e-5):
    """Fused (x + residual) -> LayerNorm over last dim.  bf16 in / bf16 out."""
    M, D = x.shape
    tm = _pick_tile(M, 512, 16)
    kernel = functools.partial(_add_layernorm_kernel, eps=eps)
    return pl.pallas_call(
        kernel,
        out_shape=jax.ShapeDtypeStruct((M, D), jnp.bfloat16),
        grid=(M // tm,),
        in_specs=[
            pl.BlockSpec((tm, D), lambda i: (i, 0)),
            pl.BlockSpec((tm, D), lambda i: (i, 0)),
            pl.BlockSpec((1, D), lambda i: (0, 0)),
            pl.BlockSpec((1, D), lambda i: (0, 0)),
        ],
        out_specs=pl.BlockSpec((tm, D), lambda i: (i, 0)),
        compiler_params=pltpu.CompilerParams(
            dimension_semantics=("parallel",)),
    )(x.astype(jnp.bfloat16), residual.astype(jnp.bfloat16),
      gamma.reshape(1, D).astype(jnp.float32),
      beta.reshape(1, D).astype(jnp.float32))


# ----------------------------------------------------------------------------
# Model glue (plain JAX): embeddings, masks, layer wiring
# ----------------------------------------------------------------------------

def sinusoidal_positions(seq_len, d_model):
    # Marian-style sinusoidal positions: sin in first half dims, cos in second.
    half = d_model // 2
    pos = jnp.arange(seq_len, dtype=jnp.float32)[:, None]
    dim = jnp.arange(half, dtype=jnp.float32)[None, :]
    inv_freq = jnp.exp(-math.log(10000.0) * (2.0 * dim / d_model))
    angles = pos * inv_freq
    return jnp.concatenate([jnp.sin(angles), jnp.cos(angles)], axis=-1)


def self_attention_block(x, p, kmask, H, Dh, causal):
    B, S, D = x.shape
    qkv = linear_pallas(x.reshape(-1, D), p["wqkv"], p["bqkv"])   # (B*S, 3D)
    qkv = qkv.reshape(B, S, 3 * D)           # metadata reshape only, no copy
    o = self_attention_pallas(qkv, kmask, num_heads=H, head_dim=Dh,
                              causal=causal)
    return linear_pallas(o.reshape(-1, D), p["wo"], p["bo"]).reshape(B, S, D)


def cross_attention_block(x_q, x_kv, p, kmask, H, Dh):
    B, Sq, D = x_q.shape
    Sk = x_kv.shape[1]
    q = linear_pallas(x_q.reshape(-1, D), p["wq"], p["bq"]).reshape(B, Sq, D)
    kv = linear_pallas(x_kv.reshape(-1, D), p["wkv"], p["bkv"])   # (B*Sk, 2D)
    kv = kv.reshape(B, Sk, 2 * D)
    o = cross_attention_pallas(q, kv, kmask, num_heads=H, head_dim=Dh)
    return linear_pallas(o.reshape(-1, D), p["wo"], p["bo"]).reshape(B, Sq, D)


def ffn_block(x_flat, p):
    h = linear_pallas(x_flat, p["w1"], p["b1"], activation="silu")  # swish
    return linear_pallas(h, p["w2"], p["b2"])


def encoder_layer(x, p, src_kmask, H, Dh):
    B, S, D = x.shape
    a = self_attention_block(x, p["self_attn"], src_kmask, H, Dh, causal=False)
    x = add_layernorm_pallas(a.reshape(-1, D), x.reshape(-1, D),
                             p["ln1_g"], p["ln1_b"]).reshape(B, S, D)
    f = ffn_block(x.reshape(-1, D), p["ffn"])
    x = add_layernorm_pallas(f, x.reshape(-1, D),
                             p["ln2_g"], p["ln2_b"]).reshape(B, S, D)
    return x


def decoder_layer(y, enc, p, tgt_kmask, src_kmask, H, Dh):
    B, T, D = y.shape
    a = self_attention_block(y, p["self_attn"], tgt_kmask, H, Dh, causal=True)
    y = add_layernorm_pallas(a.reshape(-1, D), y.reshape(-1, D),
                             p["ln1_g"], p["ln1_b"]).reshape(B, T, D)
    c = cross_attention_block(y, enc, p["cross_attn"], src_kmask, H, Dh)
    y = add_layernorm_pallas(c.reshape(-1, D), y.reshape(-1, D),
                             p["ln2_g"], p["ln2_b"]).reshape(B, T, D)
    f = ffn_block(y.reshape(-1, D), p["ffn"])
    y = add_layernorm_pallas(f, y.reshape(-1, D),
                             p["ln3_g"], p["ln3_b"]).reshape(B, T, D)
    return y


def translation_forward(params, src, src_mask, tgt, tgt_mask,
                        num_layers, num_heads):
    embed = params["embed"]                       # (V, D) bf16, shared
    V, D = embed.shape
    H = num_heads
    Dh = D // H
    B, S = src.shape
    _, T = tgt.shape
    emb_scale = math.sqrt(D)

    # Key-padding masks as tiny (B, 1, Sk) float tensors consumed in-kernel.
    src_kmask = src_mask.astype(jnp.float32).reshape(B, 1, S)
    tgt_kmask = tgt_mask.astype(jnp.float32).reshape(B, 1, T)

    # ---- encoder ----
    x = (jnp.take(embed, src, axis=0).astype(jnp.float32) * emb_scale
         + sinusoidal_positions(S, D)[None]).astype(jnp.bfloat16)
    for l in range(num_layers):
        x = encoder_layer(x, params["enc_layers"][l], src_kmask, H, Dh)
    enc_out = x

    # ---- decoder (causal term built inside the attention kernel) ----
    y = (jnp.take(embed, tgt, axis=0).astype(jnp.float32) * emb_scale
         + sinusoidal_positions(T, D)[None]).astype(jnp.bfloat16)
    for l in range(num_layers):
        y = decoder_layer(y, enc_out, params["dec_layers"][l],
                          tgt_kmask, src_kmask, H, Dh)

    # ---- LM head: tied embedding, pre-transposed + 128-lane-padded at init.
    # Full M resident (tm_target high) so the weight streams from HBM once;
    # logits emitted in bf16 (halves the largest HBM write of the forward).
    logits = linear_pallas(
        y.reshape(-1, D), params["lm_head_w"], params["final_logits_bias"],
        out_dtype=jnp.bfloat16, tm_target=1024, tn_target=512,
        vmem_limit=64 * 1024 * 1024)
    logits = logits[:, :V]                        # drop padded vocab columns
    return logits.reshape(B, T, V)


# ----------------------------------------------------------------------------
# Deterministic parameter init (matmul weights stored in bf16)
# ----------------------------------------------------------------------------

def init_params(key, vocab, d_model, d_ffn, num_layers):
    def nrm(k, shape):
        return (jax.random.normal(k, shape, jnp.float32) * 0.02).astype(jnp.bfloat16)

    keys = iter(jax.random.split(key, 1024))

    def self_attn_params():
        return {
            "wqkv": nrm(next(keys), (d_model, 3 * d_model)),
            "bqkv": jnp.zeros((3 * d_model,), jnp.float32),
            "wo": nrm(next(keys), (d_model, d_model)),
            "bo": jnp.zeros((d_model,), jnp.float32),
        }

    def cross_attn_params():
        return {
            "wq": nrm(next(keys), (d_model, d_model)),
            "bq": jnp.zeros((d_model,), jnp.float32),
            "wkv": nrm(next(keys), (d_model, 2 * d_model)),
            "bkv": jnp.zeros((2 * d_model,), jnp.float32),
            "wo": nrm(next(keys), (d_model, d_model)),
            "bo": jnp.zeros((d_model,), jnp.float32),
        }

    def ffn_params():
        return {
            "w1": nrm(next(keys), (d_model, d_ffn)),
            "b1": jnp.zeros((d_ffn,), jnp.float32),
            "w2": nrm(next(keys), (d_ffn, d_model)),
            "b2": jnp.zeros((d_model,), jnp.float32),
        }

    enc_layers = []
    for _ in range(num_layers):
        enc_layers.append({
            "self_attn": self_attn_params(), "ffn": ffn_params(),
            "ln1_g": jnp.ones((d_model,), jnp.float32),
            "ln1_b": jnp.zeros((d_model,), jnp.float32),
            "ln2_g": jnp.ones((d_model,), jnp.float32),
            "ln2_b": jnp.zeros((d_model,), jnp.float32),
        })
    dec_layers = []
    for _ in range(num_layers):
        dec_layers.append({
            "self_attn": self_attn_params(), "cross_attn": cross_attn_params(),
            "ffn": ffn_params(),
            "ln1_g": jnp.ones((d_model,), jnp.float32),
            "ln1_b": jnp.zeros((d_model,), jnp.float32),
            "ln2_g": jnp.ones((d_model,), jnp.float32),
            "ln2_b": jnp.zeros((d_model,), jnp.float32),
            "ln3_g": jnp.ones((d_model,), jnp.float32),
            "ln3_b": jnp.zeros((d_model,), jnp.float32),
        })

    embed = nrm(next(keys), (vocab, d_model))

    # Tied LM head: transposed ONCE and zero-padded to a 128-lane multiple so
    # the vocab dimension always tiles lane-dense (real Marian vocab ~58k is
    # not 128-divisible).  Padded columns produce 0 logits and are sliced off.
    vocab_pad = _round_up(vocab, 128)
    lm_head_w = jnp.zeros((d_model, vocab_pad), jnp.bfloat16)
    lm_head_w = lm_head_w.at[:, :vocab].set(embed.T)
    final_logits_bias = jnp.zeros((vocab_pad,), jnp.float32)

    return {
        "embed": embed,
        "lm_head_w": lm_head_w,
        "final_logits_bias": final_logits_bias,
        "enc_layers": enc_layers,
        "dec_layers": dec_layers,
    }


# ----------------------------------------------------------------------------
# Main
# ----------------------------------------------------------------------------

if __name__ == "__main__":
    # Small config consistent with the module's forward (seq2seq vocab logits):
    B, S, T = 2, 8, 8
    VOCAB, D_MODEL, D_FFN = 64, 32, 64
    NUM_LAYERS, NUM_HEADS = 2, 4   # args.num_transformer_layers / _heads

    key = jax.random.PRNGKey(0)
    kp, ks, kt = jax.random.split(key, 3)

    params = init_params(kp, VOCAB, D_MODEL, D_FFN, NUM_LAYERS)

    src = jax.random.randint(ks, (B, S), 0, VOCAB, dtype=jnp.int32)
    tgt = jax.random.randint(kt, (B, T), 0, VOCAB, dtype=jnp.int32)
    # Attention masks: 1 = valid token, 0 = padding (pad out the tail of batch 1).
    src_attention_mask = jnp.ones((B, S), jnp.int32).at[1, -2:].set(0)
    tgt_attention_mask = jnp.ones((B, T), jnp.int32).at[1, -3:].set(0)

    forward = jax.jit(functools.partial(translation_forward,
                                        num_layers=NUM_LAYERS,
                                        num_heads=NUM_HEADS))
    # TODO(synk): autoregressive generate() (beam search / KV cache) is not
    # implemented; only the training-style forward producing logits is.
    logits = forward(params, src, src_attention_mask, tgt, tgt_attention_mask)
    jax.block_until_ready(logits)
    assert logits.shape == (B, T, VOCAB)
    assert bool(jnp.all(jnp.isfinite(logits.astype(jnp.float32))))
    print("KERNEL_OK")
</pallas_src>

<mosaic_0001>
module attributes {stable_mosaic.version = 11 : i64} {
  func.func @_linear_kernel(%arg0: i32, %arg1: i32, %arg2: i32, %arg3: memref<16x32xbf16, #tpu.memory_space<vmem>>, %arg4: memref<32x32xbf16, #tpu.memory_space<vmem>>, %arg5: memref<1x32xf32, #tpu.memory_space<vmem>>, %arg6: memref<16x32xbf16, #tpu.memory_space<vmem>>, %arg7: memref<16x32xf32, #tpu.memory_space<vmem>>) attributes {dimension_semantics = [#tpu.dimension_semantics<parallel>, #tpu.dimension_semantics<parallel>, #tpu.dimension_semantics<arbitrary>], iteration_bounds = array<i64: 1, 1, 1>, scalar_prefetch = 0 : i64, scratch_operands = 1 : i64, tpu.core_type = #tpu.core_type<tc>, window_params = [{transform_indices = @transform_0, window_bounds = array<i64: 16, 32>}, {transform_indices = @transform_1, window_bounds = array<i64: 32, 32>}, {transform_indices = @transform_2, window_bounds = array<i64: 1, 32>}, {transform_indices = @transform_3, window_bounds = array<i64: 16, 32>}]} {
    %c0_i32 = arith.constant 0 : i32
    %0 = arith.cmpi eq, %arg2, %c0_i32 : i32
    %1 = arith.extui %0 : i1 to i32
    %c0_i32_0 = arith.constant 0 : i32
    %2 = arith.cmpi ne, %1, %c0_i32_0 : i32
    scf.if %2 {
      %cst_10 = arith.constant 0.000000e+00 : f32
      %12 = vector.broadcast %cst_10 : f32 to vector<16x32xf32>
      %c0_11 = arith.constant 0 : index
      %c0_12 = arith.constant 0 : index
      %13 = vector.load %arg7[%c0_11, %c0_12] : memref<16x32xf32, #tpu.memory_space<vmem>>, vector<16x32xf32>
      tpu.vector_store %arg7[%c0_11, %c0_12], %12 {strides = array<i32>} : memref<16x32xf32, #tpu.memory_space<vmem>>, vector<16x32xf32>,
    } else {
    }
    %c0 = arith.constant 0 : index
    %c0_1 = arith.constant 0 : index
    %3 = vector.load %arg7[%c0, %c0_1] : memref<16x32xf32, #tpu.memory_space<vmem>>, vector<16x32xf32>
    %c0_2 = arith.constant 0 : index
    %c0_3 = arith.constant 0 : index
    %4 = vector.load %arg3[%c0_2, %c0_3] : memref<16x32xbf16, #tpu.memory_space<vmem>>, vector<16x32xbf16>
    %c0_4 = arith.constant 0 : index
    %c0_5 = arith.constant 0 : index
    %5 = vector.load %arg4[%c0_4, %c0_5] : memref<32x32xbf16, #tpu.memory_space<vmem>>, vector<32x32xbf16>
    %cst = arith.constant dense<0.000000e+00> : vector<16x32xf32>
    %6 = tpu.matmul %4, %5, %cst {dimension_numbers = #tpu.dot_dimension_numbers<[1], [0], [0], [1], [0, 0, 1, 1], [], []>} : vector<16x32xbf16>, vector<32x32xbf16>, vector<16x32xf32> -> vector<16x32xf32>
    %7 = arith.addf %3, %6 : vector<16x32xf32>
    %c0_6 = arith.constant 0 : index
    %c0_7 = arith.constant 0 : index
    %8 = vector.load %arg7[%c0_6, %c0_7] : memref<16x32xf32, #tpu.memory_space<vmem>>, vector<16x32xf32>
    tpu.vector_store %arg7[%c0_6, %c0_7], %7 {strides = array<i32>} : memref<16x32xf32, #tpu.memory_space<vmem>>, vector<16x32xf32>,
    %c0_i32_8 = arith.constant 0 : i32
    %9 = arith.cmpi eq, %arg2, %c0_i32_8 : i32
    %10 = arith.extui %9 : i1 to i32
    %c0_i32_9 = arith.constant 0 : i32
    %11 = arith.cmpi ne, %10, %c0_i32_9 : i32
    scf.if %11 {
      %c0_10 = arith.constant 0 : index
      %c0_11 = arith.constant 0 : index
      %12 = vector.load %arg7[%c0_10, %c0_11] : memref<16x32xf32, #tpu.memory_space<vmem>>, vector<16x32xf32>
      %c0_12 = arith.constant 0 : index
      %c0_13 = arith.constant 0 : index
      %13 = vector.load %arg5[%c0_12, %c0_13] : memref<1x32xf32, #tpu.memory_space<vmem>>, vector<1x32xf32>
      %14 = vector.broadcast %13 : vector<1x32xf32> to vector<16x32xf32>
      %15 = arith.addf %12, %14 : vector<16x32xf32>
      %16 = arith.truncf %15 : vector<16x32xf32> to vector<16x32xbf16>
      %c0_14 = arith.constant 0 : index
      %c0_15 = arith.constant 0 : index
      %17 = vector.load %arg6[%c0_14, %c0_15] : memref<16x32xbf16, #tpu.memory_space<vmem>>, vector<16x32xbf16>
      tpu.vector_store %arg6[%c0_14, %c0_15], %16 {strides = array<i32>} : memref<16x32xbf16, #tpu.memory_space<vmem>>, vector<16x32xbf16>,
    } else {
    }
    return
  }
  func.func @transform_0(%arg0: i32, %arg1: i32, %arg2: i32) -> (i32, i32) {
    %c0_i32 = arith.constant 0 : i32
    return %arg0, %arg2 : i32, i32
  }
  func.func @transform_1(%arg0: i32, %arg1: i32, %arg2: i32) -> (i32, i32) {
    %c0_i32 = arith.constant 0 : i32
    return %arg2, %arg1 : i32, i32
  }
  func.func @transform_2(%arg0: i32, %arg1: i32, %arg2: i32) -> (i32, i32) {
    %c0_i32 = arith.constant 0 : i32
    %c0_i32_0 = arith.constant 0 : i32
    return %c0_i32, %arg1 : i32, i32
  }
  func.func @transform_3(%arg0: i32, %arg1: i32, %arg2: i32) -> (i32, i32) {
    %c0_i32 = arith.constant 0 : i32
    return %arg0, %arg1 : i32, i32
  }
}

module attributes {stable_mosaic.version = 11 : i64} {
  func.func @_linear_kernel(%arg0: i32, %arg1: i32, %arg2: i32, %arg3: memref<16x32xbf16, #tpu.memory_space<vmem>>, %arg4: memref<32x96xbf16, #tpu.memory_space<vmem>>, %arg5: memref<1x96xf32, #tpu.memory_space<vmem>>, %arg6: memref<16x96xbf16, #tpu.memory_space<vmem>>, %arg7: memref<16x96xf32, #tpu.memory_space<vmem>>) attributes {dimension_semantics = [#tpu.dimension_semantics<parallel>, #tpu.dimension_semantics<parallel>, #tpu.dimension_semantics<arbitrary>], iteration_bounds = array<i64: 1, 1, 1>, scalar_prefetch = 0 : i64, scratch_operands = 1 : i64, tpu.core_type = #tpu.core_type<tc>, window_params = [{transform_indices = @transform_0, window_bounds = array<i64: 16, 32>}, {transform_indices = @transform_1, window_bounds = array<i64: 32, 96>}, {transform_indices = @transform_2, window_bounds = array<i64: 1, 96>}, {transform_indices = @transform_3, window_bounds = array<i64: 16, 96>}]} {
    %c0_i32 = arith.constant 0 : i32
    %0 = arith.cmpi eq, %arg2, %c0_i32 : i32
    %1 = arith.extui %0 : i1 to i32
    %c0_i32_0 = arith.constant 0 : i32
    %2 = arith.cmpi ne, %1, %c0_i32_0 : i32
    scf.if %2 {
      %cst_10 = arith.constant 0.000000e+00 : f32
      %12 = vector.broadcast %cst_10 : f32 to vector<16x96xf32>
      %c0_11 = arith.constant 0 : index
      %c0_12 = arith.constant 0 : index
      %13 = vector.load %arg7[%c0_11, %c0_12] : memref<16x96xf32, #tpu.memory_space<vmem>>, vector<16x96xf32>
      tpu.vector_store %arg7[%c0_11, %c0_12], %12 {strides = array<i32>} : memref<16x96xf32, #tpu.memory_space<vmem>>, vector<16x96xf32>,
    } else {
    }
    %c0 = arith.constant 0 : index
    %c0_1 = arith.constant 0 : index
    %3 = vector.load %arg7[%c0, %c0_1] : memref<16x96xf32, #tpu.memory_space<vmem>>, vector<16x96xf32>
    %c0_2 = arith.constant 0 : index
    %c0_3 = arith.constant 0 : index
    %4 = vector.load %arg3[%c0_2, %c0_3] : memref<16x32xbf16, #tpu.memory_space<vmem>>, vector<16x32xbf16>
    %c0_4 = arith.constant 0 : index
    %c0_5 = arith.constant 0 : index
    %5 = vector.load %arg4[%c0_4, %c0_5] : memref<32x96xbf16, #tpu.memory_space<vmem>>, vector<32x96xbf16>
    %cst = arith.constant dense<0.000000e+00> : vector<16x96xf32>
    %6 = tpu.matmul %4, %5, %cst {dimension_numbers = #tpu.dot_dimension_numbers<[1], [0], [0], [1], [0, 0, 1, 1], [], []>} : vector<16x32xbf16>, vector<32x96xbf16>, vector<16x96xf32> -> vector<16x96xf32>
    %7 = arith.addf %3, %6 : vector<16x96xf32>
    %c0_6 = arith.constant 0 : index
    %c0_7 = arith.constant 0 : index
    %8 = vector.load %arg7[%c0_6, %c0_7] : memref<16x96xf32, #tpu.memory_space<vmem>>, vector<16x96xf32>
    tpu.vector_store %arg7[%c0_6, %c0_7], %7 {strides = array<i32>} : memref<16x96xf32, #tpu.memory_space<vmem>>, vector<16x96xf32>,
    %c0_i32_8 = arith.constant 0 : i32
    %9 = arith.cmpi eq, %arg2, %c0_i32_8 : i32
    %10 = arith.extui %9 : i1 to i32
    %c0_i32_9 = arith.constant 0 : i32
    %11 = arith.cmpi ne, %10, %c0_i32_9 : i32
    scf.if %11 {
      %c0_10 = arith.constant 0 : index
      %c0_11 = arith.constant 0 : index
      %12 = vector.load %arg7[%c0_10, %c0_11] : memref<16x96xf32, #tpu.memory_space<vmem>>, vector<16x96xf32>
      %c0_12 = arith.constant 0 : index
      %c0_13 = arith.constant 0 : index
      %13 = vector.load %arg5[%c0_12, %c0_13] : memref<1x96xf32, #tpu.memory_space<vmem>>, vector<1x96xf32>
      %14 = vector.broadcast %13 : vector<1x96xf32> to vector<16x96xf32>
      %15 = arith.addf %12, %14 : vector<16x96xf32>
      %16 = arith.truncf %15 : vector<16x96xf32> to vector<16x96xbf16>
      %c0_14 = arith.constant 0 : index
      %c0_15 = arith.constant 0 : index
      %17 = vector.load %arg6[%c0_14, %c0_15] : memref<16x96xbf16, #tpu.memory_space<vmem>>, vector<16x96xbf16>
      tpu.vector_store %arg6[%c0_14, %c0_15], %16 {strides = array<i32>} : memref<16x96xbf16, #tpu.memory_space<vmem>>, vector<16x96xbf16>,
    } else {
    }
    return
  }
  func.func @transform_0(%arg0: i32, %arg1: i32, %arg2: i32) -> (i32, i32) {
    %c0_i32 = arith.constant 0 : i32
    return %arg0, %arg2 : i32, i32
  }
  func.func @transform_1(%arg0: i32, %arg1: i32, %arg2: i32) -> (i32, i32) {
    %c0_i32 = arith.constant 0 : i32
    return %arg2, %arg1 : i32, i32
  }
  func.func @transform_2(%arg0: i32, %arg1: i32, %arg2: i32) -> (i32, i32) {
    %c0_i32 = arith.constant 0 : i32
    %c0_i32_0 = arith.constant 0 : i32
    return %c0_i32, %arg1 : i32, i32
  }
  func.func @transform_3(%arg0: i32, %arg1: i32, %arg2: i32) -> (i32, i32) {
    %c0_i32 = arith.constant 0 : i32
    return %arg0, %arg1 : i32, i32
  }
}

module attributes {stable_mosaic.version = 11 : i64} {
  func.func @_add_layernorm_kernel(%arg0: i32, %arg1: memref<16x32xbf16, #tpu.memory_space<vmem>>, %arg2: memref<16x32xbf16, #tpu.memory_space<vmem>>, %arg3: memref<1x32xf32, #tpu.memory_space<vmem>>, %arg4: memref<1x32xf32, #tpu.memory_space<vmem>>, %arg5: memref<16x32xbf16, #tpu.memory_space<vmem>>) attributes {dimension_semantics = [#tpu.dimension_semantics<parallel>], iteration_bounds = array<i64: 1>, scalar_prefetch = 0 : i64, scratch_operands = 0 : i64, tpu.core_type = #tpu.core_type<tc>, window_params = [{transform_indices = @transform_0, window_bounds = array<i64: 16, 32>}, {transform_indices = @transform_1, window_bounds = array<i64: 16, 32>}, {pipeline_mode = #tpu.pipeline_mode<synchronous>, transform_indices = @transform_2, window_bounds = array<i64: 1, 32>}, {pipeline_mode = #tpu.pipeline_mode<synchronous>, transform_indices = @transform_3, window_bounds = array<i64: 1, 32>}, {transform_indices = @transform_4, window_bounds = array<i64: 16, 32>}]} {
    %c0 = arith.constant 0 : index
    %c0_0 = arith.constant 0 : index
    %0 = vector.load %arg1[%c0, %c0_0] : memref<16x32xbf16, #tpu.memory_space<vmem>>, vector<16x32xbf16>
    %1 = arith.extf %0 : vector<16x32xbf16> to vector<16x32xf32>
    %c0_1 = arith.constant 0 : index
    %c0_2 = arith.constant 0 : index
    %2 = vector.load %arg2[%c0_1, %c0_2] : memref<16x32xbf16, #tpu.memory_space<vmem>>, vector<16x32xbf16>
    %3 = arith.extf %2 : vector<16x32xbf16> to vector<16x32xf32>
    %4 = arith.addf %1, %3 : vector<16x32xf32>
    %cst = arith.constant dense<0.000000e+00> : vector<16xf32>
    %5 = vector.multi_reduction <add>, %4, %cst [1] : vector<16x32xf32> to vector<16xf32>
    %6 = vector.shape_cast %5 : vector<16xf32> to vector<16x1xf32>
    %cst_3 = arith.constant 3.200000e+01 : f32
    %7 = vector.broadcast %cst_3 : f32 to vector<16x1xf32>
    %8 = arith.divf %6, %7 : vector<16x1xf32>
    %9 = vector.broadcast %8 : vector<16x1xf32> to vector<16x32xf32>
    %10 = arith.subf %4, %9 : vector<16x32xf32>
    %11 = arith.mulf %10, %10 : vector<16x32xf32>
    %cst_4 = arith.constant dense<0.000000e+00> : vector<16xf32>
    %12 = vector.multi_reduction <add>, %11, %cst_4 [1] : vector<16x32xf32> to vector<16xf32>
    %13 = vector.shape_cast %12 : vector<16xf32> to vector<16x1xf32>
    %cst_5 = arith.constant 3.200000e+01 : f32
    %14 = vector.broadcast %cst_5 : f32 to vector<16x1xf32>
    %15 = arith.divf %13, %14 : vector<16x1xf32>
    %16 = vector.broadcast %8 : vector<16x1xf32> to vector<16x32xf32>
    %17 = arith.subf %4, %16 : vector<16x32xf32>
    %cst_6 = arith.constant 9.99999974E-6 : f32
    %18 = vector.broadcast %cst_6 : f32 to vector<16x1xf32>
    %19 = arith.addf %15, %18 : vector<16x1xf32>
    %20 = math.rsqrt %19 : vector<16x1xf32>
    %21 = vector.broadcast %20 : vector<16x1xf32> to vector<16x32xf32>
    %22 = arith.mulf %17, %21 : vector<16x32xf32>
    %c0_7 = arith.constant 0 : index
    %c0_8 = arith.constant 0 : index
    %23 = vector.load %arg3[%c0_7, %c0_8] : memref<1x32xf32, #tpu.memory_space<vmem>>, vector<1x32xf32>
    %24 = vector.broadcast %23 : vector<1x32xf32> to vector<16x32xf32>
    %25 = arith.mulf %22, %24 : vector<16x32xf32>
    %c0_9 = arith.constant 0 : index
    %c0_10 = arith.constant 0 : index
    %26 = vector.load %arg4[%c0_9, %c0_10] : memref<1x32xf32, #tpu.memory_space<vmem>>, vector<1x32xf32>
    %27 = vector.broadcast %26 : vector<1x32xf32> to vector<16x32xf32>
    %28 = arith.addf %25, %27 : vector<16x32xf32>
    %29 = arith.truncf %28 : vector<16x32xf32> to vector<16x32xbf16>
    %c0_11 = arith.constant 0 : index
    %c0_12 = arith.constant 0 : index
    %30 = vector.load %arg5[%c0_11, %c0_12] : memref<16x32xbf16, #tpu.memory_space<vmem>>, vector<16x32xbf16>
    tpu.vector_store %arg5[%c0_11, %c0_12], %29 {strides = array<i32>} : memref<16x32xbf16, #tpu.memory_space<vmem>>, vector<16x32xbf16>,
    return
  }
  func.func @transform_0(%arg0: i32) -> (i32, i32) {
    %c0_i32 = arith.constant 0 : i32
    %c0_i32_0 = arith.constant 0 : i32
    return %arg0, %c0_i32 : i32, i32
  }
  func.func @transform_1(%arg0: i32) -> (i32, i32) {
    %c0_i32 = arith.constant 0 : i32
    %c0_i32_0 = arith.constant 0 : i32
    return %arg0, %c0_i32 : i32, i32
  }
  func.func @transform_2(%arg0: i32) -> (i32, i32) {
    %c0_i32 = arith.constant 0 : i32
    %c0_i32_0 = arith.constant 0 : i32
    %c0_i32_1 = arith.constant 0 : i32
    return %c0_i32, %c0_i32_0 : i32, i32
  }
  func.func @transform_3(%arg0: i32) -> (i32, i32) {
    %c0_i32 = arith.constant 0 : i32
    %c0_i32_0 = arith.constant 0 : i32
    %c0_i32_1 = arith.constant 0 : i32
    return %c0_i32, %c0_i32_0 : i32, i32
  }
  func.func @transform_4(%arg0: i32) -> (i32, i32) {
    %c0_i32 = arith.constant 0 : i32
    %c0_i32_0 = arith.constant 0 : i32
    return %arg0, %c0_i32 : i32, i32
  }
}

module attributes {stable_mosaic.version = 11 : i64} {
  func.func @_self_attention_kernel(%arg0: i32, %arg1: memref<1x8x96xbf16, #tpu.memory_space<vmem>>, %arg2: memref<1x1x8xf32, #tpu.memory_space<vmem>>, %arg3: memref<1x8x32xbf16, #tpu.memory_space<vmem>>) attributes {dimension_semantics = [#tpu.dimension_semantics<parallel>], iteration_bounds = array<i64: 2>, scalar_prefetch = 0 : i64, scratch_operands = 0 : i64, tpu.core_type = #tpu.core_type<tc>, window_params = [{transform_indices = @transform_0, window_bounds = array<i64: 1, 8, 96>}, {transform_indices = @transform_1, window_bounds = array<i64: 1, 1, 8>}, {transform_indices = @transform_2, window_bounds = array<i64: 1, 8, 32>}]} {
    %c0 = arith.constant 0 : index
    %c0_0 = arith.constant 0 : index
    %c0_1 = arith.constant 0 : index
    %0 = vector.load %arg1[%c0, %c0_0, %c0_1] : memref<1x8x96xbf16, #tpu.memory_space<vmem>>, vector<1x8x96xbf16>
    %1 = vector.shape_cast %0 : vector<1x8x96xbf16> to vector<8x96xbf16>
    %2 = vector.extract_strided_slice %1 {offsets = [0, 0], sizes = [8, 32], strides = [1, 1]} : vector<8x96xbf16> to vector<8x32xbf16>
    %3 = vector.extract_strided_slice %1 {offsets = [0, 32], sizes = [8, 32], strides = [1, 1]} : vector<8x96xbf16> to vector<8x32xbf16>
    %4 = vector.extract_strided_slice %1 {offsets = [0, 64], sizes = [8, 32], strides = [1, 1]} : vector<8x96xbf16> to vector<8x32xbf16>
    %c0_2 = arith.constant 0 : index
    %c0_3 = arith.constant 0 : index
    %c0_4 = arith.constant 0 : index
    %5 = vector.load %arg2[%c0_2, %c0_3, %c0_4] : memref<1x1x8xf32, #tpu.memory_space<vmem>>, vector<1x1x8xf32>
    %6 = vector.shape_cast %5 : vector<1x1x8xf32> to vector<1x8xf32>
    %cst = arith.constant 1.000000e+00 : f32
    %7 = vector.broadcast %cst : f32 to vector<1x8xf32>
    %8 = arith.subf %6, %7 : vector<1x8xf32>
    %cst_5 = arith.constant 1.000000e+09 : f32
    %9 = vector.broadcast %cst_5 : f32 to vector<1x8xf32>
    %10 = arith.mulf %8, %9 : vector<1x8xf32>
    %11 = vector.extract_strided_slice %2 {offsets = [0, 0], sizes = [8, 8], strides = [1, 1]} : vector<8x32xbf16> to vector<8x8xbf16>
    %12 = vector.extract_strided_slice %3 {offsets = [0, 0], sizes = [8, 8], strides = [1, 1]} : vector<8x32xbf16> to vector<8x8xbf16>
    %13 = vector.extract_strided_slice %4 {offsets = [0, 0], sizes = [8, 8], strides = [1, 1]} : vector<8x32xbf16> to vector<8x8xbf16>
    %cst_6 = arith.constant dense<0.000000e+00> : vector<8x8xf32>
    %14 = tpu.matmul %11, %12, %cst_6 {dimension_numbers = #tpu.dot_dimension_numbers<[1], [1], [0], [0], [0, 0, 1, 0], [], []>} : vector<8x8xbf16>, vector<8x8xbf16>, vector<8x8xf32> -> vector<8x8xf32>
    %cst_7 = arith.constant 0.353553385 : f32
    %15 = vector.broadcast %cst_7 : f32 to vector<8x8xf32>
    %16 = arith.mulf %14, %15 : vector<8x8xf32>
    %17 = vector.broadcast %10 : vector<1x8xf32> to vector<8x8xf32>
    %18 = arith.addf %16, %17 : vector<8x8xf32>
    %cst_8 = arith.constant dense<0xFF800000> : vector<8xf32>
    %19 = vector.multi_reduction <maximumf>, %18, %cst_8 [1] : vector<8x8xf32> to vector<8xf32>
    %20 = vector.shape_cast %19 : vector<8xf32> to vector<8x1xf32>
    %21 = vector.broadcast %20 : vector<8x1xf32> to vector<8x8xf32>
    %22 = arith.subf %18, %21 : vector<8x8xf32>
    %23 = math.exp %22 : vector<8x8xf32>
    %cst_9 = arith.constant dense<0.000000e+00> : vector<8xf32>
    %24 = vector.multi_reduction <add>, %23, %cst_9 [1] : vector<8x8xf32> to vector<8xf32>
    %25 = vector.shape_cast %24 : vector<8xf32> to vector<8x1xf32>
    %26 = tpu.reciprocal %25 {approx = true} : vector<8x1xf32> -> vector<8x1xf32>
    %27 = vector.broadcast %26 : vector<8x1xf32> to vector<8x8xf32>
    %28 = arith.mulf %23, %27 : vector<8x8xf32>
    %29 = arith.truncf %28 : vector<8x8xf32> to vector<8x8xbf16>
    %cst_10 = arith.constant dense<0.000000e+00> : vector<8x8xf32>
    %30 = tpu.matmul %29, %13, %cst_10 {dimension_numbers = #tpu.dot_dimension_numbers<[1], [0], [0], [1], [0, 0, 1, 1], [], []>} : vector<8x8xbf16>, vector<8x8xbf16>, vector<8x8xf32> -> vector<8x8xf32>
    %31 = vector.extract_strided_slice %2 {offsets = [0, 8], sizes = [8, 8], strides = [1, 1]} : vector<8x32xbf16> to vector<8x8xbf16>
    %32 = vector.extract_strided_slice %3 {offsets = [0, 8], sizes = [8, 8], strides = [1, 1]} : vector<8x32xbf16> to vector<8x8xbf16>
    %33 = vector.extract_strided_slice %4 {offsets = [0, 8], sizes = [8, 8], strides = [1, 1]} : vector<8x32xbf16> to vector<8x8xbf16>
    %cst_11 = arith.constant dense<0.000000e+00> : vector<8x8xf32>
    %34 = tpu.matmul %31, %32, %cst_11 {dimension_numbers = #tpu.dot_dimension_numbers<[1], [1], [0], [0], [0, 0, 1, 0], [], []>} : vector<8x8xbf16>, vector<8x8xbf16>, vector<8x8xf32> -> vector<8x8xf32>
    %cst_12 = arith.constant 0.353553385 : f32
    %35 = vector.broadcast %cst_12 : f32 to vector<8x8xf32>
    %36 = arith.mulf %34, %35 : vector<8x8xf32>
    %37 = vector.broadcast %10 : vector<1x8xf32> to vector<8x8xf32>
    %38 = arith.addf %36, %37 : vector<8x8xf32>
    %cst_13 = arith.constant dense<0xFF800000> : vector<8xf32>
    %39 = vector.multi_reduction <maximumf>, %38, %cst_13 [1] : vector<8x8xf32> to vector<8xf32>
    %40 = vector.shape_cast %39 : vector<8xf32> to vector<8x1xf32>
    %41 = vector.broadcast %40 : vector<8x1xf32> to vector<8x8xf32>
    %42 = arith.subf %38, %41 : vector<8x8xf32>
    %43 = math.exp %42 : vector<8x8xf32>
    %cst_14 = arith.constant dense<0.000000e+00> : vector<8xf32>
    %44 = vector.multi_reduction <add>, %43, %cst_14 [1] : vector<8x8xf32> to vector<8xf32>
    %45 = vector.shape_cast %44 : vector<8xf32> to vector<8x1xf32>
    %46 = tpu.reciprocal %45 {approx = true} : vector<8x1xf32> -> vector<8x1xf32>
    %47 = vector.broadcast %46 : vector<8x1xf32> to vector<8x8xf32>
    %48 = arith.mulf %43, %47 : vector<8x8xf32>
    %49 = arith.truncf %48 : vector<8x8xf32> to vector<8x8xbf16>
    %cst_15 = arith.constant dense<0.000000e+00> : vector<8x8xf32>
    %50 = tpu.matmul %49, %33, %cst_15 {dimension_numbers = #tpu.dot_dimension_numbers<[1], [0], [0], [1], [0, 0, 1, 1], [], []>} : vector<8x8xbf16>, vector<8x8xbf16>, vector<8x8xf32> -> vector<8x8xf32>
    %51 = vector.extract_strided_slice %2 {offsets = [0, 16], sizes = [8, 8], strides = [1, 1]} : vector<8x32xbf16> to vector<8x8xbf16>
    %52 = vector.extract_strided_slice %3 {offsets = [0, 16], sizes = [8, 8], strides = [1, 1]} : vector<8x32xbf16> to vector<8x8xbf16>
    %53 = vector.extract_strided_slice %4 {offsets = [0, 16], sizes = [8, 8], strides = [1, 1]} : vector<8x32xbf16> to vector<8x8xbf16>
    %cst_16 = arith.constant dense<0.000000e+00> : vector<8x8xf32>
    %54 = tpu.matmul %51, %52, %cst_16 {dimension_numbers = #tpu.dot_dimension_numbers<[1], [1], [0], [0], [0, 0, 1, 0], [], []>} : vector<8x8xbf16>, vector<8x8xbf16>, vector<8x8xf32> -> vector<8x8xf32>
    %cst_17 = arith.constant 0.353553385 : f32
    %55 = vector.broadcast %cst_17 : f32 to vector<8x8xf32>
    %56 = arith.mulf %54, %55 : vector<8x8xf32>
    %57 = vector.broadcast %10 : vector<1x8xf32> to vector<8x8xf32>
    %58 = arith.addf %56, %57 : vector<8x8xf32>
    %cst_18 = arith.constant dense<0xFF800000> : vector<8xf32>
    %59 = vector.multi_reduction <maximumf>, %58, %cst_18 [1] : vector<8x8xf32> to vector<8xf32>
    %60 = vector.shape_cast %59 : vector<8xf32> to vector<8x1xf32>
    %61 = vector.broadcast %60 : vector<8x1xf32> to vector<8x8xf32>
    %62 = arith.subf %58, %61 : vector<8x8xf32>
    %63 = math.exp %62 : vector<8x8xf32>
    %cst_19 = arith.constant dense<0.000000e+00> : vector<8xf32>
    %64 = vector.multi_reduction <add>, %63, %cst_19 [1] : vector<8x8xf32> to vector<8xf32>
    %65 = vector.shape_cast %64 : vector<8xf32> to vector<8x1xf32>
    %66 = tpu.reciprocal %65 {approx = true} : vector<8x1xf32> -> vector<8x1xf32>
    %67 = vector.broadcast %66 : vector<8x1xf32> to vector<8x8xf32>
    %68 = arith.mulf %63, %67 : vector<8x8xf32>
    %69 = arith.truncf %68 : vector<8x8xf32> to vector<8x8xbf16>
    %cst_20 = arith.constant dense<0.000000e+00> : vector<8x8xf32>
    %70 = tpu.matmul %69, %53, %cst_20 {dimension_numbers = #tpu.dot_dimension_numbers<[1], [0], [0], [1], [0, 0, 1, 1], [], []>} : vector<8x8xbf16>, vector<8x8xbf16>, vector<8x8xf32> -> vector<8x8xf32>
    %71 = vector.extract_strided_slice %2 {offsets = [0, 24], sizes = [8, 8], strides = [1, 1]} : vector<8x32xbf16> to vector<8x8xbf16>
    %72 = vector.extract_strided_slice %3 {offsets = [0, 24], sizes = [8, 8], strides = [1, 1]} : vector<8x32xbf16> to vector<8x8xbf16>
    %73 = vector.extract_strided_slice %4 {offsets = [0, 24], sizes = [8, 8], strides = [1, 1]} : vector<8x32xbf16> to vector<8x8xbf16>
    %cst_21 = arith.constant dense<0.000000e+00> : vector<8x8xf32>
    %74 = tpu.matmul %71, %72, %cst_21 {dimension_numbers = #tpu.dot_dimension_numbers<[1], [1], [0], [0], [0, 0, 1, 0], [], []>} : vector<8x8xbf16>, vector<8x8xbf16>, vector<8x8xf32> -> vector<8x8xf32>
    %cst_22 = arith.constant 0.353553385 : f32
    %75 = vector.broadcast %cst_22 : f32 to vector<8x8xf32>
    %76 = arith.mulf %74, %75 : vector<8x8xf32>
    %77 = vector.broadcast %10 : vector<1x8xf32> to vector<8x8xf32>
    %78 = arith.addf %76, %77 : vector<8x8xf32>
    %cst_23 = arith.constant dense<0xFF800000> : vector<8xf32>
    %79 = vector.multi_reduction <maximumf>, %78, %cst_23 [1] : vector<8x8xf32> to vector<8xf32>
    %80 = vector.shape_cast %79 : vector<8xf32> to vector<8x1xf32>
    %81 = vector.broadcast %80 : vector<8x1xf32> to vector<8x8xf32>
    %82 = arith.subf %78, %81 : vector<8x8xf32>
    %83 = math.exp %82 : vector<8x8xf32>
    %cst_24 = arith.constant dense<0.000000e+00> : vector<8xf32>
    %84 = vector.multi_reduction <add>, %83, %cst_24 [1] : vector<8x8xf32> to vector<8xf32>
    %85 = vector.shape_cast %84 : vector<8xf32> to vector<8x1xf32>
    %86 = tpu.reciprocal %85 {approx = true} : vector<8x1xf32> -> vector<8x1xf32>
    %87 = vector.broadcast %86 : vector<8x1xf32> to vector<8x8xf32>
    %88 = arith.mulf %83, %87 : vector<8x8xf32>
    %89 = arith.truncf %88 : vector<8x8xf32> to vector<8x8xbf16>
    %cst_25 = arith.constant dense<0.000000e+00> : vector<8x8xf32>
    %90 = tpu.matmul %89, %73, %cst_25 {dimension_numbers = #tpu.dot_dimension_numbers<[1], [0], [0], [1], [0, 0, 1, 1], [], []>} : vector<8x8xbf16>, vector<8x8xbf16>, vector<8x8xf32> -> vector<8x8xf32>
    %91 = tpu.concatenate %30, %50, %70, %90 in 1 : vector<8x8xf32>, vector<8x8xf32>, vector<8x8xf32>, vector<8x8xf32> -> vector<8x32xf32>
    %92 = arith.truncf %91 : vector<8x32xf32> to vector<8x32xbf16>
    %c0_26 = arith.constant 0 : index
    %c0_27 = arith.constant 0 : index
    %c0_28 = arith.constant 0 : index
    %93 = vector.load %arg3[%c0_26, %c0_27, %c0_28] : memref<1x8x32xbf16, #tpu.memory_space<vmem>>, vector<1x8x32xbf16>
    %94 = vector.shape_cast %93 : vector<1x8x32xbf16> to vector<8x32xbf16>
    %95 = vector.shape_cast %92 : vector<8x32xbf16> to vector<1x8x32xbf16>
    tpu.vector_store %arg3[%c0_26, %c0_27, %c0_28], %95 {strides = array<i32>} : memref<1x8x32xbf16, #tpu.memory_space<vmem>>, vector<1x8x32xbf16>,
    return
  }
  func.func @transform_0(%arg0: i32) -> (i32, i32, i32) {
    %c0_i32 = arith.constant 0 : i32
    %c0_i32_0 = arith.constant 0 : i32
    %c0_i32_1 = arith.constant 0 : i32
    return %arg0, %c0_i32, %c0_i32_0 : i32, i32, i32
  }
  func.func @transform_1(%arg0: i32) -> (i32, i32, i32) {
    %c0_i32 = arith.constant 0 : i32
    %c0_i32_0 = arith.constant 0 : i32
    %c0_i32_1 = arith.constant 0 : i32
    return %arg0, %c0_i32, %c0_i32_0 : i32, i32, i32
  }
  func.func @transform_2(%arg0: i32) -> (i32, i32, i32) {
    %c0_i32 = arith.constant 0 : i32
    %c0_i32_0 = arith.constant 0 : i32
    %c0_i32_1 = arith.constant 0 : i32
    return %arg0, %c0_i32, %c0_i32_0 : i32, i32, i32
  }
}

module attributes {stable_mosaic.version = 11 : i64} {
  func.func @_linear_kernel(%arg0: i32, %arg1: i32, %arg2: i32, %arg3: memref<16x32xbf16, #tpu.memory_space<vmem>>, %arg4: memref<32x64xbf16, #tpu.memory_space<vmem>>, %arg5: memref<1x64xf32, #tpu.memory_space<vmem>>, %arg6: memref<16x64xbf16, #tpu.memory_space<vmem>>, %arg7: memref<16x64xf32, #tpu.memory_space<vmem>>) attributes {dimension_semantics = [#tpu.dimension_semantics<parallel>, #tpu.dimension_semantics<parallel>, #tpu.dimension_semantics<arbitrary>], iteration_bounds = array<i64: 1, 1, 1>, scalar_prefetch = 0 : i64, scratch_operands = 1 : i64, tpu.core_type = #tpu.core_type<tc>, window_params = [{transform_indices = @transform_0, window_bounds = array<i64: 16, 32>}, {transform_indices = @transform_1, window_bounds = array<i64: 32, 64>}, {transform_indices = @transform_2, window_bounds = array<i64: 1, 64>}, {transform_indices = @transform_3, window_bounds = array<i64: 16, 64>}]} {
    %c0_i32 = arith.constant 0 : i32
    %0 = arith.cmpi eq, %arg2, %c0_i32 : i32
    %1 = arith.extui %0 : i1 to i32
    %c0_i32_0 = arith.constant 0 : i32
    %2 = arith.cmpi ne, %1, %c0_i32_0 : i32
    scf.if %2 {
      %cst_10 = arith.constant 0.000000e+00 : f32
      %12 = vector.broadcast %cst_10 : f32 to vector<16x64xf32>
      %c0_11 = arith.constant 0 : index
      %c0_12 = arith.constant 0 : index
      %13 = vector.load %arg7[%c0_11, %c0_12] : memref<16x64xf32, #tpu.memory_space<vmem>>, vector<16x64xf32>
      tpu.vector_store %arg7[%c0_11, %c0_12], %12 {strides = array<i32>} : memref<16x64xf32, #tpu.memory_space<vmem>>, vector<16x64xf32>,
    } else {
    }
    %c0 = arith.constant 0 : index
    %c0_1 = arith.constant 0 : index
    %3 = vector.load %arg7[%c0, %c0_1] : memref<16x64xf32, #tpu.memory_space<vmem>>, vector<16x64xf32>
    %c0_2 = arith.constant 0 : index
    %c0_3 = arith.constant 0 : index
    %4 = vector.load %arg3[%c0_2, %c0_3] : memref<16x32xbf16, #tpu.memory_space<vmem>>, vector<16x32xbf16>
    %c0_4 = arith.constant 0 : index
    %c0_5 = arith.constant 0 : index
    %5 = vector.load %arg4[%c0_4, %c0_5] : memref<32x64xbf16, #tpu.memory_space<vmem>>, vector<32x64xbf16>
    %cst = arith.constant dense<0.000000e+00> : vector<16x64xf32>
    %6 = tpu.matmul %4, %5, %cst {dimension_numbers = #tpu.dot_dimension_numbers<[1], [0], [0], [1], [0, 0, 1, 1], [], []>} : vector<16x32xbf16>, vector<32x64xbf16>, vector<16x64xf32> -> vector<16x64xf32>
    %7 = arith.addf %3, %6 : vector<16x64xf32>
    %c0_6 = arith.constant 0 : index
    %c0_7 = arith.constant 0 : index
    %8 = vector.load %arg7[%c0_6, %c0_7] : memref<16x64xf32, #tpu.memory_space<vmem>>, vector<16x64xf32>
    tpu.vector_store %arg7[%c0_6, %c0_7], %7 {strides = array<i32>} : memref<16x64xf32, #tpu.memory_space<vmem>>, vector<16x64xf32>,
    %c0_i32_8 = arith.constant 0 : i32
    %9 = arith.cmpi eq, %arg2, %c0_i32_8 : i32
    %10 = arith.extui %9 : i1 to i32
    %c0_i32_9 = arith.constant 0 : i32
    %11 = arith.cmpi ne, %10, %c0_i32_9 : i32
    scf.if %11 {
      %c0_10 = arith.constant 0 : index
      %c0_11 = arith.constant 0 : index
      %12 = vector.load %arg7[%c0_10, %c0_11] : memref<16x64xf32, #tpu.memory_space<vmem>>, vector<16x64xf32>
      %c0_12 = arith.constant 0 : index
      %c0_13 = arith.constant 0 : index
      %13 = vector.load %arg5[%c0_12, %c0_13] : memref<1x64xf32, #tpu.memory_space<vmem>>, vector<1x64xf32>
      %14 = vector.broadcast %13 : vector<1x64xf32> to vector<16x64xf32>
      %15 = arith.addf %12, %14 : vector<16x64xf32>
      %16 = arith.negf %15 : vector<16x64xf32>
      %17 = math.exp %16 : vector<16x64xf32>
      %cst_14 = arith.constant 1.000000e+00 : f32
      %18 = vector.broadcast %cst_14 : f32 to vector<16x64xf32>
      %19 = arith.addf %18, %17 : vector<16x64xf32>
      %20 = arith.divf %18, %19 : vector<16x64xf32>
      %21 = arith.mulf %15, %20 : vector<16x64xf32>
      %22 = arith.truncf %21 : vector<16x64xf32> to vector<16x64xbf16>
      %c0_15 = arith.constant 0 : index
      %c0_16 = arith.constant 0 : index
      %23 = vector.load %arg6[%c0_15, %c0_16] : memref<16x64xbf16, #tpu.memory_space<vmem>>, vector<16x64xbf16>
      tpu.vector_store %arg6[%c0_15, %c0_16], %22 {strides = array<i32>} : memref<16x64xbf16, #tpu.memory_space<vmem>>, vector<16x64xbf16>,
    } else {
    }
    return
  }
  func.func @transform_0(%arg0: i32, %arg1: i32, %arg2: i32) -> (i32, i32) {
    %c0_i32 = arith.constant 0 : i32
    return %arg0, %arg2 : i32, i32
  }
  func.func @transform_1(%arg0: i32, %arg1: i32, %arg2: i32) -> (i32, i32) {
    %c0_i32 = arith.constant 0 : i32
    return %arg2, %arg1 : i32, i32
  }
  func.func @transform_2(%arg0: i32, %arg1: i32, %arg2: i32) -> (i32, i32) {
    %c0_i32 = arith.constant 0 : i32
    %c0_i32_0 = arith.constant 0 : i32
    return %c0_i32, %arg1 : i32, i32
  }
  func.func @transform_3(%arg0: i32, %arg1: i32, %arg2: i32) -> (i32, i32) {
    %c0_i32 = arith.constant 0 : i32
    return %arg0, %arg1 : i32, i32
  }
}

module attributes {stable_mosaic.version = 11 : i64} {
  func.func @_linear_kernel(%arg0: i32, %arg1: i32, %arg2: i32, %arg3: memref<16x32xbf16, #tpu.memory_space<vmem>>, %arg4: memref<32x64xbf16, #tpu.memory_space<vmem>>, %arg5: memref<1x64xf32, #tpu.memory_space<vmem>>, %arg6: memref<16x64xbf16, #tpu.memory_space<vmem>>, %arg7: memref<16x64xf32, #tpu.memory_space<vmem>>) attributes {dimension_semantics = [#tpu.dimension_semantics<parallel>, #tpu.dimension_semantics<parallel>, #tpu.dimension_semantics<arbitrary>], iteration_bounds = array<i64: 1, 1, 1>, scalar_prefetch = 0 : i64, scratch_operands = 1 : i64, tpu.core_type = #tpu.core_type<tc>, window_params = [{transform_indices = @transform_0, window_bounds = array<i64: 16, 32>}, {transform_indices = @transform_1, window_bounds = array<i64: 32, 64>}, {transform_indices = @transform_2, window_bounds = array<i64: 1, 64>}, {transform_indices = @transform_3, window_bounds = array<i64: 16, 64>}]} {
    %c0_i32 = arith.constant 0 : i32
    %0 = arith.cmpi eq, %arg2, %c0_i32 : i32
    %1 = arith.extui %0 : i1 to i32
    %c0_i32_0 = arith.constant 0 : i32
    %2 = arith.cmpi ne, %1, %c0_i32_0 : i32
    scf.if %2 {
      %cst_10 = arith.constant 0.000000e+00 : f32
      %12 = vector.broadcast %cst_10 : f32 to vector<16x64xf32>
      %c0_11 = arith.constant 0 : index
      %c0_12 = arith.constant 0 : index
      %13 = vector.load %arg7[%c0_11, %c0_12] : memref<16x64xf32, #tpu.memory_space<vmem>>, vector<16x64xf32>
      tpu.vector_store %arg7[%c0_11, %c0_12], %12 {strides = array<i32>} : memref<16x64xf32, #tpu.memory_space<vmem>>, vector<16x64xf32>,
    } else {
    }
    %c0 = arith.constant 0 : index
    %c0_1 = arith.constant 0 : index
    %3 = vector.load %arg7[%c0, %c0_1] : memref<16x64xf32, #tpu.memory_space<vmem>>, vector<16x64xf32>
    %c0_2 = arith.constant 0 : index
    %c0_3 = arith.constant 0 : index
    %4 = vector.load %arg3[%c0_2, %c0_3] : memref<16x32xbf16, #tpu.memory_space<vmem>>, vector<16x32xbf16>
    %c0_4 = arith.constant 0 : index
    %c0_5 = arith.constant 0 : index
    %5 = vector.load %arg4[%c0_4, %c0_5] : memref<32x64xbf16, #tpu.memory_space<vmem>>, vector<32x64xbf16>
    %cst = arith.constant dense<0.000000e+00> : vector<16x64xf32>
    %6 = tpu.matmul %4, %5, %cst {dimension_numbers = #tpu.dot_dimension_numbers<[1], [0], [0], [1], [0, 0, 1, 1], [], []>} : vector<16x32xbf16>, vector<32x64xbf16>, vector<16x64xf32> -> vector<16x64xf32>
    %7 = arith.addf %3, %6 : vector<16x64xf32>
    %c0_6 = arith.constant 0 : index
    %c0_7 = arith.constant 0 : index
    %8 = vector.load %arg7[%c0_6, %c0_7] : memref<16x64xf32, #tpu.memory_space<vmem>>, vector<16x64xf32>
    tpu.vector_store %arg7[%c0_6, %c0_7], %7 {strides = array<i32>} : memref<16x64xf32, #tpu.memory_space<vmem>>, vector<16x64xf32>,
    %c0_i32_8 = arith.constant 0 : i32
    %9 = arith.cmpi eq, %arg2, %c0_i32_8 : i32
    %10 = arith.extui %9 : i1 to i32
    %c0_i32_9 = arith.constant 0 : i32
    %11 = arith.cmpi ne, %10, %c0_i32_9 : i32
    scf.if %11 {
      %c0_10 = arith.constant 0 : index
      %c0_11 = arith.constant 0 : index
      %12 = vector.load %arg7[%c0_10, %c0_11] : memref<16x64xf32, #tpu.memory_space<vmem>>, vector<16x64xf32>
      %c0_12 = arith.constant 0 : index
      %c0_13 = arith.constant 0 : index
      %13 = vector.load %arg5[%c0_12, %c0_13] : memref<1x64xf32, #tpu.memory_space<vmem>>, vector<1x64xf32>
      %14 = vector.broadcast %13 : vector<1x64xf32> to vector<16x64xf32>
      %15 = arith.addf %12, %14 : vector<16x64xf32>
      %16 = arith.truncf %15 : vector<16x64xf32> to vector<16x64xbf16>
      %c0_14 = arith.constant 0 : index
      %c0_15 = arith.constant 0 : index
      %17 = vector.load %arg6[%c0_14, %c0_15] : memref<16x64xbf16, #tpu.memory_space<vmem>>, vector<16x64xbf16>
      tpu.vector_store %arg6[%c0_14, %c0_15], %16 {strides = array<i32>} : memref<16x64xbf16, #tpu.memory_space<vmem>>, vector<16x64xbf16>,
    } else {
    }
    return
  }
  func.func @transform_0(%arg0: i32, %arg1: i32, %arg2: i32) -> (i32, i32) {
    %c0_i32 = arith.constant 0 : i32
    return %arg0, %arg2 : i32, i32
  }
  func.func @transform_1(%arg0: i32, %arg1: i32, %arg2: i32) -> (i32, i32) {
    %c0_i32 = arith.constant 0 : i32
    return %arg2, %arg1 : i32, i32
  }
  func.func @transform_2(%arg0: i32, %arg1: i32, %arg2: i32) -> (i32, i32) {
    %c0_i32 = arith.constant 0 : i32
    %c0_i32_0 = arith.constant 0 : i32
    return %c0_i32, %arg1 : i32, i32
  }
  func.func @transform_3(%arg0: i32, %arg1: i32, %arg2: i32) -> (i32, i32) {
    %c0_i32 = arith.constant 0 : i32
    return %arg0, %arg1 : i32, i32
  }
}

module attributes {stable_mosaic.version = 11 : i64} {
  func.func @_linear_kernel(%arg0: i32, %arg1: i32, %arg2: i32, %arg3: memref<16x64xbf16, #tpu.memory_space<vmem>>, %arg4: memref<64x32xbf16, #tpu.memory_space<vmem>>, %arg5: memref<1x32xf32, #tpu.memory_space<vmem>>, %arg6: memref<16x32xbf16, #tpu.memory_space<vmem>>, %arg7: memref<16x32xf32, #tpu.memory_space<vmem>>) attributes {dimension_semantics = [#tpu.dimension_semantics<parallel>, #tpu.dimension_semantics<parallel>, #tpu.dimension_semantics<arbitrary>], iteration_bounds = array<i64: 1, 1, 1>, scalar_prefetch = 0 : i64, scratch_operands = 1 : i64, tpu.core_type = #tpu.core_type<tc>, window_params = [{transform_indices = @transform_0, window_bounds = array<i64: 16, 64>}, {transform_indices = @transform_1, window_bounds = array<i64: 64, 32>}, {transform_indices = @transform_2, window_bounds = array<i64: 1, 32>}, {transform_indices = @transform_3, window_bounds = array<i64: 16, 32>}]} {
    %c0_i32 = arith.constant 0 : i32
    %0 = arith.cmpi eq, %arg2, %c0_i32 : i32
    %1 = arith.extui %0 : i1 to i32
    %c0_i32_0 = arith.constant 0 : i32
    %2 = arith.cmpi ne, %1, %c0_i32_0 : i32
    scf.if %2 {
      %cst_10 = arith.constant 0.000000e+00 : f32
      %12 = vector.broadcast %cst_10 : f32 to vector<16x32xf32>
      %c0_11 = arith.constant 0 : index
      %c0_12 = arith.constant 0 : index
      %13 = vector.load %arg7[%c0_11, %c0_12] : memref<16x32xf32, #tpu.memory_space<vmem>>, vector<16x32xf32>
      tpu.vector_store %arg7[%c0_11, %c0_12], %12 {strides = array<i32>} : memref<16x32xf32, #tpu.memory_space<vmem>>, vector<16x32xf32>,
    } else {
    }
    %c0 = arith.constant 0 : index
    %c0_1 = arith.constant 0 : index
    %3 = vector.load %arg7[%c0, %c0_1] : memref<16x32xf32, #tpu.memory_space<vmem>>, vector<16x32xf32>
    %c0_2 = arith.constant 0 : index
    %c0_3 = arith.constant 0 : index
    %4 = vector.load %arg3[%c0_2, %c0_3] : memref<16x64xbf16, #tpu.memory_space<vmem>>, vector<16x64xbf16>
    %c0_4 = arith.constant 0 : index
    %c0_5 = arith.constant 0 : index
    %5 = vector.load %arg4[%c0_4, %c0_5] : memref<64x32xbf16, #tpu.memory_space<vmem>>, vector<64x32xbf16>
    %cst = arith.constant dense<0.000000e+00> : vector<16x32xf32>
    %6 = tpu.matmul %4, %5, %cst {dimension_numbers = #tpu.dot_dimension_numbers<[1], [0], [0], [1], [0, 0, 1, 1], [], []>} : vector<16x64xbf16>, vector<64x32xbf16>, vector<16x32xf32> -> vector<16x32xf32>
    %7 = arith.addf %3, %6 : vector<16x32xf32>
    %c0_6 = arith.constant 0 : index
    %c0_7 = arith.constant 0 : index
    %8 = vector.load %arg7[%c0_6, %c0_7] : memref<16x32xf32, #tpu.memory_space<vmem>>, vector<16x32xf32>
    tpu.vector_store %arg7[%c0_6, %c0_7], %7 {strides = array<i32>} : memref<16x32xf32, #tpu.memory_space<vmem>>, vector<16x32xf32>,
    %c0_i32_8 = arith.constant 0 : i32
    %9 = arith.cmpi eq, %arg2, %c0_i32_8 : i32
    %10 = arith.extui %9 : i1 to i32
    %c0_i32_9 = arith.constant 0 : i32
    %11 = arith.cmpi ne, %10, %c0_i32_9 : i32
    scf.if %11 {
      %c0_10 = arith.constant 0 : index
      %c0_11 = arith.constant 0 : index
      %12 = vector.load %arg7[%c0_10, %c0_11] : memref<16x32xf32, #tpu.memory_space<vmem>>, vector<16x32xf32>
      %c0_12 = arith.constant 0 : index
      %c0_13 = arith.constant 0 : index
      %13 = vector.load %arg5[%c0_12, %c0_13] : memref<1x32xf32, #tpu.memory_space<vmem>>, vector<1x32xf32>
      %14 = vector.broadcast %13 : vector<1x32xf32> to vector<16x32xf32>
      %15 = arith.addf %12, %14 : vector<16x32xf32>
      %16 = arith.truncf %15 : vector<16x32xf32> to vector<16x32xbf16>
      %c0_14 = arith.constant 0 : index
      %c0_15 = arith.constant 0 : index
      %17 = vector.load %arg6[%c0_14, %c0_15] : memref<16x32xbf16, #tpu.memory_space<vmem>>, vector<16x32xbf16>
      tpu.vector_store %arg6[%c0_14, %c0_15], %16 {strides = array<i32>} : memref<16x32xbf16, #tpu.memory_space<vmem>>, vector<16x32xbf16>,
    } else {
    }
    return
  }
  func.func @transform_0(%arg0: i32, %arg1: i32, %arg2: i32) -> (i32, i32) {
    %c0_i32 = arith.constant 0 : i32
    return %arg0, %arg2 : i32, i32
  }
  func.func @transform_1(%arg0: i32, %arg1: i32, %arg2: i32) -> (i32, i32) {
    %c0_i32 = arith.constant 0 : i32
    return %arg2, %arg1 : i32, i32
  }
  func.func @transform_2(%arg0: i32, %arg1: i32, %arg2: i32) -> (i32, i32) {
    %c0_i32 = arith.constant 0 : i32
    %c0_i32_0 = arith.constant 0 : i32
    return %c0_i32, %arg1 : i32, i32
  }
  func.func @transform_3(%arg0: i32, %arg1: i32, %arg2: i32) -> (i32, i32) {
    %c0_i32 = arith.constant 0 : i32
    return %arg0, %arg1 : i32, i32
  }
}

module attributes {stable_mosaic.version = 11 : i64} {
  func.func @_self_attention_kernel(%arg0: i32, %arg1: memref<1x8x96xbf16, #tpu.memory_space<vmem>>, %arg2: memref<1x1x8xf32, #tpu.memory_space<vmem>>, %arg3: memref<1x8x32xbf16, #tpu.memory_space<vmem>>) attributes {dimension_semantics = [#tpu.dimension_semantics<parallel>], iteration_bounds = array<i64: 2>, scalar_prefetch = 0 : i64, scratch_operands = 0 : i64, tpu.core_type = #tpu.core_type<tc>, window_params = [{transform_indices = @transform_0, window_bounds = array<i64: 1, 8, 96>}, {transform_indices = @transform_1, window_bounds = array<i64: 1, 1, 8>}, {transform_indices = @transform_2, window_bounds = array<i64: 1, 8, 32>}]} {
    %c0 = arith.constant 0 : index
    %c0_0 = arith.constant 0 : index
    %c0_1 = arith.constant 0 : index
    %0 = vector.load %arg1[%c0, %c0_0, %c0_1] : memref<1x8x96xbf16, #tpu.memory_space<vmem>>, vector<1x8x96xbf16>
    %1 = vector.shape_cast %0 : vector<1x8x96xbf16> to vector<8x96xbf16>
    %2 = vector.extract_strided_slice %1 {offsets = [0, 0], sizes = [8, 32], strides = [1, 1]} : vector<8x96xbf16> to vector<8x32xbf16>
    %3 = vector.extract_strided_slice %1 {offsets = [0, 32], sizes = [8, 32], strides = [1, 1]} : vector<8x96xbf16> to vector<8x32xbf16>
    %4 = vector.extract_strided_slice %1 {offsets = [0, 64], sizes = [8, 32], strides = [1, 1]} : vector<8x96xbf16> to vector<8x32xbf16>
    %c0_2 = arith.constant 0 : index
    %c0_3 = arith.constant 0 : index
    %c0_4 = arith.constant 0 : index
    %5 = vector.load %arg2[%c0_2, %c0_3, %c0_4] : memref<1x1x8xf32, #tpu.memory_space<vmem>>, vector<1x1x8xf32>
    %6 = vector.shape_cast %5 : vector<1x1x8xf32> to vector<1x8xf32>
    %cst = arith.constant 1.000000e+00 : f32
    %7 = vector.broadcast %cst : f32 to vector<1x8xf32>
    %8 = arith.subf %6, %7 : vector<1x8xf32>
    %cst_5 = arith.constant 1.000000e+09 : f32
    %9 = vector.broadcast %cst_5 : f32 to vector<1x8xf32>
    %10 = arith.mulf %8, %9 : vector<1x8xf32>
    %11 = tpu.iota {dimensions = array<i32: 0>} : vector<8x8xi32>
    %12 = tpu.iota {dimensions = array<i32: 1>} : vector<8x8xi32>
    %13 = arith.cmpi sle, %12, %11 : vector<8x8xi32>
    %cst_6 = arith.constant 0.000000e+00 : f32
    %cst_7 = arith.constant -1.000000e+09 : f32
    %14 = vector.broadcast %cst_6 : f32 to vector<8x8xf32>
    %15 = vector.broadcast %cst_7 : f32 to vector<8x8xf32>
    %16 = arith.select %13, %14, %15 : vector<8x8xi1>, vector<8x8xf32>
    %17 = vector.broadcast %10 : vector<1x8xf32> to vector<8x8xf32>
    %18 = arith.addf %17, %16 : vector<8x8xf32>
    %19 = vector.extract_strided_slice %2 {offsets = [0, 0], sizes = [8, 8], strides = [1, 1]} : vector<8x32xbf16> to vector<8x8xbf16>
    %20 = vector.extract_strided_slice %3 {offsets = [0, 0], sizes = [8, 8], strides = [1, 1]} : vector<8x32xbf16> to vector<8x8xbf16>
    %21 = vector.extract_strided_slice %4 {offsets = [0, 0], sizes = [8, 8], strides = [1, 1]} : vector<8x32xbf16> to vector<8x8xbf16>
    %cst_8 = arith.constant dense<0.000000e+00> : vector<8x8xf32>
    %22 = tpu.matmul %19, %20, %cst_8 {dimension_numbers = #tpu.dot_dimension_numbers<[1], [1], [0], [0], [0, 0, 1, 0], [], []>} : vector<8x8xbf16>, vector<8x8xbf16>, vector<8x8xf32> -> vector<8x8xf32>
    %cst_9 = arith.constant 0.353553385 : f32
    %23 = vector.broadcast %cst_9 : f32 to vector<8x8xf32>
    %24 = arith.mulf %22, %23 : vector<8x8xf32>
    %25 = arith.addf %24, %18 : vector<8x8xf32>
    %cst_10 = arith.constant dense<0xFF800000> : vector<8xf32>
    %26 = vector.multi_reduction <maximumf>, %25, %cst_10 [1] : vector<8x8xf32> to vector<8xf32>
    %27 = vector.shape_cast %26 : vector<8xf32> to vector<8x1xf32>
    %28 = vector.broadcast %27 : vector<8x1xf32> to vector<8x8xf32>
    %29 = arith.subf %25, %28 : vector<8x8xf32>
    %30 = math.exp %29 : vector<8x8xf32>
    %cst_11 = arith.constant dense<0.000000e+00> : vector<8xf32>
    %31 = vector.multi_reduction <add>, %30, %cst_11 [1] : vector<8x8xf32> to vector<8xf32>
    %32 = vector.shape_cast %31 : vector<8xf32> to vector<8x1xf32>
    %33 = tpu.reciprocal %32 {approx = true} : vector<8x1xf32> -> vector<8x1xf32>
    %34 = vector.broadcast %33 : vector<8x1xf32> to vector<8x8xf32>
    %35 = arith.mulf %30, %34 : vector<8x8xf32>
    %36 = arith.truncf %35 : vector<8x8xf32> to vector<8x8xbf16>
    %cst_12 = arith.constant dense<0.000000e+00> : vector<8x8xf32>
    %37 = tpu.matmul %36, %21, %cst_12 {dimension_numbers = #tpu.dot_dimension_numbers<[1], [0], [0], [1], [0, 0, 1, 1], [], []>} : vector<8x8xbf16>, vector<8x8xbf16>, vector<8x8xf32> -> vector<8x8xf32>
    %38 = vector.extract_strided_slice %2 {offsets = [0, 8], sizes = [8, 8], strides = [1, 1]} : vector<8x32xbf16> to vector<8x8xbf16>
    %39 = vector.extract_strided_slice %3 {offsets = [0, 8], sizes = [8, 8], strides = [1, 1]} : vector<8x32xbf16> to vector<8x8xbf16>
    %40 = vector.extract_strided_slice %4 {offsets = [0, 8], sizes = [8, 8], strides = [1, 1]} : vector<8x32xbf16> to vector<8x8xbf16>
    %cst_13 = arith.constant dense<0.000000e+00> : vector<8x8xf32>
    %41 = tpu.matmul %38, %39, %cst_13 {dimension_numbers = #tpu.dot_dimension_numbers<[1], [1], [0], [0], [0, 0, 1, 0], [], []>} : vector<8x8xbf16>, vector<8x8xbf16>, vector<8x8xf32> -> vector<8x8xf32>
    %cst_14 = arith.constant 0.353553385 : f32
    %42 = vector.broadcast %cst_14 : f32 to vector<8x8xf32>
    %43 = arith.mulf %41, %42 : vector<8x8xf32>
    %44 = arith.addf %43, %18 : vector<8x8xf32>
    %cst_15 = arith.constant dense<0xFF800000> : vector<8xf32>
    %45 = vector.multi_reduction <maximumf>, %44, %cst_15 [1] : vector<8x8xf32> to vector<8xf32>
    %46 = vector.shape_cast %45 : vector<8xf32> to vector<8x1xf32>
    %47 = vector.broadcast %46 : vector<8x1xf32> to vector<8x8xf32>
    %48 = arith.subf %44, %47 : vector<8x8xf32>
    %49 = math.exp %48 : vector<8x8xf32>
    %cst_16 = arith.constant dense<0.000000e+00> : vector<8xf32>
    %50 = vector.multi_reduction <add>, %49, %cst_16 [1] : vector<8x8xf32> to vector<8xf32>
    %51 = vector.shape_cast %50 : vector<8xf32> to vector<8x1xf32>
    %52 = tpu.reciprocal %51 {approx = true} : vector<8x1xf32> -> vector<8x1xf32>
    %53 = vector.broadcast %52 : vector<8x1xf32> to vector<8x8xf32>
    %54 = arith.mulf %49, %53 : vector<8x8xf32>
    %55 = arith.truncf %54 : vector<8x8xf32> to vector<8x8xbf16>
    %cst_17 = arith.constant dense<0.000000e+00> : vector<8x8xf32>
    %56 = tpu.matmul %55, %40, %cst_17 {dimension_numbers = #tpu.dot_dimension_numbers<[1], [0], [0], [1], [0, 0, 1, 1], [], []>} : vector<8x8xbf16>, vector<8x8xbf16>, vector<8x8xf32> -> vector<8x8xf32>
    %57 = vector.extract_strided_slice %2 {offsets = [0, 16], sizes = [8, 8], strides = [1, 1]} : vector<8x32xbf16> to vector<8x8xbf16>
    %58 = vector.extract_strided_slice %3 {offsets = [0, 16], sizes = [8, 8], strides = [1, 1]} : vector<8x32xbf16> to vector<8x8xbf16>
    %59 = vector.extract_strided_slice %4 {offsets = [0, 16], sizes = [8, 8], strides = [1, 1]} : vector<8x32xbf16> to vector<8x8xbf16>
    %cst_18 = arith.constant dense<0.000000e+00> : vector<8x8xf32>
    %60 = tpu.matmul %57, %58, %cst_18 {dimension_numbers = #tpu.dot_dimension_numbers<[1], [1], [0], [0], [0, 0, 1, 0], [], []>} : vector<8x8xbf16>, vector<8x8xbf16>, vector<8x8xf32> -> vector<8x8xf32>
    %cst_19 = arith.constant 0.353553385 : f32
    %61 = vector.broadcast %cst_19 : f32 to vector<8x8xf32>
    %62 = arith.mulf %60, %61 : vector<8x8xf32>
    %63 = arith.addf %62, %18 : vector<8x8xf32>
    %cst_20 = arith.constant dense<0xFF800000> : vector<8xf32>
    %64 = vector.multi_reduction <maximumf>, %63, %cst_20 [1] : vector<8x8xf32> to vector<8xf32>
    %65 = vector.shape_cast %64 : vector<8xf32> to vector<8x1xf32>
    %66 = vector.broadcast %65 : vector<8x1xf32> to vector<8x8xf32>
    %67 = arith.subf %63, %66 : vector<8x8xf32>
    %68 = math.exp %67 : vector<8x8xf32>
    %cst_21 = arith.constant dense<0.000000e+00> : vector<8xf32>
    %69 = vector.multi_reduction <add>, %68, %cst_21 [1] : vector<8x8xf32> to vector<8xf32>
    %70 = vector.shape_cast %69 : vector<8xf32> to vector<8x1xf32>
    %71 = tpu.reciprocal %70 {approx = true} : vector<8x1xf32> -> vector<8x1xf32>
    %72 = vector.broadcast %71 : vector<8x1xf32> to vector<8x8xf32>
    %73 = arith.mulf %68, %72 : vector<8x8xf32>
    %74 = arith.truncf %73 : vector<8x8xf32> to vector<8x8xbf16>
    %cst_22 = arith.constant dense<0.000000e+00> : vector<8x8xf32>
    %75 = tpu.matmul %74, %59, %cst_22 {dimension_numbers = #tpu.dot_dimension_numbers<[1], [0], [0], [1], [0, 0, 1, 1], [], []>} : vector<8x8xbf16>, vector<8x8xbf16>, vector<8x8xf32> -> vector<8x8xf32>
    %76 = vector.extract_strided_slice %2 {offsets = [0, 24], sizes = [8, 8], strides = [1, 1]} : vector<8x32xbf16> to vector<8x8xbf16>
    %77 = vector.extract_strided_slice %3 {offsets = [0, 24], sizes = [8, 8], strides = [1, 1]} : vector<8x32xbf16> to vector<8x8xbf16>
    %78 = vector.extract_strided_slice %4 {offsets = [0, 24], sizes = [8, 8], strides = [1, 1]} : vector<8x32xbf16> to vector<8x8xbf16>
    %cst_23 = arith.constant dense<0.000000e+00> : vector<8x8xf32>
    %79 = tpu.matmul %76, %77, %cst_23 {dimension_numbers = #tpu.dot_dimension_numbers<[1], [1], [0], [0], [0, 0, 1, 0], [], []>} : vector<8x8xbf16>, vector<8x8xbf16>, vector<8x8xf32> -> vector<8x8xf32>
    %cst_24 = arith.constant 0.353553385 : f32
    %80 = vector.broadcast %cst_24 : f32 to vector<8x8xf32>
    %81 = arith.mulf %79, %80 : vector<8x8xf32>
    %82 = arith.addf %81, %18 : vector<8x8xf32>
    %cst_25 = arith.constant dense<0xFF800000> : vector<8xf32>
    %83 = vector.multi_reduction <maximumf>, %82, %cst_25 [1] : vector<8x8xf32> to vector<8xf32>
    %84 = vector.shape_cast %83 : vector<8xf32> to vector<8x1xf32>
    %85 = vector.broadcast %84 : vector<8x1xf32> to vector<8x8xf32>
    %86 = arith.subf %82, %85 : vector<8x8xf32>
    %87 = math.exp %86 : vector<8x8xf32>
    %cst_26 = arith.constant dense<0.000000e+00> : vector<8xf32>
    %88 = vector.multi_reduction <add>, %87, %cst_26 [1] : vector<8x8xf32> to vector<8xf32>
    %89 = vector.shape_cast %88 : vector<8xf32> to vector<8x1xf32>
    %90 = tpu.reciprocal %89 {approx = true} : vector<8x1xf32> -> vector<8x1xf32>
    %91 = vector.broadcast %90 : vector<8x1xf32> to vector<8x8xf32>
    %92 = arith.mulf %87, %91 : vector<8x8xf32>
    %93 = arith.truncf %92 : vector<8x8xf32> to vector<8x8xbf16>
    %cst_27 = arith.constant dense<0.000000e+00> : vector<8x8xf32>
    %94 = tpu.matmul %93, %78, %cst_27 {dimension_numbers = #tpu.dot_dimension_numbers<[1], [0], [0], [1], [0, 0, 1, 1], [], []>} : vector<8x8xbf16>, vector<8x8xbf16>, vector<8x8xf32> -> vector<8x8xf32>
    %95 = tpu.concatenate %37, %56, %75, %94 in 1 : vector<8x8xf32>, vector<8x8xf32>, vector<8x8xf32>, vector<8x8xf32> -> vector<8x32xf32>
    %96 = arith.truncf %95 : vector<8x32xf32> to vector<8x32xbf16>
    %c0_28 = arith.constant 0 : index
    %c0_29 = arith.constant 0 : index
    %c0_30 = arith.constant 0 : index
    %97 = vector.load %arg3[%c0_28, %c0_29, %c0_30] : memref<1x8x32xbf16, #tpu.memory_space<vmem>>, vector<1x8x32xbf16>
    %98 = vector.shape_cast %97 : vector<1x8x32xbf16> to vector<8x32xbf16>
    %99 = vector.shape_cast %96 : vector<8x32xbf16> to vector<1x8x32xbf16>
    tpu.vector_store %arg3[%c0_28, %c0_29, %c0_30], %99 {strides = array<i32>} : memref<1x8x32xbf16, #tpu.memory_space<vmem>>, vector<1x8x32xbf16>,
    return
  }
  func.func @transform_0(%arg0: i32) -> (i32, i32, i32) {
    %c0_i32 = arith.constant 0 : i32
    %c0_i32_0 = arith.constant 0 : i32
    %c0_i32_1 = arith.constant 0 : i32
    return %arg0, %c0_i32, %c0_i32_0 : i32, i32, i32
  }
  func.func @transform_1(%arg0: i32) -> (i32, i32, i32) {
    %c0_i32 = arith.constant 0 : i32
    %c0_i32_0 = arith.constant 0 : i32
    %c0_i32_1 = arith.constant 0 : i32
    return %arg0, %c0_i32, %c0_i32_0 : i32, i32, i32
  }
  func.func @transform_2(%arg0: i32) -> (i32, i32, i32) {
    %c0_i32 = arith.constant 0 : i32
    %c0_i32_0 = arith.constant 0 : i32
    %c0_i32_1 = arith.constant 0 : i32
    return %arg0, %c0_i32, %c0_i32_0 : i32, i32, i32
  }
}

module attributes {stable_mosaic.version = 11 : i64} {
  func.func @_cross_attention_kernel(%arg0: i32, %arg1: memref<1x8x32xbf16, #tpu.memory_space<vmem>>, %arg2: memref<1x8x64xbf16, #tpu.memory_space<vmem>>, %arg3: memref<1x1x8xf32, #tpu.memory_space<vmem>>, %arg4: memref<1x8x32xbf16, #tpu.memory_space<vmem>>) attributes {dimension_semantics = [#tpu.dimension_semantics<parallel>], iteration_bounds = array<i64: 2>, scalar_prefetch = 0 : i64, scratch_operands = 0 : i64, tpu.core_type = #tpu.core_type<tc>, window_params = [{transform_indices = @transform_0, window_bounds = array<i64: 1, 8, 32>}, {transform_indices = @transform_1, window_bounds = array<i64: 1, 8, 64>}, {transform_indices = @transform_2, window_bounds = array<i64: 1, 1, 8>}, {transform_indices = @transform_3, window_bounds = array<i64: 1, 8, 32>}]} {
    %c0 = arith.constant 0 : index
    %c0_0 = arith.constant 0 : index
    %c0_1 = arith.constant 0 : index
    %0 = vector.load %arg1[%c0, %c0_0, %c0_1] : memref<1x8x32xbf16, #tpu.memory_space<vmem>>, vector<1x8x32xbf16>
    %1 = vector.shape_cast %0 : vector<1x8x32xbf16> to vector<8x32xbf16>
    %c0_2 = arith.constant 0 : index
    %c0_3 = arith.constant 0 : index
    %c0_4 = arith.constant 0 : index
    %2 = vector.load %arg2[%c0_2, %c0_3, %c0_4] : memref<1x8x64xbf16, #tpu.memory_space<vmem>>, vector<1x8x64xbf16>
    %3 = vector.shape_cast %2 : vector<1x8x64xbf16> to vector<8x64xbf16>
    %4 = vector.extract_strided_slice %3 {offsets = [0, 0], sizes = [8, 32], strides = [1, 1]} : vector<8x64xbf16> to vector<8x32xbf16>
    %5 = vector.extract_strided_slice %3 {offsets = [0, 32], sizes = [8, 32], strides = [1, 1]} : vector<8x64xbf16> to vector<8x32xbf16>
    %c0_5 = arith.constant 0 : index
    %c0_6 = arith.constant 0 : index
    %c0_7 = arith.constant 0 : index
    %6 = vector.load %arg3[%c0_5, %c0_6, %c0_7] : memref<1x1x8xf32, #tpu.memory_space<vmem>>, vector<1x1x8xf32>
    %7 = vector.shape_cast %6 : vector<1x1x8xf32> to vector<1x8xf32>
    %cst = arith.constant 1.000000e+00 : f32
    %8 = vector.broadcast %cst : f32 to vector<1x8xf32>
    %9 = arith.subf %7, %8 : vector<1x8xf32>
    %cst_8 = arith.constant 1.000000e+09 : f32
    %10 = vector.broadcast %cst_8 : f32 to vector<1x8xf32>
    %11 = arith.mulf %9, %10 : vector<1x8xf32>
    %12 = vector.extract_strided_slice %1 {offsets = [0, 0], sizes = [8, 8], strides = [1, 1]} : vector<8x32xbf16> to vector<8x8xbf16>
    %13 = vector.extract_strided_slice %4 {offsets = [0, 0], sizes = [8, 8], strides = [1, 1]} : vector<8x32xbf16> to vector<8x8xbf16>
    %14 = vector.extract_strided_slice %5 {offsets = [0, 0], sizes = [8, 8], strides = [1, 1]} : vector<8x32xbf16> to vector<8x8xbf16>
    %cst_9 = arith.constant dense<0.000000e+00> : vector<8x8xf32>
    %15 = tpu.matmul %12, %13, %cst_9 {dimension_numbers = #tpu.dot_dimension_numbers<[1], [1], [0], [0], [0, 0, 1, 0], [], []>} : vector<8x8xbf16>, vector<8x8xbf16>, vector<8x8xf32> -> vector<8x8xf32>
    %cst_10 = arith.constant 0.353553385 : f32
    %16 = vector.broadcast %cst_10 : f32 to vector<8x8xf32>
    %17 = arith.mulf %15, %16 : vector<8x8xf32>
    %18 = vector.broadcast %11 : vector<1x8xf32> to vector<8x8xf32>
    %19 = arith.addf %17, %18 : vector<8x8xf32>
    %cst_11 = arith.constant dense<0xFF800000> : vector<8xf32>
    %20 = vector.multi_reduction <maximumf>, %19, %cst_11 [1] : vector<8x8xf32> to vector<8xf32>
    %21 = vector.shape_cast %20 : vector<8xf32> to vector<8x1xf32>
    %22 = vector.broadcast %21 : vector<8x1xf32> to vector<8x8xf32>
    %23 = arith.subf %19, %22 : vector<8x8xf32>
    %24 = math.exp %23 : vector<8x8xf32>
    %cst_12 = arith.constant dense<0.000000e+00> : vector<8xf32>
    %25 = vector.multi_reduction <add>, %24, %cst_12 [1] : vector<8x8xf32> to vector<8xf32>
    %26 = vector.shape_cast %25 : vector<8xf32> to vector<8x1xf32>
    %27 = tpu.reciprocal %26 {approx = true} : vector<8x1xf32> -> vector<8x1xf32>
    %28 = vector.broadcast %27 : vector<8x1xf32> to vector<8x8xf32>
    %29 = arith.mulf %24, %28 : vector<8x8xf32>
    %30 = arith.truncf %29 : vector<8x8xf32> to vector<8x8xbf16>
    %cst_13 = arith.constant dense<0.000000e+00> : vector<8x8xf32>
    %31 = tpu.matmul %30, %14, %cst_13 {dimension_numbers = #tpu.dot_dimension_numbers<[1], [0], [0], [1], [0, 0, 1, 1], [], []>} : vector<8x8xbf16>, vector<8x8xbf16>, vector<8x8xf32> -> vector<8x8xf32>
    %32 = vector.extract_strided_slice %1 {offsets = [0, 8], sizes = [8, 8], strides = [1, 1]} : vector<8x32xbf16> to vector<8x8xbf16>
    %33 = vector.extract_strided_slice %4 {offsets = [0, 8], sizes = [8, 8], strides = [1, 1]} : vector<8x32xbf16> to vector<8x8xbf16>
    %34 = vector.extract_strided_slice %5 {offsets = [0, 8], sizes = [8, 8], strides = [1, 1]} : vector<8x32xbf16> to vector<8x8xbf16>
    %cst_14 = arith.constant dense<0.000000e+00> : vector<8x8xf32>
    %35 = tpu.matmul %32, %33, %cst_14 {dimension_numbers = #tpu.dot_dimension_numbers<[1], [1], [0], [0], [0, 0, 1, 0], [], []>} : vector<8x8xbf16>, vector<8x8xbf16>, vector<8x8xf32> -> vector<8x8xf32>
    %cst_15 = arith.constant 0.353553385 : f32
    %36 = vector.broadcast %cst_15 : f32 to vector<8x8xf32>
    %37 = arith.mulf %35, %36 : vector<8x8xf32>
    %38 = vector.broadcast %11 : vector<1x8xf32> to vector<8x8xf32>
    %39 = arith.addf %37, %38 : vector<8x8xf32>
    %cst_16 = arith.constant dense<0xFF800000> : vector<8xf32>
    %40 = vector.multi_reduction <maximumf>, %39, %cst_16 [1] : vector<8x8xf32> to vector<8xf32>
    %41 = vector.shape_cast %40 : vector<8xf32> to vector<8x1xf32>
    %42 = vector.broadcast %41 : vector<8x1xf32> to vector<8x8xf32>
    %43 = arith.subf %39, %42 : vector<8x8xf32>
    %44 = math.exp %43 : vector<8x8xf32>
    %cst_17 = arith.constant dense<0.000000e+00> : vector<8xf32>
    %45 = vector.multi_reduction <add>, %44, %cst_17 [1] : vector<8x8xf32> to vector<8xf32>
    %46 = vector.shape_cast %45 : vector<8xf32> to vector<8x1xf32>
    %47 = tpu.reciprocal %46 {approx = true} : vector<8x1xf32> -> vector<8x1xf32>
    %48 = vector.broadcast %47 : vector<8x1xf32> to vector<8x8xf32>
    %49 = arith.mulf %44, %48 : vector<8x8xf32>
    %50 = arith.truncf %49 : vector<8x8xf32> to vector<8x8xbf16>
    %cst_18 = arith.constant dense<0.000000e+00> : vector<8x8xf32>
    %51 = tpu.matmul %50, %34, %cst_18 {dimension_numbers = #tpu.dot_dimension_numbers<[1], [0], [0], [1], [0, 0, 1, 1], [], []>} : vector<8x8xbf16>, vector<8x8xbf16>, vector<8x8xf32> -> vector<8x8xf32>
    %52 = vector.extract_strided_slice %1 {offsets = [0, 16], sizes = [8, 8], strides = [1, 1]} : vector<8x32xbf16> to vector<8x8xbf16>
    %53 = vector.extract_strided_slice %4 {offsets = [0, 16], sizes = [8, 8], strides = [1, 1]} : vector<8x32xbf16> to vector<8x8xbf16>
    %54 = vector.extract_strided_slice %5 {offsets = [0, 16], sizes = [8, 8], strides = [1, 1]} : vector<8x32xbf16> to vector<8x8xbf16>
    %cst_19 = arith.constant dense<0.000000e+00> : vector<8x8xf32>
    %55 = tpu.matmul %52, %53, %cst_19 {dimension_numbers = #tpu.dot_dimension_numbers<[1], [1], [0], [0], [0, 0, 1, 0], [], []>} : vector<8x8xbf16>, vector<8x8xbf16>, vector<8x8xf32> -> vector<8x8xf32>
    %cst_20 = arith.constant 0.353553385 : f32
    %56 = vector.broadcast %cst_20 : f32 to vector<8x8xf32>
    %57 = arith.mulf %55, %56 : vector<8x8xf32>
    %58 = vector.broadcast %11 : vector<1x8xf32> to vector<8x8xf32>
    %59 = arith.addf %57, %58 : vector<8x8xf32>
    %cst_21 = arith.constant dense<0xFF800000> : vector<8xf32>
    %60 = vector.multi_reduction <maximumf>, %59, %cst_21 [1] : vector<8x8xf32> to vector<8xf32>
    %61 = vector.shape_cast %60 : vector<8xf32> to vector<8x1xf32>
    %62 = vector.broadcast %61 : vector<8x1xf32> to vector<8x8xf32>
    %63 = arith.subf %59, %62 : vector<8x8xf32>
    %64 = math.exp %63 : vector<8x8xf32>
    %cst_22 = arith.constant dense<0.000000e+00> : vector<8xf32>
    %65 = vector.multi_reduction <add>, %64, %cst_22 [1] : vector<8x8xf32> to vector<8xf32>
    %66 = vector.shape_cast %65 : vector<8xf32> to vector<8x1xf32>
    %67 = tpu.reciprocal %66 {approx = true} : vector<8x1xf32> -> vector<8x1xf32>
    %68 = vector.broadcast %67 : vector<8x1xf32> to vector<8x8xf32>
    %69 = arith.mulf %64, %68 : vector<8x8xf32>
    %70 = arith.truncf %69 : vector<8x8xf32> to vector<8x8xbf16>
    %cst_23 = arith.constant dense<0.000000e+00> : vector<8x8xf32>
    %71 = tpu.matmul %70, %54, %cst_23 {dimension_numbers = #tpu.dot_dimension_numbers<[1], [0], [0], [1], [0, 0, 1, 1], [], []>} : vector<8x8xbf16>, vector<8x8xbf16>, vector<8x8xf32> -> vector<8x8xf32>
    %72 = vector.extract_strided_slice %1 {offsets = [0, 24], sizes = [8, 8], strides = [1, 1]} : vector<8x32xbf16> to vector<8x8xbf16>
    %73 = vector.extract_strided_slice %4 {offsets = [0, 24], sizes = [8, 8], strides = [1, 1]} : vector<8x32xbf16> to vector<8x8xbf16>
    %74 = vector.extract_strided_slice %5 {offsets = [0, 24], sizes = [8, 8], strides = [1, 1]} : vector<8x32xbf16> to vector<8x8xbf16>
    %cst_24 = arith.constant dense<0.000000e+00> : vector<8x8xf32>
    %75 = tpu.matmul %72, %73, %cst_24 {dimension_numbers = #tpu.dot_dimension_numbers<[1], [1], [0], [0], [0, 0, 1, 0], [], []>} : vector<8x8xbf16>, vector<8x8xbf16>, vector<8x8xf32> -> vector<8x8xf32>
    %cst_25 = arith.constant 0.353553385 : f32
    %76 = vector.broadcast %cst_25 : f32 to vector<8x8xf32>
    %77 = arith.mulf %75, %76 : vector<8x8xf32>
    %78 = vector.broadcast %11 : vector<1x8xf32> to vector<8x8xf32>
    %79 = arith.addf %77, %78 : vector<8x8xf32>
    %cst_26 = arith.constant dense<0xFF800000> : vector<8xf32>
    %80 = vector.multi_reduction <maximumf>, %79, %cst_26 [1] : vector<8x8xf32> to vector<8xf32>
    %81 = vector.shape_cast %80 : vector<8xf32> to vector<8x1xf32>
    %82 = vector.broadcast %81 : vector<8x1xf32> to vector<8x8xf32>
    %83 = arith.subf %79, %82 : vector<8x8xf32>
    %84 = math.exp %83 : vector<8x8xf32>
    %cst_27 = arith.constant dense<0.000000e+00> : vector<8xf32>
    %85 = vector.multi_reduction <add>, %84, %cst_27 [1] : vector<8x8xf32> to vector<8xf32>
    %86 = vector.shape_cast %85 : vector<8xf32> to vector<8x1xf32>
    %87 = tpu.reciprocal %86 {approx = true} : vector<8x1xf32> -> vector<8x1xf32>
    %88 = vector.broadcast %87 : vector<8x1xf32> to vector<8x8xf32>
    %89 = arith.mulf %84, %88 : vector<8x8xf32>
    %90 = arith.truncf %89 : vector<8x8xf32> to vector<8x8xbf16>
    %cst_28 = arith.constant dense<0.000000e+00> : vector<8x8xf32>
    %91 = tpu.matmul %90, %74, %cst_28 {dimension_numbers = #tpu.dot_dimension_numbers<[1], [0], [0], [1], [0, 0, 1, 1], [], []>} : vector<8x8xbf16>, vector<8x8xbf16>, vector<8x8xf32> -> vector<8x8xf32>
    %92 = tpu.concatenate %31, %51, %71, %91 in 1 : vector<8x8xf32>, vector<8x8xf32>, vector<8x8xf32>, vector<8x8xf32> -> vector<8x32xf32>
    %93 = arith.truncf %92 : vector<8x32xf32> to vector<8x32xbf16>
    %c0_29 = arith.constant 0 : index
    %c0_30 = arith.constant 0 : index
    %c0_31 = arith.constant 0 : index
    %94 = vector.load %arg4[%c0_29, %c0_30, %c0_31] : memref<1x8x32xbf16, #tpu.memory_space<vmem>>, vector<1x8x32xbf16>
    %95 = vector.shape_cast %94 : vector<1x8x32xbf16> to vector<8x32xbf16>
    %96 = vector.shape_cast %93 : vector<8x32xbf16> to vector<1x8x32xbf16>
    tpu.vector_store %arg4[%c0_29, %c0_30, %c0_31], %96 {strides = array<i32>} : memref<1x8x32xbf16, #tpu.memory_space<vmem>>, vector<1x8x32xbf16>,
    return
  }
  func.func @transform_0(%arg0: i32) -> (i32, i32, i32) {
    %c0_i32 = arith.constant 0 : i32
    %c0_i32_0 = arith.constant 0 : i32
    %c0_i32_1 = arith.constant 0 : i32
    return %arg0, %c0_i32, %c0_i32_0 : i32, i32, i32
  }
  func.func @transform_1(%arg0: i32) -> (i32, i32, i32) {
    %c0_i32 = arith.constant 0 : i32
    %c0_i32_0 = arith.constant 0 : i32
    %c0_i32_1 = arith.constant 0 : i32
    return %arg0, %c0_i32, %c0_i32_0 : i32, i32, i32
  }
  func.func @transform_2(%arg0: i32) -> (i32, i32, i32) {
    %c0_i32 = arith.constant 0 : i32
    %c0_i32_0 = arith.constant 0 : i32
    %c0_i32_1 = arith.constant 0 : i32
    return %arg0, %c0_i32, %c0_i32_0 : i32, i32, i32
  }
  func.func @transform_3(%arg0: i32) -> (i32, i32, i32) {
    %c0_i32 = arith.constant 0 : i32
    %c0_i32_0 = arith.constant 0 : i32
    %c0_i32_1 = arith.constant 0 : i32
    return %arg0, %c0_i32, %c0_i32_0 : i32, i32, i32
  }
}

module attributes {stable_mosaic.version = 11 : i64} {
  func.func @_linear_kernel(%arg0: i32, %arg1: i32, %arg2: i32, %arg3: memref<16x32xbf16, #tpu.memory_space<vmem>>, %arg4: memref<32x128xbf16, #tpu.memory_space<vmem>>, %arg5: memref<1x128xf32, #tpu.memory_space<vmem>>, %arg6: memref<16x128xbf16, #tpu.memory_space<vmem>>, %arg7: memref<16x128xf32, #tpu.memory_space<vmem>>) attributes {dimension_semantics = [#tpu.dimension_semantics<parallel>, #tpu.dimension_semantics<parallel>, #tpu.dimension_semantics<arbitrary>], iteration_bounds = array<i64: 1, 1, 1>, scalar_prefetch = 0 : i64, scratch_operands = 1 : i64, tpu.core_type = #tpu.core_type<tc>, window_params = [{transform_indices = @transform_0, window_bounds = array<i64: 16, 32>}, {transform_indices = @transform_1, window_bounds = array<i64: 32, 128>}, {transform_indices = @transform_2, window_bounds = array<i64: 1, 128>}, {transform_indices = @transform_3, window_bounds = array<i64: 16, 128>}]} {
    %c0_i32 = arith.constant 0 : i32
    %0 = arith.cmpi eq, %arg2, %c0_i32 : i32
    %1 = arith.extui %0 : i1 to i32
    %c0_i32_0 = arith.constant 0 : i32
    %2 = arith.cmpi ne, %1, %c0_i32_0 : i32
    scf.if %2 {
      %cst_10 = arith.constant 0.000000e+00 : f32
      %12 = vector.broadcast %cst_10 : f32 to vector<16x128xf32>
      %c0_11 = arith.constant 0 : index
      %c0_12 = arith.constant 0 : index
      %13 = vector.load %arg7[%c0_11, %c0_12] : memref<16x128xf32, #tpu.memory_space<vmem>>, vector<16x128xf32>
      tpu.vector_store %arg7[%c0_11, %c0_12], %12 {strides = array<i32>} : memref<16x128xf32, #tpu.memory_space<vmem>>, vector<16x128xf32>,
    } else {
    }
    %c0 = arith.constant 0 : index
    %c0_1 = arith.constant 0 : index
    %3 = vector.load %arg7[%c0, %c0_1] : memref<16x128xf32, #tpu.memory_space<vmem>>, vector<16x128xf32>
    %c0_2 = arith.constant 0 : index
    %c0_3 = arith.constant 0 : index
    %4 = vector.load %arg3[%c0_2, %c0_3] : memref<16x32xbf16, #tpu.memory_space<vmem>>, vector<16x32xbf16>
    %c0_4 = arith.constant 0 : index
    %c0_5 = arith.constant 0 : index
    %5 = vector.load %arg4[%c0_4, %c0_5] : memref<32x128xbf16, #tpu.memory_space<vmem>>, vector<32x128xbf16>
    %cst = arith.constant dense<0.000000e+00> : vector<16x128xf32>
    %6 = tpu.matmul %4, %5, %cst {dimension_numbers = #tpu.dot_dimension_numbers<[1], [0], [0], [1], [0, 0, 1, 1], [], []>} : vector<16x32xbf16>, vector<32x128xbf16>, vector<16x128xf32> -> vector<16x128xf32>
    %7 = arith.addf %3, %6 : vector<16x128xf32>
    %c0_6 = arith.constant 0 : index
    %c0_7 = arith.constant 0 : index
    %8 = vector.load %arg7[%c0_6, %c0_7] : memref<16x128xf32, #tpu.memory_space<vmem>>, vector<16x128xf32>
    tpu.vector_store %arg7[%c0_6, %c0_7], %7 {strides = array<i32>} : memref<16x128xf32, #tpu.memory_space<vmem>>, vector<16x128xf32>,
    %c0_i32_8 = arith.constant 0 : i32
    %9 = arith.cmpi eq, %arg2, %c0_i32_8 : i32
    %10 = arith.extui %9 : i1 to i32
    %c0_i32_9 = arith.constant 0 : i32
    %11 = arith.cmpi ne, %10, %c0_i32_9 : i32
    scf.if %11 {
      %c0_10 = arith.constant 0 : index
      %c0_11 = arith.constant 0 : index
      %12 = vector.load %arg7[%c0_10, %c0_11] : memref<16x128xf32, #tpu.memory_space<vmem>>, vector<16x128xf32>
      %c0_12 = arith.constant 0 : index
      %c0_13 = arith.constant 0 : index
      %13 = vector.load %arg5[%c0_12, %c0_13] : memref<1x128xf32, #tpu.memory_space<vmem>>, vector<1x128xf32>
      %14 = vector.broadcast %13 : vector<1x128xf32> to vector<16x128xf32>
      %15 = arith.addf %12, %14 : vector<16x128xf32>
      %16 = arith.truncf %15 : vector<16x128xf32> to vector<16x128xbf16>
      %c0_14 = arith.constant 0 : index
      %c0_15 = arith.constant 0 : index
      %17 = vector.load %arg6[%c0_14, %c0_15] : memref<16x128xbf16, #tpu.memory_space<vmem>>, vector<16x128xbf16>
      tpu.vector_store %arg6[%c0_14, %c0_15], %16 {strides = array<i32>} : memref<16x128xbf16, #tpu.memory_space<vmem>>, vector<16x128xbf16>,
    } else {
    }
    return
  }
  func.func @transform_0(%arg0: i32, %arg1: i32, %arg2: i32) -> (i32, i32) {
    %c0_i32 = arith.constant 0 : i32
    return %arg0, %arg2 : i32, i32
  }
  func.func @transform_1(%arg0: i32, %arg1: i32, %arg2: i32) -> (i32, i32) {
    %c0_i32 = arith.constant 0 : i32
    return %arg2, %arg1 : i32, i32
  }
  func.func @transform_2(%arg0: i32, %arg1: i32, %arg2: i32) -> (i32, i32) {
    %c0_i32 = arith.constant 0 : i32
    %c0_i32_0 = arith.constant 0 : i32
    return %c0_i32, %arg1 : i32, i32
  }
  func.func @transform_3(%arg0: i32, %arg1: i32, %arg2: i32) -> (i32, i32) {
    %c0_i32 = arith.constant 0 : i32
    return %arg0, %arg1 : i32, i32
  }
}

</mosaic_0001>

<bundles_post_ra>
// kernel: translation_forward.41
= control target key start
LH: loop header
LB: loop body
LE: loop exit
PB: predicated region body
PF: predicated region fallthrough
CT: control target
= control target key end

     0   :  { %vm19_vm0 = vcmask 261120   ;;  %v150_v0 = vmov 0.0   ;;  %vm151_vm1 = vmmov 0   ;;  %vm118_vm2 = vcmask 257024   ;;  %s195_s1 = inlined_call_operand.vmem [shape: bf16[32,32], index: 1, kind: input, shape index: {}]   ;;  %s196_s0 = inlined_call_operand.vmem [shape: bf16[16,32], index: 0, kind: input, shape index: {}]   ;;  %s197_s2 = inlined_call_operand.vmem [shape: f32[1,32], index: 2, kind: input, shape index: {}]   ;;  %s198_s3 = inlined_call_operand.vmem [shape: bf16[16,32], index: 3, kind: output, shape index: {}]  }
   0x1   :  { %137 = vmatprep.subr.bf16.mxu0 %v150_v0  ;;  %v147_v1 = vld [vmem:[%s195_s1 + $0x8] sm:$0xff]   ;;  %141 = vmatprep.mubr.msk.bf16.mxu0 %vm151_vm1, %v150_v0  ;;  %20 = vst.msk [vmem:[#allocation2] sm:$0xff] %vm19_vm0, %v150_v0  ;;  %21 = vst.msk [vmem:[#allocation2 + $0x8] sm:$0xff] %vm19_vm0, %v150_v0  ;;  %v148_v2 = vld [vmem:[%s195_s1] sm:$0xff]  }
   0x2   :  { %138 = vmatpush3.bf16.msra.mxu0 %v147_v1  ;;  %v149_v3 = vld [vmem:[%s196_s0] sm:$0xff]  }
   0x3   :  { %139 = vmatprep.subr.bf16.mxu0 %v150_v0  ;;  %v129_v12 = vld [vmem:[%s197_s2] ss:$0 sm:$0xff] }
   0x6   :  { %140 = vmatpush3.bf16.msra.mxu0 %v148_v2 }
   0x8   :  { %v22_v4 = vld [vmem:[#allocation2] sm:$0xff]  ;;  %v23_v8 = vld [vmem:[#allocation2 + $0x8] sm:$0xff] }
   0x9   :  { %142 = vmatmul.mubr.msk.bf16.vlgmr.msra.gmra.mxu0 %vm19_vm0, %v149_v3 }
  0xc9   :  { %v85_v5 = vpop.f32.mrf.mxu0 }
  0xca   :  { %v92_v6 = vadd.f32 %v85_v5, %v22_v4 }
  0xcb   :  { %v143_v7 = vpop.f32.mrf.mxu0 }
  0xcc   :  { %94 = vst.msk [vmem:[#allocation2] sm:$0xff] %vm19_vm0, %v92_v6 }
  0xcd   :  { %v88_v9 = vpop.f32.mrf.mxu0 }
  0xce   :  { %v93_v10 = vadd.f32 %v88_v9, %v23_v8 }
  0xcf   :  { %v144_v11 = vpop.f32.mrf.mxu0 }
  0xd0   :  { %95 = vst.msk [vmem:[#allocation2 + $0x8] sm:$0xff] %vm19_vm0, %v93_v10 }
  0xd3   :  { %v99_v13 = vld [vmem:[#allocation2] sm:$0xff] }
  0xd4   :  { %v108_v14 = vadd.f32 %v129_v12, %v99_v13 }
  0xd6   :  { %v132_v15 = vpack.c.bf16 %v108_v14, %v108_v14 }
  0xd7   :  { %v100_v16 = vld [vmem:[#allocation2 + $0x8] sm:$0xff] }
  0xd8   :  { %119 = vst.msk [vmem:[%s198_s3] sm:$0xf] %vm118_vm2, %v132_v15  ;;  %v109_v17 = vadd.f32 %v129_v12, %v100_v16 }
  0xda   :  { %v133_v18 = vpack.c.bf16 %v109_v17, %v109_v17 }
  0xdc   :  { %120 = vst.msk [vmem:[%s198_s3 + $0x4] sm:$0xf] %vm118_vm2, %v133_v18 }

// kernel: translation_forward.39
= control target key start
LH: loop header
LB: loop body
LE: loop exit
PB: predicated region body
PF: predicated region fallthrough
CT: control target
= control target key end

     0   :  { %vm19_vm0 = vcmask 785408   ;;  %v151_v0 = vmov 0.0   ;;  %vm152_vm1 = vmmov 0   ;;  %vm47_vm2 = vcmask 261120   ;;  %s195_s1 = inlined_call_operand.vmem [shape: bf16[32,96], index: 1, kind: input, shape index: {}]   ;;  %s196_s0 = inlined_call_operand.vmem [shape: bf16[16,32], index: 0, kind: input, shape index: {}]   ;;  %s197_s2 = inlined_call_operand.vmem [shape: f32[1,96], index: 2, kind: input, shape index: {}]   ;;  %s198_s3 = inlined_call_operand.vmem [shape: bf16[16,96], index: 3, kind: output, shape index: {}]  }
   0x1   :  { %138 = vmatprep.subr.bf16.mxu0 %v151_v0  ;;  %v148_v1 = vld [vmem:[%s195_s1 + $0x8] sm:$0xff]   ;;  %142 = vmatprep.mubr.msk.bf16.mxu0 %vm152_vm1, %v151_v0  ;;  %20 = vst.msk [vmem:[#allocation2] sm:$0xff] %vm19_vm0, %v151_v0  ;;  %21 = vst.msk [vmem:[#allocation2 + $0x8] sm:$0xff] %vm19_vm0, %v151_v0  ;;  %v149_v2 = vld [vmem:[%s195_s1] sm:$0xff]   ;;  %vm119_vm3 = vcmask 781312  }
   0x2   :  { %139 = vmatpush3.bf16.msra.mxu0 %v148_v1  ;;  %v150_v3 = vld [vmem:[%s196_s0] sm:$0xff]  }
   0x3   :  { %140 = vmatprep.subr.bf16.mxu0 %v151_v0  ;;  %v130_v12 = vld [vmem:[%s197_s2] ss:$0 sm:$0xff] }
   0x6   :  { %141 = vmatpush3.bf16.msra.mxu0 %v149_v2 }
   0x8   :  { %v22_v4 = vld [vmem:[#allocation2] sm:$0xff]  ;;  %v23_v8 = vld [vmem:[#allocation2 + $0x8] sm:$0xff] }
   0x9   :  { %143 = vmatmul.mubr.msk.bf16.vlgmr.msra.gmra.mxu0 %vm47_vm2, %v150_v3 }
  0xc9   :  { %v85_v5 = vpop.f32.mrf.mxu0 }
  0xca   :  { %v92_v6 = vadd.f32 %v85_v5, %v22_v4 }
  0xcb   :  { %v144_v7 = vpop.f32.mrf.mxu0 }
  0xcc   :  { %95 = vst.msk [vmem:[#allocation2] sm:$0xff] %vm19_vm0, %v92_v6 }
  0xcd   :  { %v88_v9 = vpop.f32.mrf.mxu0 }
  0xce   :  { %v93_v10 = vadd.f32 %v88_v9, %v23_v8 }
  0xcf   :  { %v145_v11 = vpop.f32.mrf.mxu0 }
  0xd0   :  { %96 = vst.msk [vmem:[#allocation2 + $0x8] sm:$0xff] %vm19_vm0, %v93_v10 }
  0xd3   :  { %v100_v13 = vld [vmem:[#allocation2] sm:$0xff] }
  0xd4   :  { %v109_v14 = vadd.f32 %v130_v12, %v100_v13 }
  0xd6   :  { %v133_v15 = vpack.c.bf16 %v109_v14, %v109_v14 }
  0xd7   :  { %v101_v16 = vld [vmem:[#allocation2 + $0x8] sm:$0xff] }
  0xd8   :  { %120 = vst.msk [vmem:[%s198_s3] sm:$0xf] %vm119_vm3, %v133_v15  ;;  %v110_v17 = vadd.f32 %v130_v12, %v101_v16 }
  0xda   :  { %v134_v18 = vpack.c.bf16 %v110_v17, %v110_v17 }
  0xdc   :  { %121 = vst.msk [vmem:[%s198_s3 + $0x4] sm:$0xf] %vm119_vm3, %v134_v18 }

// kernel: translation_forward.42
= control target key start
LH: loop header
LB: loop body
LE: loop exit
PB: predicated region body
PF: predicated region fallthrough
CT: control target
= control target key end

     0   :  { %vm27_vm0 = vcmask 261120   ;;  %vm81_vm1 = vcmask 257024   ;;  %s153_s0 = inlined_call_operand.vmem [shape: bf16[16,32], index: 0, kind: input, shape index: {}]   ;;  %s154_s1 = inlined_call_operand.vmem [shape: bf16[16,32], index: 1, kind: input, shape index: {}]   ;;  %s155_s2 = inlined_call_operand.vmem [shape: f32[1,32], index: 2, kind: input, shape index: {}]   ;;  %s156_s3 = inlined_call_operand.vmem [shape: f32[1,32], index: 3, kind: input, shape index: {}]   ;;  %s157_s4 = inlined_call_operand.vmem [shape: bf16[16,32], index: 4, kind: output, shape index: {}]  }
   0x1   :  { %v95_v0 = vld [vmem:[%s153_s0] sm:$0xff]  }
   0x2   :  { %v99_v1 = vld [vmem:[%s154_s1] sm:$0xff]   ;;  %v96_v2 = vunpack.c.l.bf16 %v95_v0  ;;  %v97_v4 = vunpack.c.h.bf16 %v95_v0 }
   0x3   :  { %v100_v3 = vunpack.c.l.bf16 %v99_v1  ;;  %v101_v5 = vunpack.c.h.bf16 %v99_v1  ;;  %v88_v27 = vld [vmem:[%s155_s2] ss:$0 sm:$0xff] }
   0x4   :  { %v89_v29 = vld [vmem:[%s156_s3] ss:$0 sm:$0xff] }
   0x5   :  { %v25_v6 = vadd.f32 %v100_v3, %v96_v2  ;;  %v26_v7 = vadd.f32 %v101_v5, %v97_v4 }
   0x7   :  { %v28_v8 = vsel %vm27_vm0, %v25_v6, 0.0  ;;  %v31_v9 = vsel %vm27_vm0, %v26_v7, 0.0 }
   0x8   :  { %29 = vadd.xlane.f32.xlu0 %v28_v8 }
   0xc   :  { %32 = vadd.xlane.f32.xlu0 %v31_v9 }
  0x91   :  { %v30_v10 = vpop.xlane.xlu0 %29 }
  0x92   :  { %v35_v11 = vmul.f32 0.03125, %v30_v10 }
  0x94   :  { %v37_v12 = vsub.f32 %v25_v6, %v35_v11 }
  0x95   :  { %v33_v13 = vpop.xlane.xlu0 %32 }
  0x96   :  { %v36_v14 = vmul.f32 0.03125, %v33_v13  ;;  %v39_v15 = vmul.f32 %v37_v12, %v37_v12 }
  0x98   :  { %v38_v16 = vsub.f32 %v26_v7, %v36_v14  ;;  %v41_v17 = vsel %vm27_vm0, %v39_v15, 0.0 }
  0x99   :  { %42 = vadd.xlane.f32.xlu1 %v41_v17 }
  0x9a   :  { %v40_v18 = vmul.f32 %v38_v16, %v38_v16 }
  0x9c   :  { %v44_v19 = vsel %vm27_vm0, %v40_v18, 0.0 }
  0x9d   :  { %45 = vadd.xlane.f32.xlu1 %v44_v19 }
 0x122   :  { %v43_v20 = vpop.xlane.xlu1 %42 }
 0x123   :  { %v47_v21 = vmul.f32 0.03125, %v43_v20 }
 0x125   :  { %v49_v22 = vadd.f32 1e-05, %v47_v21 }
 0x126   :  { %v46_v23 = vpop.xlane.xlu1 %45 }
 0x127   :  { %102 = vrsqrt.f32 %v49_v22  ;;  %v48_v24 = vmul.f32 0.03125, %v46_v23 }
 0x129   :  { %v50_v25 = vadd.f32 1e-05, %v48_v24 }
 0x12b   :  { %104 = vrsqrt.f32 %v50_v25 }
 0x134   :  { %v103_v26 = vpop.eup %102 }
 0x135   :  { %v53_v28 = vmul.f32 %v103_v26, %v37_v12 }
 0x137   :  { %v62_v30 = vmul.f32 %v88_v27, %v53_v28 }
 0x138   :  { %v105_v31 = vpop.eup %104 }
 0x139   :  { %v71_v32 = vadd.f32 %v89_v29, %v62_v30  ;;  %v54_v33 = vmul.f32 %v105_v31, %v38_v16 }
 0x13b   :  { %v92_v34 = vpack.c.bf16 %v71_v32, %v71_v32  ;;  %v63_v35 = vmul.f32 %v88_v27, %v54_v33 }
 0x13d   :  { %82 = vst.msk [vmem:[%s157_s4] sm:$0xf] %vm81_vm1, %v92_v34  ;;  %v72_v36 = vadd.f32 %v89_v29, %v63_v35 }
 0x13f   :  { %v93_v37 = vpack.c.bf16 %v72_v36, %v72_v36 }
 0x141   :  { %83 = vst.msk [vmem:[%s157_s4 + $0x4] sm:$0xf] %vm81_vm1, %v93_v37 }

// kernel: translation_forward.40
= control target key start
LH: loop header
LB: loop body
LE: loop exit
PB: predicated region body
PF: predicated region fallthrough
CT: control target
= control target key end

     0   :  { %s860_s9 = smov 0   ;;  %s959_s0 = inlined_call_operand.vmem [shape: bf16[2,8,96], index: 0, kind: input, shape index: {}]   ;;  %s960_s1 = inlined_call_operand.vmem [shape: f32[2,1,8], index: 1, kind: input, shape index: {}]   ;;  %s961_s2 = inlined_call_operand.vmem [shape: bf16[2,8,32], index: 2, kind: output, shape index: {}]  }
   0x1 LB: > { %s697_s10 = sadd.s32 4294967295, %s827_s9   ;;  %p701_p0 = scmp.ge.s32.totalorder %s827_s9, 1  ;;  %s827_s9 = sphi %s860_s9, %s12_s9  }
   0x2   : > { %p119_p1 = scmp.lt.s32.totalorder %s827_s9, 3 }
   0x4   : > { %p120_p2 = pnand %p701_p0, %p119_p1 }
   0x5   : > { %p142_p3 = scmp.lt.s32.totalorder (!%p120_p2), %s697_s10, 1  ;;  %s831_s15 = smov (!%p120_p2), 96  }
   0x6   : > { %123 = sbr.rel (%p120_p2) target bundleno = 1543 (0x607), region = 28  ;;  %s832_s16 = smov (!%p120_p2), 64  }
   0x7   : > { %s833_s17 = smov (!%p120_p2), 88   ;;  %s834_s21 = smov (!%p120_p2), 72  }
   0x8   : > { %s835_s22 = smov (!%p120_p2), 120   ;;  %s836_s23 = smov (!%p120_p2), 80  }
   0x9   : > { %s837_s24 = smov (!%p120_p2), 112   ;;  %s838_s25 = smov (!%p120_p2), 104  }
   0xa   : > { %s839_s26 = smov (!%p120_p2), 56   ;;  %s840_s27 = smov (!%p120_p2), 48  }
   0xb   : > { %v829_v0 = vmov 0.0   ;;  %vm830_vm0 = vmmov 0   ;;  %s963_s10 = smov (!%p142_p3, %s697_s10), 1  ;;  %vm163_vm1 = vcmask 64512   ;;  %v212_v5 = vlaneseq  ;;  %s841_s28 = smov 40  }
   0xc   : > { %732 = vmatprep.subr.bf16.mxu0 %v829_v0  ;;  %734 = vmatprep.mubr.msk.bf16.mxu0 %vm830_vm0, %v829_v0  ;;  %s702_s11 = sshll.u32 %s963_s10, 2  ;;  %s148_s20 = scalar_lea.vmem %s960_s1, %s963_s10  ;;  %vm235_vm2 = vcmask 1043456   ;;  %vm628_vm3 = vcmask 130048   ;;  %vm630_vm4 = vcmask 195584   ;;  %vm633_vm5 = vcmask 257024  }
   0xd   : > { %738 = vmatprep.subr.bf16.mxu1 %v829_v0  ;;  %740 = vmatprep.mubr.msk.bf16.mxu1 %vm830_vm0, %v829_v0  ;;  %s145_s14 = scalar_lea.vmem %s959_s0, %s702_s11  ;;  %v155_v6 = vld [vmem:[%s148_s20] sm:$0x1]  ;;  %v213_v8 = vshrl.u32 %v212_v5, 7  ;;  %s842_s29 = smov 8  }
   0xe   : > { %v154_v1 = vld [vmem:[%s145_s14] sm:$0xf]  ;;  %v704_v7 = vadd.f32 -1.0, %v155_v6  ;;  %s843_s30 = smov 16   ;;  %s844_s3 = smov 24  }
   0xf   : > { %v882_v2 = vcombine.low %v154_v1, %v154_v1  ;;  %v214_v10 = vsub.s32 0, %v213_v8  ;;  %s152_s6 = scalar_lea.vmem %s961_s2, %s702_s11 }
  0x10   : > { %v157_v9 = vmul.f32 1e+09, %v704_v7 }
  0x11   : > { %161 = vrot.lane.b32.xlu0 %v882_v2, %s831_s15  ;;  %230 = vrot.lane.b32.xlu1 %v882_v2, %s832_s16 }
  0x12   : > { %v896_v11 = vrot.slane %v157_v9, %v214_v10 }
  0x15   : > { %281 = vrot.lane.b32.xlu1 %v882_v2, %s833_s17 }
  0x83   : > { %v162_v3 = vpop.permute.xlu0 %161  ;;  %v231_v19 = vpop.permute.xlu1 %230 }
  0x84   : > { %v168_v4 = vsel %vm163_vm1, %v162_v3, 0  ;;  %v237_v20 = vsel %vm235_vm2, %v231_v19, 0 }
  0x85   : > { %733 = vmatpush3.bf16.xpose.msra.mxu0 %v168_v4  ;;  %739 = vmatpush3.bf16.msra.mxu1 %v237_v20 }
  0x86   : > { %750 = vmatprep.subr.bf16.mxu0 %v829_v0  ;;  %744 = vmatprep.subr.bf16.mxu1 %v829_v0 }
  0x87   : > { %v282_v26 = vpop.permute.xlu1 %281 }
  0x88   : > { %v287_v32 = vsel %vm163_vm1, %v282_v26, 0 }
  0x8c   : > { %735 = vmatmul.mubr.msk.bf16.vlgmr.msra.gmra.mxu0 %vm163_vm1, %v154_v1 }
  0x8d   : > { %752 = vmatprep.mubr.msk.bf16.mxu0 %vm830_vm0, %v829_v0 }
 0x14c   : > { %v204_v12 = vpop.f32.mrf.mxu0 }
 0x14d   : > { %v210_v13 = vmul.f32 0.35355338, %v204_v12 }
 0x14e   : > { %v736_v14 = vpop.f32.mrf.mxu0 }
 0x14f   : > { %v217_v15 = vadd.f32 %v896_v11, %v210_v13 }
 0x150   : > { %v207_v16 = vpop.f32.mrf.mxu0 }
 0x151   : > { %v218_v17 = vsel %vm163_vm1, %v217_v15, -inf }
 0x152   : > { %219 = vmax.xlane.f32.xlu0 %v218_v17  ;;  %v737_v18 = vpop.f32.mrf.mxu0 }
 0x168   : > { %505 = vrot.lane.b32.xlu0 %v882_v2, %s834_s21 }
 0x1db   : > { %v220_v21 = vpop.xlane.xlu0 %219 }
 0x1dc   : > { %v221_v22 = vsub.f32 %v217_v15, %v220_v21 }
 0x1de   : > { %v222_v23 = vmul.f32 1.442695, %v221_v22 }
 0x1df   : > { %v506_v35 = vpop.permute.xlu0 %505 }
 0x1e0   : > { %805 = vpow2.f32 %v222_v23  ;;  %v511_v37 = vsel %vm163_vm1, %v506_v35, 0 }
 0x1ed   : > { %v806_v24 = vpop.eup %805 }
 0x1ee   : > { %v224_v25 = vsel %vm163_vm1, %v806_v24, 0.0 }
 0x1ef   : > { %225 = vadd.xlane.f32.xlu1 %v224_v25 }
 0x200   : > { %279 = vrot.lane.b32.xlu1 %v882_v2, %s835_s22 }
 0x204   : > { %393 = vrot.lane.b32.xlu1 %v882_v2, %s836_s23 }
 0x208   : > { %391 = vrot.lane.b32.xlu1 %v882_v2, %s837_s24 }
 0x20c   : > { %503 = vrot.lane.b32.xlu1 %v882_v2, %s838_s25 }
 0x278   : > { %v226_v27 = vpop.xlane.xlu1 %225 }
 0x279   : > { %807 = vrcp.f32 %v226_v27 }
 0x27c   : > { %v280_v30 = vpop.permute.xlu1 %279 }
 0x280   : > { %v394_v33 = vpop.permute.xlu1 %393 }
 0x281   : > { %v399_v34 = vsel %vm163_vm1, %v394_v33, 0 }
 0x284   : > { %v392_v36 = vpop.permute.xlu1 %391 }
 0x286   : > { %v808_v28 = vpop.eup %807 }
 0x287   : > { %v228_v29 = vmul.f32 %v808_v28, %v806_v24 }
 0x288   : > { %v504_v38 = vpop.permute.xlu1 %503 }
 0x289   : > { %v229_v31 = vpack.c.bf16 %v228_v29, %v228_v29 }
 0x28b   : > { %741 = vmatmul.mubr.msk.bf16.vlgmr.msra.gmra.mxu1 %vm163_vm1, %v229_v31 }
 0x28c   : > { %745 = vmatpush3.bf16.xpose.msra.mxu1 %v287_v32  ;;  %746 = vmatprep.mubr.msk.bf16.mxu1 %vm830_vm0, %v829_v0 }
 0x28d   : > { %756 = vmatprep.subr.bf16.mxu1 %v829_v0 }
 0x293   : > { %747 = vmatmul.mubr.msk.bf16.vlgmr.msra.gmra.mxu1 %vm163_vm1, %v280_v30 }
 0x294   : > { %757 = vmatpush3.bf16.xpose.msra.mxu1 %v399_v34  ;;  %758 = vmatprep.mubr.msk.bf16.mxu1 %vm830_vm0, %v829_v0 }
 0x295   : > { %768 = vmatprep.subr.bf16.mxu1 %v829_v0 }
 0x29b   : > { %759 = vmatmul.mubr.msk.bf16.vlgmr.msra.gmra.mxu1 %vm163_vm1, %v392_v36 }
 0x29c   : > { %769 = vmatpush3.bf16.xpose.msra.mxu1 %v511_v37  ;;  %770 = vmatprep.mubr.msk.bf16.mxu1 %vm830_vm0, %v829_v0 }
 0x2a3   : > { %771 = vmatmul.mubr.msk.bf16.vlgmr.msra.gmra.mxu1 %vm163_vm1, %v504_v38 }
 0x34b   : > { %v923_v39 = vpop.f32.mrf.mxu1 }
 0x34d   : > { %v742_v40 = vpop.f32.mrf.mxu1 }
 0x34f   : > { %v276_v41 = vpop.f32.mrf.mxu1 }
 0x351   : > { %v743_v42 = vpop.f32.mrf.mxu1 }
 0x353   : > { %v323_v43 = vpop.f32.mrf.mxu1 }
 0x354   : > { %v329_v44 = vmul.f32 0.35355338, %v323_v43 }
 0x355   : > { %v748_v45 = vpop.f32.mrf.mxu1 }
 0x356   : > { %v330_v46 = vadd.f32 %v329_v44, %v896_v11 }
 0x357   : > { %v326_v47 = vpop.f32.mrf.mxu1 }
 0x358   : > { %v331_v48 = vsel %vm163_vm1, %v330_v46, -inf }
 0x359   : > { %332 = vmax.xlane.f32.xlu1 %v331_v48  ;;  %v749_v49 = vpop.f32.mrf.mxu1 }
 0x35b   : > { %v435_v50 = vpop.f32.mrf.mxu1 }
 0x35c   : > { %v441_v51 = vmul.f32 0.35355338, %v435_v50 }
 0x35d   : > { %v760_v52 = vpop.f32.mrf.mxu1 }
 0x35e   : > { %v442_v53 = vadd.f32 %v441_v51, %v896_v11 }
 0x35f   : > { %v438_v54 = vpop.f32.mrf.mxu1 }
 0x360   : > { %v443_v55 = vsel %vm163_vm1, %v442_v53, -inf }
 0x361   : > { %444 = vmax.xlane.f32.xlu0 %v443_v55  ;;  %v761_v56 = vpop.f32.mrf.mxu1 }
 0x363   : > { %v547_v57 = vpop.f32.mrf.mxu1 }
 0x364   : > { %v553_v58 = vmul.f32 0.35355338, %v547_v57 }
 0x365   : > { %v772_v59 = vpop.f32.mrf.mxu1 }
 0x366   : > { %v554_v60 = vadd.f32 %v553_v58, %v896_v11 }
 0x367   : > { %v550_v61 = vpop.f32.mrf.mxu1 }
 0x368   : > { %v555_v62 = vsel %vm163_vm1, %v554_v60, -inf }
 0x369   : > { %556 = vmax.xlane.f32.xlu1 %v555_v62  ;;  %v773_v63 = vpop.f32.mrf.mxu1 }
 0x3e2   : > { %v333_v1 = vpop.xlane.xlu1 %332 }
 0x3e3   : > { %v334_v3 = vsub.f32 %v330_v46, %v333_v1 }
 0x3e5   : > { %v335_v4 = vmul.f32 1.442695, %v334_v3 }
 0x3e7   : > { %809 = vpow2.f32 %v335_v4 }
 0x3ea   : > { %v445_v12 = vpop.xlane.xlu0 %444 }
 0x3eb   : > { %v446_v13 = vsub.f32 %v442_v53, %v445_v12 }
 0x3ed   : > { %v447_v14 = vmul.f32 1.442695, %v446_v13 }
 0x3f2   : > { %v557_v5 = vpop.xlane.xlu1 %556 }
 0x3f3   : > { %v558_v6 = vsub.f32 %v554_v60, %v557_v5 }
 0x3f4   : > { %v810_v7 = vpop.eup %809 }
 0x3f5   : > { %v559_v8 = vmul.f32 1.442695, %v558_v6  ;;  %v337_v9 = vsel %vm163_vm1, %v810_v7, 0.0 }
 0x3f6   : > { %338 = vadd.xlane.f32.xlu1 %v337_v9 }
 0x3f7   : > { %811 = vpow2.f32 %v559_v8 }
 0x3f8   : > { %813 = vpow2.f32 %v447_v14 }
 0x404   : > { %v812_v10 = vpop.eup %811 }
 0x405   : > { %v561_v11 = vsel %vm163_vm1, %v812_v10, 0.0  ;;  %v814_v15 = vpop.eup %813 }
 0x406   : > { %562 = vadd.xlane.f32.xlu0 %v561_v11  ;;  %v449_v16 = vsel %vm163_vm1, %v814_v15, 0.0 }
 0x407   : > { %343 = vrot.lane.b32.xlu1 %v882_v2, %s839_s26 }
 0x41c   : > { %455 = vrot.lane.b32.xlu0 %v882_v2, %s840_s27 }
 0x42b   : > { %450 = vadd.xlane.f32.xlu1 %v449_v16 }
 0x43c   : > { %567 = vrot.lane.b32.xlu1 %v882_v2, %s841_s28 }
 0x47f   : > { %v339_v17 = vpop.xlane.xlu1 %338 }
 0x480   : > { %815 = vrcp.f32 %v339_v17 }
 0x483   : > { %v344_v18 = vpop.permute.xlu1 %343 }
 0x484   : > { %v349_v19 = vsel %vm235_vm2, %v344_v18, 0 }
 0x485   : > { %751 = vmatpush3.bf16.msra.mxu0 %v349_v19 }
 0x486   : > { %762 = vmatprep.subr.bf16.mxu0 %v829_v0 }
 0x48d   : > { %v816_v20 = vpop.eup %815 }
 0x48e   : > { %v341_v21 = vmul.f32 %v816_v20, %v810_v7 }
 0x48f   : > { %v563_v22 = vpop.xlane.xlu0 %562 }
 0x490   : > { %v342_v23 = vpack.c.bf16 %v341_v21, %v341_v21 }
 0x492   : > { %753 = vmatmul.mubr.msk.bf16.vlgmr.msra.gmra.mxu0 %vm163_vm1, %v342_v23 }
 0x493   : > { %v456_v24 = vpop.permute.xlu0 %455  ;;  %764 = vmatprep.mubr.msk.bf16.mxu0 %vm830_vm0, %v829_v0 }
 0x494   : > { %v461_v2 = vsel %vm235_vm2, %v456_v24, 0 }
 0x495   : > { %763 = vmatpush3.bf16.msra.mxu0 %v461_v2 }
 0x496   : > { %774 = vmatprep.subr.bf16.mxu0 %v829_v0 }
 0x4b4   : > { %v451_v25 = vpop.xlane.xlu1 %450 }
 0x4b5   : > { %817 = vrcp.f32 %v451_v25 }
 0x4b6   : > { %819 = vrcp.f32 %v563_v22 }
 0x4b8   : > { %v568_v27 = vpop.permute.xlu1 %567 }
 0x4b9   : > { %v573_v29 = vsel %vm235_vm2, %v568_v27, 0 }
 0x4c2   : > { %v818_v26 = vpop.eup %817 }
 0x4c3   : > { %v453_v28 = vmul.f32 %v818_v26, %v814_v15  ;;  %v820_v31 = vpop.eup %819 }
 0x4c4   : > { %v565_v32 = vmul.f32 %v820_v31, %v812_v10 }
 0x4c5   : > { %v454_v30 = vpack.c.bf16 %v453_v28, %v453_v28 }
 0x4c6   : > { %v566_v33 = vpack.c.bf16 %v565_v32, %v565_v32 }
 0x4c7   : > { %765 = vmatmul.mubr.msk.bf16.vlgmr.msra.gmra.mxu0 %vm163_vm1, %v454_v30 }
 0x4c8   : > { %775 = vmatpush3.bf16.msra.mxu0 %v573_v29  ;;  %776 = vmatprep.mubr.msk.bf16.mxu0 %vm830_vm0, %v829_v0 }
 0x4cf   : > { %777 = vmatmul.mubr.msk.bf16.vlgmr.msra.gmra.mxu0 %vm163_vm1, %v566_v33 }
 0x552   : > { %v385_v34 = vpop.f32.mrf.mxu0 }
 0x553   : > { %616 = vrot.lane.b32.xlu1 %v385_v34, %s842_s29 }
 0x554   : > { %v754_v35 = vpop.f32.mrf.mxu0 }
 0x556   : > { %v388_v36 = vpop.f32.mrf.mxu0 }
 0x558   : > { %v755_v37 = vpop.f32.mrf.mxu0 }
 0x587   : > { %v497_v38 = vpop.f32.mrf.mxu0 }
 0x588   : > { %620 = vrot.lane.b32.xlu0 %v497_v38, %s843_s30 }
 0x589   : > { %v766_v40 = vpop.f32.mrf.mxu0 }
 0x58b   : > { %v500_v41 = vpop.f32.mrf.mxu0 }
 0x58d   : > { %v767_v42 = vpop.f32.mrf.mxu0 }
 0x58f   : > { %v609_v43 = vpop.f32.mrf.mxu0 }
 0x590   : > { %624 = vrot.lane.b32.xlu1 %v609_v43, %s844_s3 }
 0x591   : > { %v778_v0 = vpop.f32.mrf.mxu0 }
 0x593   : > { %v612_v44 = vpop.f32.mrf.mxu0 }
 0x595   : > { %v779_v45 = vpop.f32.mrf.mxu0 }
 0x5c5   : > { %v617_v46 = vpop.permute.xlu1 %616 }
 0x5c6   : > { %v627_v48 = vsel %vm163_vm1, %v923_v39, %v617_v46 }
 0x5fa   : > { %v621_v47 = vpop.permute.xlu0 %620 }
 0x5fb   : > { %v629_v49 = vsel %vm628_vm3, %v627_v48, %v621_v47 }
 0x602   : > { %v625_v50 = vpop.permute.xlu1 %624 }
 0x603   : > { %v631_v51 = vsel %vm630_vm4, %v629_v49, %v625_v50 }
 0x604   : > { %v632_v52 = vpack.c.bf16 %v631_v51, %v631_v51 }
 0x606   : > { %634 = vst.msk [vmem:[%s152_s6] sm:$0xf] %vm633_vm5, %v632_v52 }
 0x607 PF: > { %s12_s9 = sadd.s32 1, %s827_s9  }
 0x608   : > { %p9_p4 = scmp.ge.s32.totalorder %s12_s9, 4  }
 0x60a   :  { %11 = sbr.rel (!%p9_p4) target bundleno = 1 (0x1), region = 61 }

// kernel: translation_forward.58
= control target key start
LH: loop header
LB: loop body
LE: loop exit
PB: predicated region body
PF: predicated region fallthrough
CT: control target
= control target key end

     0   :  { %vm19_vm0 = vcmask 523264   ;;  %v151_v0 = vmov 0.0   ;;  %vm152_vm1 = vmmov 0   ;;  %vm47_vm2 = vcmask 261120   ;;  %s195_s1 = inlined_call_operand.vmem [shape: bf16[32,64], index: 1, kind: input, shape index: {}]   ;;  %s196_s0 = inlined_call_operand.vmem [shape: bf16[16,32], index: 0, kind: input, shape index: {}]   ;;  %s197_s2 = inlined_call_operand.vmem [shape: f32[1,64], index: 2, kind: input, shape index: {}]   ;;  %s198_s3 = inlined_call_operand.vmem [shape: bf16[16,64], index: 3, kind: output, shape index: {}]  }
   0x1   :  { %138 = vmatprep.subr.bf16.mxu0 %v151_v0  ;;  %v148_v1 = vld [vmem:[%s195_s1 + $0x8] sm:$0xff]   ;;  %142 = vmatprep.mubr.msk.bf16.mxu0 %vm152_vm1, %v151_v0  ;;  %20 = vst.msk [vmem:[#allocation2] sm:$0xff] %vm19_vm0, %v151_v0  ;;  %21 = vst.msk [vmem:[#allocation2 + $0x8] sm:$0xff] %vm19_vm0, %v151_v0  ;;  %v149_v2 = vld [vmem:[%s195_s1] sm:$0xff]   ;;  %vm119_vm3 = vcmask 519168  }
   0x2   :  { %139 = vmatpush3.bf16.msra.mxu0 %v148_v1  ;;  %v150_v3 = vld [vmem:[%s196_s0] sm:$0xff]  }
   0x3   :  { %140 = vmatprep.subr.bf16.mxu0 %v151_v0  ;;  %v130_v12 = vld [vmem:[%s197_s2] ss:$0 sm:$0xff] }
   0x6   :  { %141 = vmatpush3.bf16.msra.mxu0 %v149_v2 }
   0x8   :  { %v22_v4 = vld [vmem:[#allocation2] sm:$0xff]  ;;  %v23_v8 = vld [vmem:[#allocation2 + $0x8] sm:$0xff] }
   0x9   :  { %143 = vmatmul.mubr.msk.bf16.vlgmr.msra.gmra.mxu0 %vm47_vm2, %v150_v3 }
  0xc9   :  { %v85_v5 = vpop.f32.mrf.mxu0 }
  0xca   :  { %v92_v6 = vadd.f32 %v85_v5, %v22_v4 }
  0xcb   :  { %v144_v7 = vpop.f32.mrf.mxu0 }
  0xcc   :  { %95 = vst.msk [vmem:[#allocation2] sm:$0xff] %vm19_vm0, %v92_v6 }
  0xcd   :  { %v88_v9 = vpop.f32.mrf.mxu0 }
  0xce   :  { %v93_v10 = vadd.f32 %v88_v9, %v23_v8 }
  0xcf   :  { %v145_v11 = vpop.f32.mrf.mxu0 }
  0xd0   :  { %96 = vst.msk [vmem:[#allocation2 + $0x8] sm:$0xff] %vm19_vm0, %v93_v10 }
  0xd3   :  { %v100_v13 = vld [vmem:[#allocation2] sm:$0xff] }
  0xd4   :  { %v109_v14 = vadd.f32 %v130_v12, %v100_v13 }
  0xd6   :  { %v133_v15 = vpack.c.bf16 %v109_v14, %v109_v14 }
  0xd7   :  { %v101_v16 = vld [vmem:[#allocation2 + $0x8] sm:$0xff] }
  0xd8   :  { %120 = vst.msk [vmem:[%s198_s3] sm:$0xf] %vm119_vm3, %v133_v15  ;;  %v110_v17 = vadd.f32 %v130_v12, %v101_v16 }
  0xda   :  { %v134_v18 = vpack.c.bf16 %v110_v17, %v110_v17 }
  0xdc   :  { %121 = vst.msk [vmem:[%s198_s3 + $0x4] sm:$0xf] %vm119_vm3, %v134_v18 }

// kernel: translation_forward.43
= control target key start
LH: loop header
LB: loop body
LE: loop exit
PB: predicated region body
PF: predicated region fallthrough
CT: control target
= control target key end

     0   :  { %vm19_vm0 = vcmask 523264   ;;  %v175_v0 = vmov 0.0   ;;  %vm176_vm1 = vmmov 0   ;;  %vm47_vm2 = vcmask 261120   ;;  %s219_s1 = inlined_call_operand.vmem [shape: bf16[32,64], index: 1, kind: input, shape index: {}]   ;;  %s220_s0 = inlined_call_operand.vmem [shape: bf16[16,32], index: 0, kind: input, shape index: {}]   ;;  %s221_s2 = inlined_call_operand.vmem [shape: f32[1,64], index: 2, kind: input, shape index: {}]   ;;  %s222_s3 = inlined_call_operand.vmem [shape: bf16[16,64], index: 3, kind: output, shape index: {}]  }
   0x1   :  { %154 = vmatprep.subr.bf16.mxu0 %v175_v0  ;;  %v164_v1 = vld [vmem:[%s219_s1 + $0x8] sm:$0xff]   ;;  %158 = vmatprep.mubr.msk.bf16.mxu0 %vm176_vm1, %v175_v0  ;;  %20 = vst.msk [vmem:[#allocation2] sm:$0xff] %vm19_vm0, %v175_v0  ;;  %21 = vst.msk [vmem:[#allocation2 + $0x8] sm:$0xff] %vm19_vm0, %v175_v0  ;;  %v165_v2 = vld [vmem:[%s219_s1] sm:$0xff]   ;;  %vm133_vm3 = vcmask 519168  }
   0x2   :  { %155 = vmatpush3.bf16.msra.mxu0 %v164_v1  ;;  %v166_v3 = vld [vmem:[%s220_s0] sm:$0xff]  }
   0x3   :  { %156 = vmatprep.subr.bf16.mxu0 %v175_v0  ;;  %v144_v12 = vld [vmem:[%s221_s2] ss:$0 sm:$0xff] }
   0x6   :  { %157 = vmatpush3.bf16.msra.mxu0 %v165_v2 }
   0x8   :  { %v22_v4 = vld [vmem:[#allocation2] sm:$0xff]  ;;  %v23_v8 = vld [vmem:[#allocation2 + $0x8] sm:$0xff] }
   0x9   :  { %159 = vmatmul.mubr.msk.bf16.vlgmr.msra.gmra.mxu0 %vm47_vm2, %v166_v3 }
  0xc9   :  { %v85_v5 = vpop.f32.mrf.mxu0 }
  0xca   :  { %v92_v6 = vadd.f32 %v85_v5, %v22_v4 }
  0xcb   :  { %v160_v7 = vpop.f32.mrf.mxu0 }
  0xcc   :  { %95 = vst.msk [vmem:[#allocation2] sm:$0xff] %vm19_vm0, %v92_v6 }
  0xcd   :  { %v88_v9 = vpop.f32.mrf.mxu0 }
  0xce   :  { %v93_v10 = vadd.f32 %v88_v9, %v23_v8 }
  0xcf   :  { %v161_v11 = vpop.f32.mrf.mxu0 }
  0xd0   :  { %96 = vst.msk [vmem:[#allocation2 + $0x8] sm:$0xff] %vm19_vm0, %v93_v10 }
  0xd3   :  { %v100_v13 = vld [vmem:[#allocation2] sm:$0xff] }
  0xd4   :  { %v109_v14 = vadd.f32 %v144_v12, %v100_v13 }
  0xd6   :  { %v145_v15 = vmul.f32 -1.442695, %v109_v14 }
  0xd7   :  { %v101_v16 = vld [vmem:[#allocation2 + $0x8] sm:$0xff] }
  0xd8   :  { %167 = vpow2.f32 %v145_v15  ;;  %v110_v17 = vadd.f32 %v144_v12, %v101_v16 }
  0xda   :  { %v146_v18 = vmul.f32 -1.442695, %v110_v17 }
  0xdc   :  { %169 = vpow2.f32 %v146_v18 }
  0xe5   :  { %v168_v19 = vpop.eup %167 }
  0xe6   :  { %v117_v20 = vadd.f32 1.0, %v168_v19 }
  0xe8   :  { %171 = vrcp.f32 %v117_v20 }
  0xe9   :  { %v170_v21 = vpop.eup %169 }
  0xea   :  { %v118_v22 = vadd.f32 1.0, %v170_v21 }
  0xec   :  { %173 = vrcp.f32 %v118_v22 }
  0xf5   :  { %v172_v23 = vpop.eup %171 }
  0xf6   :  { %v123_v24 = vmul.f32 %v172_v23, %v109_v14 }
  0xf8   :  { %v149_v25 = vpack.c.bf16 %v123_v24, %v123_v24 }
  0xf9   :  { %v174_v26 = vpop.eup %173 }
  0xfa   :  { %134 = vst.msk [vmem:[%s222_s3] sm:$0xf] %vm133_vm3, %v149_v25  ;;  %v124_v27 = vmul.f32 %v174_v26, %v110_v17 }
  0xfc   :  { %v150_v28 = vpack.c.bf16 %v124_v27, %v124_v27 }
  0xfe   :  { %135 = vst.msk [vmem:[%s222_s3 + $0x4] sm:$0xf] %vm133_vm3, %v150_v28 }

// kernel: translation_forward.44
= control target key start
LH: loop header
LB: loop body
LE: loop exit
PB: predicated region body
PF: predicated region fallthrough
CT: control target
= control target key end

     0   :  { %vm19_vm0 = vcmask 261120   ;;  %v177_v0 = vmov 0.0   ;;  %vm178_vm1 = vmmov 0   ;;  %vm63_vm2 = vcmask 523264   ;;  %s227_s1 = inlined_call_operand.vmem [shape: bf16[64,32], index: 1, kind: input, shape index: {}]   ;;  %s228_s0 = inlined_call_operand.vmem [shape: bf16[16,64], index: 0, kind: input, shape index: {}]   ;;  %s229_s2 = inlined_call_operand.vmem [shape: f32[1,32], index: 2, kind: input, shape index: {}]   ;;  %s230_s3 = inlined_call_operand.vmem [shape: bf16[16,32], index: 3, kind: output, shape index: {}]  }
   0x1   :  { %158 = vmatprep.subr.bf16.mxu0 %v177_v0  ;;  %v172_v1 = vld [vmem:[%s227_s1 + $0x18] sm:$0xff]   ;;  %166 = vmatprep.mubr.msk.bf16.mxu0 %vm178_vm1, %v177_v0  ;;  %20 = vst.msk [vmem:[#allocation2] sm:$0xff] %vm19_vm0, %v177_v0  ;;  %21 = vst.msk [vmem:[#allocation2 + $0x8] sm:$0xff] %vm19_vm0, %v177_v0  ;;  %v173_v2 = vld [vmem:[%s227_s1 + $0x10] sm:$0xff]   ;;  %vm135_vm3 = vcmask 257024  }
   0x2   :  { %159 = vmatpush3.bf16.msra.mxu0 %v172_v1  ;;  %v174_v3 = vld [vmem:[%s227_s1 + $0x8] sm:$0xff]   ;;  %v175_v4 = vld [vmem:[%s227_s1] sm:$0xff]  }
   0x3   :  { %160 = vmatprep.subr.bf16.mxu0 %v177_v0  ;;  %v176_v5 = vld [vmem:[%s228_s0] sm:$0xff]  }
   0x4   :  { %v148_v14 = vld [vmem:[%s229_s2] ss:$0 sm:$0xff] }
   0x6   :  { %161 = vmatpush3.bf16.msra.mxu0 %v173_v2 }
   0x7   :  { %162 = vmatprep.subr.bf16.mxu0 %v177_v0 }
   0x8   :  { %v22_v6 = vld [vmem:[#allocation2] sm:$0xff]  ;;  %v23_v10 = vld [vmem:[#allocation2 + $0x8] sm:$0xff] }
   0xa   :  { %163 = vmatpush3.bf16.msra.mxu0 %v174_v3 }
   0xb   :  { %164 = vmatprep.subr.bf16.mxu0 %v177_v0 }
   0xe   :  { %165 = vmatpush3.bf16.msra.mxu0 %v175_v4 }
  0x11   :  { %167 = vmatmul.mubr.msk.bf16.vlgmr.msra.gmra.mxu0 %vm63_vm2, %v176_v5 }
  0xd1   :  { %v101_v7 = vpop.f32.mrf.mxu0 }
  0xd2   :  { %v108_v8 = vadd.f32 %v101_v7, %v22_v6 }
  0xd3   :  { %v168_v9 = vpop.f32.mrf.mxu0 }
  0xd4   :  { %111 = vst.msk [vmem:[#allocation2] sm:$0xff] %vm19_vm0, %v108_v8 }
  0xd5   :  { %v104_v11 = vpop.f32.mrf.mxu0 }
  0xd6   :  { %v109_v12 = vadd.f32 %v104_v11, %v23_v10 }
  0xd7   :  { %v169_v13 = vpop.f32.mrf.mxu0 }
  0xd8   :  { %112 = vst.msk [vmem:[#allocation2 + $0x8] sm:$0xff] %vm19_vm0, %v109_v12 }
  0xdb   :  { %v116_v15 = vld [vmem:[#allocation2] sm:$0xff] }
  0xdc   :  { %v125_v16 = vadd.f32 %v148_v14, %v116_v15 }
  0xde   :  { %v151_v17 = vpack.c.bf16 %v125_v16, %v125_v16 }
  0xdf   :  { %v117_v18 = vld [vmem:[#allocation2 + $0x8] sm:$0xff] }
  0xe0   :  { %136 = vst.msk [vmem:[%s230_s3] sm:$0xf] %vm135_vm3, %v151_v17  ;;  %v126_v19 = vadd.f32 %v148_v14, %v117_v18 }
  0xe2   :  { %v152_v20 = vpack.c.bf16 %v126_v19, %v126_v19 }
  0xe4   :  { %137 = vst.msk [vmem:[%s230_s3 + $0x4] sm:$0xf] %vm135_vm3, %v152_v20 }

// kernel: translation_forward.54
= control target key start
LH: loop header
LB: loop body
LE: loop exit
PB: predicated region body
PF: predicated region fallthrough
CT: control target
= control target key end

     0   :  { %s869_s9 = smov 0   ;;  %s968_s0 = inlined_call_operand.vmem [shape: bf16[2,8,96], index: 0, kind: input, shape index: {}]   ;;  %s969_s1 = inlined_call_operand.vmem [shape: f32[2,1,8], index: 1, kind: input, shape index: {}]   ;;  %s970_s2 = inlined_call_operand.vmem [shape: bf16[2,8,32], index: 2, kind: output, shape index: {}]  }
   0x1 LB: > { %s704_s10 = sadd.s32 4294967295, %s835_s9   ;;  %p708_p0 = scmp.ge.s32.totalorder %s835_s9, 1  ;;  %s835_s9 = sphi %s869_s9, %s12_s9  }
   0x2   : > { %p119_p1 = scmp.lt.s32.totalorder %s835_s9, 3 }
   0x4   : > { %p120_p2 = pnand %p708_p0, %p119_p1 }
   0x5   : > { %p142_p3 = scmp.lt.s32.totalorder (!%p120_p2), %s704_s10, 1  ;;  %s839_s15 = smov (!%p120_p2), 96  }
   0x6   : > { %123 = sbr.rel (%p120_p2) target bundleno = 1543 (0x607), region = 28  ;;  %s840_s16 = smov (!%p120_p2), 64  }
   0x7   : > { %s841_s17 = smov (!%p120_p2), 88   ;;  %s843_s21 = smov (!%p120_p2), 72  }
   0x8   : > { %s844_s22 = smov (!%p120_p2), 120   ;;  %s845_s23 = smov (!%p120_p2), 80  }
   0x9   : > { %s846_s24 = smov (!%p120_p2), 112   ;;  %s847_s25 = smov (!%p120_p2), 104  }
   0xa   : > { %s848_s26 = smov (!%p120_p2), 56   ;;  %s849_s27 = smov (!%p120_p2), 48  }
   0xb   : > { %v837_v0 = vmov 0.0   ;;  %vm838_vm0 = vmmov 0   ;;  %s972_s10 = smov (!%p142_p3, %s704_s10), 1  ;;  %vm176_vm1 = vcmask 64512   ;;  %v158_v5 = vlaneseq  ;;  %s850_s28 = smov 40  }
   0xc   : > { %739 = vmatprep.subr.bf16.mxu0 %v837_v0  ;;  %741 = vmatprep.mubr.msk.bf16.mxu0 %vm838_vm0, %v837_v0  ;;  %s709_s11 = sshll.u32 %s972_s10, 2  ;;  %s148_s20 = scalar_lea.vmem %s969_s1, %s972_s10  ;;  %v842_v13 = vmov -1e+09   ;;  %vm242_vm3 = vcmask 1043456   ;;  %vm635_vm4 = vcmask 130048   ;;  %vm637_vm5 = vcmask 195584  }
   0xd   : > { %745 = vmatprep.subr.bf16.mxu1 %v837_v0  ;;  %747 = vmatprep.mubr.msk.bf16.mxu1 %vm838_vm0, %v837_v0  ;;  %s145_s14 = scalar_lea.vmem %s968_s0, %s709_s11  ;;  %v155_v6 = vld [vmem:[%s148_s20] sm:$0x1]  ;;  %v159_v8 = vshrl.u32 %v158_v5, 7  ;;  %v161_v9 = vand.u32 127, %v158_v5  ;;  %s851_s29 = smov 8   ;;  %vm640_vm6 = vcmask 257024  }
   0xe   : > { %v154_v1 = vld [vmem:[%s145_s14] sm:$0xf]  ;;  %v711_v7 = vadd.f32 -1.0, %v155_v6  ;;  %s852_s30 = smov 16   ;;  %s853_s3 = smov 24  }
   0xf   : > { %v891_v2 = vcombine.low %v154_v1, %v154_v1  ;;  %v167_v11 = vsub.s32 0, %v159_v8  ;;  %vm162_vm2 = vcmp.le.s32.totalorder %v161_v9, %v159_v8  ;;  %s152_s6 = scalar_lea.vmem %s970_s2, %s709_s11 }
  0x10   : > { %v157_v10 = vmul.f32 1e+09, %v711_v7  ;;  %v163_v14 = vsel %vm162_vm2, 0.0, %v842_v13 }
  0x11   : > { %174 = vrot.lane.b32.xlu0 %v891_v2, %s839_s15  ;;  %237 = vrot.lane.b32.xlu1 %v891_v2, %s840_s16 }
  0x12   : > { %v168_v12 = vrot.slane %v157_v10, %v167_v11 }
  0x14   : > { %v905_v15 = vadd.f32 %v168_v12, %v163_v14 }
  0x15   : > { %288 = vrot.lane.b32.xlu1 %v891_v2, %s841_s17 }
  0x83   : > { %v175_v3 = vpop.permute.xlu0 %174  ;;  %v238_v23 = vpop.permute.xlu1 %237 }
  0x84   : > { %v181_v4 = vsel %vm176_vm1, %v175_v3, 0  ;;  %v244_v24 = vsel %vm242_vm3, %v238_v23, 0 }
  0x85   : > { %740 = vmatpush3.bf16.xpose.msra.mxu0 %v181_v4  ;;  %746 = vmatpush3.bf16.msra.mxu1 %v244_v24 }
  0x86   : > { %757 = vmatprep.subr.bf16.mxu0 %v837_v0  ;;  %751 = vmatprep.subr.bf16.mxu1 %v837_v0 }
  0x87   : > { %v289_v30 = vpop.permute.xlu1 %288 }
  0x88   : > { %v294_v36 = vsel %vm176_vm1, %v289_v30, 0 }
  0x8c   : > { %742 = vmatmul.mubr.msk.bf16.vlgmr.msra.gmra.mxu0 %vm176_vm1, %v154_v1 }
  0x8d   : > { %759 = vmatprep.mubr.msk.bf16.mxu0 %vm838_vm0, %v837_v0 }
 0x14c   : > { %v217_v16 = vpop.f32.mrf.mxu0 }
 0x14d   : > { %v223_v17 = vmul.f32 0.35355338, %v217_v16 }
 0x14e   : > { %v743_v18 = vpop.f32.mrf.mxu0 }
 0x14f   : > { %v224_v19 = vadd.f32 %v223_v17, %v905_v15 }
 0x150   : > { %v220_v20 = vpop.f32.mrf.mxu0 }
 0x151   : > { %v225_v21 = vsel %vm176_vm1, %v224_v19, -inf }
 0x152   : > { %226 = vmax.xlane.f32.xlu0 %v225_v21  ;;  %v744_v22 = vpop.f32.mrf.mxu0 }
 0x168   : > { %512 = vrot.lane.b32.xlu0 %v891_v2, %s843_s21 }
 0x1db   : > { %v227_v25 = vpop.xlane.xlu0 %226 }
 0x1dc   : > { %v228_v26 = vsub.f32 %v224_v19, %v227_v25 }
 0x1de   : > { %v229_v27 = vmul.f32 1.442695, %v228_v26 }
 0x1df   : > { %v513_v39 = vpop.permute.xlu0 %512 }
 0x1e0   : > { %813 = vpow2.f32 %v229_v27  ;;  %v518_v41 = vsel %vm176_vm1, %v513_v39, 0 }
 0x1ed   : > { %v814_v28 = vpop.eup %813 }
 0x1ee   : > { %v231_v29 = vsel %vm176_vm1, %v814_v28, 0.0 }
 0x1ef   : > { %232 = vadd.xlane.f32.xlu1 %v231_v29 }
 0x200   : > { %286 = vrot.lane.b32.xlu1 %v891_v2, %s844_s22 }
 0x204   : > { %400 = vrot.lane.b32.xlu1 %v891_v2, %s845_s23 }
 0x208   : > { %398 = vrot.lane.b32.xlu1 %v891_v2, %s846_s24 }
 0x20c   : > { %510 = vrot.lane.b32.xlu1 %v891_v2, %s847_s25 }
 0x278   : > { %v233_v31 = vpop.xlane.xlu1 %232 }
 0x279   : > { %815 = vrcp.f32 %v233_v31 }
 0x27c   : > { %v287_v34 = vpop.permute.xlu1 %286 }
 0x280   : > { %v401_v37 = vpop.permute.xlu1 %400 }
 0x281   : > { %v406_v38 = vsel %vm176_vm1, %v401_v37, 0 }
 0x284   : > { %v399_v40 = vpop.permute.xlu1 %398 }
 0x286   : > { %v816_v32 = vpop.eup %815 }
 0x287   : > { %v235_v33 = vmul.f32 %v816_v32, %v814_v28 }
 0x288   : > { %v511_v42 = vpop.permute.xlu1 %510 }
 0x289   : > { %v236_v35 = vpack.c.bf16 %v235_v33, %v235_v33 }
 0x28b   : > { %748 = vmatmul.mubr.msk.bf16.vlgmr.msra.gmra.mxu1 %vm176_vm1, %v236_v35 }
 0x28c   : > { %752 = vmatpush3.bf16.xpose.msra.mxu1 %v294_v36  ;;  %753 = vmatprep.mubr.msk.bf16.mxu1 %vm838_vm0, %v837_v0 }
 0x28d   : > { %763 = vmatprep.subr.bf16.mxu1 %v837_v0 }
 0x293   : > { %754 = vmatmul.mubr.msk.bf16.vlgmr.msra.gmra.mxu1 %vm176_vm1, %v287_v34 }
 0x294   : > { %764 = vmatpush3.bf16.xpose.msra.mxu1 %v406_v38  ;;  %765 = vmatprep.mubr.msk.bf16.mxu1 %vm838_vm0, %v837_v0 }
 0x295   : > { %775 = vmatprep.subr.bf16.mxu1 %v837_v0 }
 0x29b   : > { %766 = vmatmul.mubr.msk.bf16.vlgmr.msra.gmra.mxu1 %vm176_vm1, %v399_v40 }
 0x29c   : > { %776 = vmatpush3.bf16.xpose.msra.mxu1 %v518_v41  ;;  %777 = vmatprep.mubr.msk.bf16.mxu1 %vm838_vm0, %v837_v0 }
 0x2a3   : > { %778 = vmatmul.mubr.msk.bf16.vlgmr.msra.gmra.mxu1 %vm176_vm1, %v511_v42 }
 0x34b   : > { %v932_v43 = vpop.f32.mrf.mxu1 }
 0x34d   : > { %v749_v44 = vpop.f32.mrf.mxu1 }
 0x34f   : > { %v283_v45 = vpop.f32.mrf.mxu1 }
 0x351   : > { %v750_v46 = vpop.f32.mrf.mxu1 }
 0x353   : > { %v330_v47 = vpop.f32.mrf.mxu1 }
 0x354   : > { %v336_v48 = vmul.f32 0.35355338, %v330_v47 }
 0x355   : > { %v755_v49 = vpop.f32.mrf.mxu1 }
 0x356   : > { %v337_v50 = vadd.f32 %v336_v48, %v905_v15 }
 0x357   : > { %v333_v51 = vpop.f32.mrf.mxu1 }
 0x358   : > { %v338_v52 = vsel %vm176_vm1, %v337_v50, -inf }
 0x359   : > { %339 = vmax.xlane.f32.xlu1 %v338_v52  ;;  %v756_v53 = vpop.f32.mrf.mxu1 }
 0x35b   : > { %v442_v54 = vpop.f32.mrf.mxu1 }
 0x35c   : > { %v448_v55 = vmul.f32 0.35355338, %v442_v54 }
 0x35d   : > { %v767_v56 = vpop.f32.mrf.mxu1 }
 0x35e   : > { %v449_v57 = vadd.f32 %v448_v55, %v905_v15 }
 0x35f   : > { %v445_v58 = vpop.f32.mrf.mxu1 }
 0x360   : > { %v450_v59 = vsel %vm176_vm1, %v449_v57, -inf }
 0x361   : > { %451 = vmax.xlane.f32.xlu0 %v450_v59  ;;  %v768_v60 = vpop.f32.mrf.mxu1 }
 0x363   : > { %v554_v61 = vpop.f32.mrf.mxu1 }
 0x364   : > { %v560_v62 = vmul.f32 0.35355338, %v554_v61 }
 0x365   : > { %v779_v63 = vpop.f32.mrf.mxu1 }
 0x366   : > { %v561_v1 = vadd.f32 %v560_v62, %v905_v15 }
 0x367   : > { %v557_v3 = vpop.f32.mrf.mxu1 }
 0x368   : > { %v562_v4 = vsel %vm176_vm1, %v561_v1, -inf }
 0x369   : > { %563 = vmax.xlane.f32.xlu1 %v562_v4  ;;  %v780_v5 = vpop.f32.mrf.mxu1 }
 0x3e2   : > { %v340_v6 = vpop.xlane.xlu1 %339 }
 0x3e3   : > { %v341_v7 = vsub.f32 %v337_v50, %v340_v6 }
 0x3e5   : > { %v342_v8 = vmul.f32 1.442695, %v341_v7 }
 0x3e7   : > { %817 = vpow2.f32 %v342_v8 }
 0x3ea   : > { %v452_v16 = vpop.xlane.xlu0 %451 }
 0x3eb   : > { %v453_v17 = vsub.f32 %v449_v57, %v452_v16 }
 0x3ed   : > { %v454_v18 = vmul.f32 1.442695, %v453_v17 }
 0x3f2   : > { %v564_v9 = vpop.xlane.xlu1 %563 }
 0x3f3   : > { %v565_v10 = vsub.f32 %v561_v1, %v564_v9 }
 0x3f4   : > { %v818_v11 = vpop.eup %817 }
 0x3f5   : > { %v566_v12 = vmul.f32 1.442695, %v565_v10  ;;  %v344_v13 = vsel %vm176_vm1, %v818_v11, 0.0 }
 0x3f6   : > { %345 = vadd.xlane.f32.xlu1 %v344_v13 }
 0x3f7   : > { %819 = vpow2.f32 %v566_v12 }
 0x3f8   : > { %821 = vpow2.f32 %v454_v18 }
 0x404   : > { %v820_v14 = vpop.eup %819 }
 0x405   : > { %v568_v15 = vsel %vm176_vm1, %v820_v14, 0.0  ;;  %v822_v19 = vpop.eup %821 }
 0x406   : > { %569 = vadd.xlane.f32.xlu0 %v568_v15  ;;  %v456_v20 = vsel %vm176_vm1, %v822_v19, 0.0 }
 0x407   : > { %350 = vrot.lane.b32.xlu1 %v891_v2, %s848_s26 }
 0x41c   : > { %462 = vrot.lane.b32.xlu0 %v891_v2, %s849_s27 }
 0x42b   : > { %457 = vadd.xlane.f32.xlu1 %v456_v20 }
 0x43c   : > { %574 = vrot.lane.b32.xlu1 %v891_v2, %s850_s28 }
 0x47f   : > { %v346_v21 = vpop.xlane.xlu1 %345 }
 0x480   : > { %823 = vrcp.f32 %v346_v21 }
 0x483   : > { %v351_v22 = vpop.permute.xlu1 %350 }
 0x484   : > { %v356_v23 = vsel %vm242_vm3, %v351_v22, 0 }
 0x485   : > { %758 = vmatpush3.bf16.msra.mxu0 %v356_v23 }
 0x486   : > { %769 = vmatprep.subr.bf16.mxu0 %v837_v0 }
 0x48d   : > { %v824_v24 = vpop.eup %823 }
 0x48e   : > { %v348_v25 = vmul.f32 %v824_v24, %v818_v11 }
 0x48f   : > { %v570_v26 = vpop.xlane.xlu0 %569 }
 0x490   : > { %v349_v27 = vpack.c.bf16 %v348_v25, %v348_v25 }
 0x492   : > { %760 = vmatmul.mubr.msk.bf16.vlgmr.msra.gmra.mxu0 %vm176_vm1, %v349_v27 }
 0x493   : > { %v463_v28 = vpop.permute.xlu0 %462  ;;  %771 = vmatprep.mubr.msk.bf16.mxu0 %vm838_vm0, %v837_v0 }
 0x494   : > { %v468_v2 = vsel %vm242_vm3, %v463_v28, 0 }
 0x495   : > { %770 = vmatpush3.bf16.msra.mxu0 %v468_v2 }
 0x496   : > { %781 = vmatprep.subr.bf16.mxu0 %v837_v0 }
 0x4b4   : > { %v458_v29 = vpop.xlane.xlu1 %457 }
 0x4b5   : > { %825 = vrcp.f32 %v458_v29 }
 0x4b6   : > { %827 = vrcp.f32 %v570_v26 }
 0x4b8   : > { %v575_v31 = vpop.permute.xlu1 %574 }
 0x4b9   : > { %v580_v33 = vsel %vm242_vm3, %v575_v31, 0 }
 0x4c2   : > { %v826_v30 = vpop.eup %825 }
 0x4c3   : > { %v460_v32 = vmul.f32 %v826_v30, %v822_v19  ;;  %v828_v35 = vpop.eup %827 }
 0x4c4   : > { %v572_v36 = vmul.f32 %v828_v35, %v820_v14 }
 0x4c5   : > { %v461_v34 = vpack.c.bf16 %v460_v32, %v460_v32 }
 0x4c6   : > { %v573_v37 = vpack.c.bf16 %v572_v36, %v572_v36 }
 0x4c7   : > { %772 = vmatmul.mubr.msk.bf16.vlgmr.msra.gmra.mxu0 %vm176_vm1, %v461_v34 }
 0x4c8   : > { %782 = vmatpush3.bf16.msra.mxu0 %v580_v33  ;;  %783 = vmatprep.mubr.msk.bf16.mxu0 %vm838_vm0, %v837_v0 }
 0x4cf   : > { %784 = vmatmul.mubr.msk.bf16.vlgmr.msra.gmra.mxu0 %vm176_vm1, %v573_v37 }
 0x552   : > { %v392_v38 = vpop.f32.mrf.mxu0 }
 0x553   : > { %623 = vrot.lane.b32.xlu1 %v392_v38, %s851_s29 }
 0x554   : > { %v761_v39 = vpop.f32.mrf.mxu0 }
 0x556   : > { %v395_v40 = vpop.f32.mrf.mxu0 }
 0x558   : > { %v762_v41 = vpop.f32.mrf.mxu0 }
 0x587   : > { %v504_v42 = vpop.f32.mrf.mxu0 }
 0x588   : > { %627 = vrot.lane.b32.xlu0 %v504_v42, %s852_s30 }
 0x589   : > { %v773_v44 = vpop.f32.mrf.mxu0 }
 0x58b   : > { %v507_v45 = vpop.f32.mrf.mxu0 }
 0x58d   : > { %v774_v46 = vpop.f32.mrf.mxu0 }
 0x58f   : > { %v616_v47 = vpop.f32.mrf.mxu0 }
 0x590   : > { %631 = vrot.lane.b32.xlu1 %v616_v47, %s853_s3 }
 0x591   : > { %v785_v0 = vpop.f32.mrf.mxu0 }
 0x593   : > { %v619_v48 = vpop.f32.mrf.mxu0 }
 0x595   : > { %v786_v49 = vpop.f32.mrf.mxu0 }
 0x5c5   : > { %v624_v50 = vpop.permute.xlu1 %623 }
 0x5c6   : > { %v634_v52 = vsel %vm176_vm1, %v932_v43, %v624_v50 }
 0x5fa   : > { %v628_v51 = vpop.permute.xlu0 %627 }
 0x5fb   : > { %v636_v53 = vsel %vm635_vm4, %v634_v52, %v628_v51 }
 0x602   : > { %v632_v54 = vpop.permute.xlu1 %631 }
 0x603   : > { %v638_v55 = vsel %vm637_vm5, %v636_v53, %v632_v54 }
 0x604   : > { %v639_v56 = vpack.c.bf16 %v638_v55, %v638_v55 }
 0x606   : > { %641 = vst.msk [vmem:[%s152_s6] sm:$0xf] %vm640_vm6, %v639_v56 }
 0x607 PF: > { %s12_s9 = sadd.s32 1, %s835_s9  }
 0x608   : > { %p9_p4 = scmp.ge.s32.totalorder %s12_s9, 4  }
 0x60a   :  { %11 = sbr.rel (!%p9_p4) target bundleno = 1 (0x1), region = 61 }

// kernel: translation_forward.77
= control target key start
LH: loop header
LB: loop body
LE: loop exit
PB: predicated region body
PF: predicated region fallthrough
CT: control target
= control target key end

     0   :  { %v153_v0 = vmov 0.0   ;;  %vm154_vm0 = vmmov 0   ;;  %vm46_vm1 = vcmask 261120   ;;  %s190_s1 = inlined_call_operand.vmem [shape: bf16[32,128], index: 1, kind: input, shape index: {}]   ;;  %s191_s0 = inlined_call_operand.vmem [shape: bf16[16,32], index: 0, kind: input, shape index: {}]   ;;  %s192_s2 = inlined_call_operand.vmem [shape: f32[1,128], index: 2, kind: input, shape index: {}]   ;;  %s193_s3 = inlined_call_operand.vmem [shape: bf16[16,128], index: 3, kind: output, shape index: {}]  }
   0x1   :  { %140 = vmatprep.subr.bf16.mxu0 %v153_v0  ;;  %v150_v1 = vld [vmem:[%s190_s1 + $0x8] sm:$0xff]   ;;  %144 = vmatprep.mubr.msk.bf16.mxu0 %vm154_vm0, %v153_v0  ;;  %v151_v2 = vld [vmem:[%s190_s1] sm:$0xff]  }
   0x2   :  { %141 = vmatpush3.bf16.msra.mxu0 %v150_v1  ;;  %v152_v3 = vld [vmem:[%s191_s0] sm:$0xff]  }
   0x3   :  { %142 = vmatprep.subr.bf16.mxu0 %v153_v0  ;;  %v127_v5 = vld [vmem:[%s192_s2] ss:$0 sm:$0xff] }
   0x6   :  { %143 = vmatpush3.bf16.msra.mxu0 %v151_v2 }
   0x9   :  { %145 = vmatmul.mubr.msk.bf16.vlgmr.msra.gmra.mxu0 %vm46_vm1, %v152_v3 }
  0xc9   :  { %v84_v4 = vpop.f32.mrf.mxu0 }
  0xca   :  { %v107_v8 = vadd.f32 %v127_v5, %v84_v4 }
  0xcb   :  { %v146_v6 = vpop.f32.mrf.mxu0 }
  0xcd   :  { %v87_v7 = vpop.f32.mrf.mxu0 }
  0xce   :  { %v108_v9 = vadd.f32 %v127_v5, %v87_v7 }
  0xcf   :  { %v147_v10 = vpop.f32.mrf.mxu0 }
  0xd0   :  { %v135_v11 = vpack.c.bf16 %v108_v9, %v107_v8 }
  0xd2   :  { %136 = vst [vmem:[%s193_s3] sm:$0xff] %v135_v11  }

// kernel: translation_forward.59
= control target key start
LH: loop header
LB: loop body
LE: loop exit
PB: predicated region body
PF: predicated region fallthrough
CT: control target
= control target key end

     0   :  { %s918_s12 = smov 0   ;;  %s1013_s0 = inlined_call_operand.vmem [shape: bf16[2,8,32], index: 0, kind: input, shape index: {}]   ;;  %s1014_s1 = inlined_call_operand.vmem [shape: bf16[2,8,64], index: 1, kind: input, shape index: {}]   ;;  %s1015_s2 = inlined_call_operand.vmem [shape: f32[2,1,8], index: 2, kind: input, shape index: {}]   ;;  %s1016_s3 = inlined_call_operand.vmem [shape: bf16[2,8,32], index: 3, kind: output, shape index: {}]  }
   0x1 LB: > { %s755_s13 = sadd.s32 4294967295, %s884_s12   ;;  %p759_p0 = scmp.ge.s32.totalorder %s884_s12, 1  ;;  %s884_s12 = sphi %s918_s12, %s13_s12  }
   0x2   : > { %p153_p1 = scmp.lt.s32.totalorder %s884_s12, 3 }
   0x4   : > { %p154_p2 = pnand %p759_p0, %p153_p1 }
   0x5   : > { %p182_p3 = scmp.lt.s32.totalorder (!%p154_p2), %s755_s13, 1  ;;  %s888_s24 = smov (!%p154_p2), 96  }
   0x6   : > { %157 = sbr.rel (%p154_p2) target bundleno = 1381 (0x565), region = 32  ;;  %s889_s25 = smov (!%p154_p2), 120  }
   0x7   : > { %s890_s26 = smov (!%p154_p2), 112   ;;  %s891_s27 = smov (!%p154_p2), 104  }
   0x8   : > { %s892_s28 = smov (!%p154_p2), 88   ;;  %s893_s29 = smov (!%p154_p2), 72  }
   0x9   : > { %s894_s30 = smov (!%p154_p2), 80   ;;  %s895_s4 = smov (!%p154_p2), 8  }
   0xa   : > { %s896_s5 = smov (!%p154_p2), 16   ;;  %s897_s6 = smov (!%p154_p2), 24  }
   0xb   : > { %v886_v0 = vmov 0.0   ;;  %vm887_vm0 = vmmov 0   ;;  %s1018_s13 = smov (!%p182_p3, %s755_s13), 1  ;;  %vm203_vm1 = vcmask 64512   ;;  %v252_v4 = vlaneseq }
   0xc   : > { %792 = vmatprep.subr.bf16.mxu0 %v886_v0  ;;  %794 = vmatprep.mubr.msk.bf16.mxu0 %vm887_vm0, %v886_v0  ;;  %s932_s14 = sshll.u32 %s1018_s13, 2  ;;  %s192_s23 = scalar_lea.vmem %s1015_s2, %s1018_s13  ;;  %vm278_vm2 = vcmask 1043456   ;;  %vm674_vm3 = vcmask 130048   ;;  %vm676_vm4 = vcmask 195584   ;;  %vm679_vm5 = vcmask 257024  }
   0xd   : > { %798 = vmatprep.subr.bf16.mxu1 %v886_v0  ;;  %800 = vmatprep.mubr.msk.bf16.mxu1 %vm887_vm0, %v886_v0  ;;  %s189_s17 = scalar_lea.vmem %s1014_s1, %s932_s14  ;;  %s185_s20 = scalar_lea.vmem %s1013_s0, %s932_s14  ;;  %v200_v5 = vld [vmem:[%s192_s23] sm:$0x1]  ;;  %v253_v7 = vshrl.u32 %v252_v4, 7 }
   0xe   : > { %v199_v1 = vld [vmem:[%s189_s17] sm:$0xf]  ;;  %v763_v6 = vadd.f32 -1.0, %v200_v5  ;;  %s196_s9 = scalar_lea.vmem %s1016_s3, %s932_s14 }
   0xf   : > { %v208_v2 = vsel %vm203_vm1, %v199_v1, 0  ;;  %v198_v3 = vld [vmem:[%s185_s20] sm:$0xf]  ;;  %v254_v9 = vsub.s32 0, %v253_v7  ;;  %v954_v18 = vcombine.low %v199_v1, %v199_v1 }
  0x10   : > { %793 = vmatpush3.bf16.xpose.msra.mxu0 %v208_v2  ;;  %v202_v8 = vmul.f32 1e+09, %v763_v6  ;;  %v767_v19 = vcombine.low %v198_v3, %v198_v3 }
  0x11   : > { %810 = vmatprep.subr.bf16.mxu0 %v886_v0  ;;  %273 = vrot.lane.b32.xlu1 %v954_v18, %s888_s24 }
  0x12   : > { %v950_v10 = vrot.slane %v202_v8, %v254_v9 }
  0x15   : > { %327 = vrot.lane.b32.xlu1 %v954_v18, %s889_s25 }
  0x17   : > { %795 = vmatmul.mubr.msk.bf16.vlgmr.msra.gmra.mxu0 %vm203_vm1, %v198_v3 }
  0x18   : > { %812 = vmatprep.mubr.msk.bf16.mxu0 %vm887_vm0, %v886_v0 }
  0x19   : > { %439 = vrot.lane.b32.xlu1 %v954_v18, %s890_s26 }
  0x1d   : > { %437 = vrot.lane.b32.xlu1 %v767_v19, %s890_s26 }
  0x21   : > { %551 = vrot.lane.b32.xlu1 %v954_v18, %s891_s27 }
  0x25   : > { %549 = vrot.lane.b32.xlu1 %v767_v19, %s891_s27 }
  0x83   : > { %v274_v25 = vpop.permute.xlu1 %273 }
  0x84   : > { %v280_v26 = vsel %vm278_vm2, %v274_v25, 0 }
  0x85   : > { %799 = vmatpush3.bf16.msra.mxu1 %v280_v26 }
  0x86   : > { %804 = vmatprep.subr.bf16.mxu1 %v886_v0 }
  0x87   : > { %v328_v29 = vpop.permute.xlu1 %327 }
  0x88   : > { %v333_v31 = vsel %vm203_vm1, %v328_v29, 0 }
  0x8b   : > { %v440_v33 = vpop.permute.xlu1 %439 }
  0x8c   : > { %v445_v36 = vsel %vm203_vm1, %v440_v33, 0 }
  0x8f   : > { %v438_v35 = vpop.permute.xlu1 %437 }
  0x93   : > { %v552_v37 = vpop.permute.xlu1 %551 }
  0x94   : > { %v557_v38 = vsel %vm203_vm1, %v552_v37, 0 }
  0x97   : > { %v550_v39 = vpop.permute.xlu1 %549 }
  0xd7   : > { %v244_v11 = vpop.f32.mrf.mxu0 }
  0xd8   : > { %v250_v12 = vmul.f32 0.35355338, %v244_v11 }
  0xd9   : > { %v796_v13 = vpop.f32.mrf.mxu0 }
  0xda   : > { %v257_v14 = vadd.f32 %v950_v10, %v250_v12 }
  0xdb   : > { %v247_v15 = vpop.f32.mrf.mxu0 }
  0xdc   : > { %v258_v16 = vsel %vm203_vm1, %v257_v14, -inf }
  0xdd   : > { %259 = vmax.xlane.f32.xlu0 %v258_v16  ;;  %v797_v17 = vpop.f32.mrf.mxu0 }
 0x166   : > { %v260_v20 = vpop.xlane.xlu0 %259 }
 0x167   : > { %v261_v21 = vsub.f32 %v257_v14, %v260_v20 }
 0x169   : > { %v262_v22 = vmul.f32 1.442695, %v261_v21 }
 0x16b   : > { %862 = vpow2.f32 %v262_v22 }
 0x178   : > { %v863_v23 = vpop.eup %862 }
 0x179   : > { %v264_v24 = vsel %vm203_vm1, %v863_v23, 0.0 }
 0x17a   : > { %265 = vadd.xlane.f32.xlu0 %v264_v24 }
 0x190   : > { %325 = vrot.lane.b32.xlu0 %v767_v19, %s889_s25 }
 0x203   : > { %v266_v27 = vpop.xlane.xlu0 %265 }
 0x204   : > { %864 = vrcp.f32 %v266_v27 }
 0x207   : > { %v326_v34 = vpop.permute.xlu0 %325 }
 0x211   : > { %v865_v28 = vpop.eup %864 }
 0x212   : > { %v268_v30 = vmul.f32 %v865_v28, %v863_v23 }
 0x214   : > { %v269_v32 = vpack.c.bf16 %v268_v30, %v268_v30 }
 0x216   : > { %801 = vmatmul.mubr.msk.bf16.vlgmr.msra.gmra.mxu1 %vm203_vm1, %v269_v32 }
 0x217   : > { %805 = vmatpush3.bf16.xpose.msra.mxu1 %v333_v31  ;;  %806 = vmatprep.mubr.msk.bf16.mxu1 %vm887_vm0, %v886_v0 }
 0x218   : > { %816 = vmatprep.subr.bf16.mxu1 %v886_v0 }
 0x21e   : > { %807 = vmatmul.mubr.msk.bf16.vlgmr.msra.gmra.mxu1 %vm203_vm1, %v326_v34 }
 0x21f   : > { %817 = vmatpush3.bf16.xpose.msra.mxu1 %v445_v36  ;;  %818 = vmatprep.mubr.msk.bf16.mxu1 %vm887_vm0, %v886_v0 }
 0x220   : > { %828 = vmatprep.subr.bf16.mxu1 %v886_v0 }
 0x226   : > { %819 = vmatmul.mubr.msk.bf16.vlgmr.msra.gmra.mxu1 %vm203_vm1, %v438_v35 }
 0x227   : > { %829 = vmatpush3.bf16.xpose.msra.mxu1 %v557_v38  ;;  %830 = vmatprep.mubr.msk.bf16.mxu1 %vm887_vm0, %v886_v0 }
 0x22e   : > { %831 = vmatmul.mubr.msk.bf16.vlgmr.msra.gmra.mxu1 %vm203_vm1, %v550_v39 }
 0x2d6   : > { %v978_v40 = vpop.f32.mrf.mxu1 }
 0x2d8   : > { %v802_v41 = vpop.f32.mrf.mxu1 }
 0x2da   : > { %v319_v42 = vpop.f32.mrf.mxu1 }
 0x2dc   : > { %v803_v43 = vpop.f32.mrf.mxu1 }
 0x2de   : > { %v369_v44 = vpop.f32.mrf.mxu1 }
 0x2df   : > { %v375_v45 = vmul.f32 0.35355338, %v369_v44 }
 0x2e0   : > { %v808_v46 = vpop.f32.mrf.mxu1 }
 0x2e1   : > { %v376_v47 = vadd.f32 %v375_v45, %v950_v10 }
 0x2e2   : > { %v372_v48 = vpop.f32.mrf.mxu1 }
 0x2e3   : > { %v377_v49 = vsel %vm203_vm1, %v376_v47, -inf }
 0x2e4   : > { %378 = vmax.xlane.f32.xlu1 %v377_v49  ;;  %v809_v50 = vpop.f32.mrf.mxu1 }
 0x2e6   : > { %v481_v51 = vpop.f32.mrf.mxu1 }
 0x2e7   : > { %v487_v52 = vmul.f32 0.35355338, %v481_v51 }
 0x2e8   : > { %v820_v53 = vpop.f32.mrf.mxu1 }
 0x2e9   : > { %v488_v54 = vadd.f32 %v487_v52, %v950_v10 }
 0x2ea   : > { %v484_v55 = vpop.f32.mrf.mxu1 }
 0x2eb   : > { %v489_v56 = vsel %vm203_vm1, %v488_v54, -inf }
 0x2ec   : > { %490 = vmax.xlane.f32.xlu0 %v489_v56  ;;  %v821_v57 = vpop.f32.mrf.mxu1 }
 0x2ee   : > { %v593_v58 = vpop.f32.mrf.mxu1 }
 0x2ef   : > { %v599_v59 = vmul.f32 0.35355338, %v593_v58 }
 0x2f0   : > { %v832_v60 = vpop.f32.mrf.mxu1 }
 0x2f1   : > { %v600_v61 = vadd.f32 %v599_v59, %v950_v10 }
 0x2f2   : > { %v596_v62 = vpop.f32.mrf.mxu1 }
 0x2f3   : > { %v601_v63 = vsel %vm203_vm1, %v600_v61, -inf }
 0x2f4   : > { %602 = vmax.xlane.f32.xlu1 %v601_v63  ;;  %v833_v1 = vpop.f32.mrf.mxu1 }
 0x305   : > { %389 = vrot.lane.b32.xlu1 %v954_v18, %s892_s28 }
 0x36d   : > { %v379_v2 = vpop.xlane.xlu1 %378 }
 0x36e   : > { %v380_v3 = vsub.f32 %v376_v47, %v379_v2 }
 0x370   : > { %v381_v4 = vmul.f32 1.442695, %v380_v3 }
 0x372   : > { %866 = vpow2.f32 %v381_v4 }
 0x375   : > { %v491_v5 = vpop.xlane.xlu0 %490 }
 0x376   : > { %v492_v6 = vsub.f32 %v488_v54, %v491_v5 }
 0x378   : > { %v493_v7 = vmul.f32 1.442695, %v492_v6 }
 0x37a   : > { %868 = vpow2.f32 %v493_v7 }
 0x37d   : > { %v603_v8 = vpop.xlane.xlu1 %602 }
 0x37e   : > { %v604_v9 = vsub.f32 %v600_v61, %v603_v8 }
 0x37f   : > { %v867_v11 = vpop.eup %866 }
 0x380   : > { %v605_v10 = vmul.f32 1.442695, %v604_v9  ;;  %v383_v12 = vsel %vm203_vm1, %v867_v11, 0.0 }
 0x381   : > { %384 = vadd.xlane.f32.xlu0 %v383_v12  ;;  %v390_v13 = vpop.permute.xlu1 %389 }
 0x382   : > { %870 = vpow2.f32 %v605_v10  ;;  %v395_v14 = vsel %vm278_vm2, %v390_v13, 0 }
 0x383   : > { %811 = vmatpush3.bf16.msra.mxu0 %v395_v14 }
 0x384   : > { %822 = vmatprep.subr.bf16.mxu0 %v886_v0 }
 0x387   : > { %v869_v15 = vpop.eup %868 }
 0x388   : > { %v495_v16 = vsel %vm203_vm1, %v869_v15, 0.0 }
 0x389   : > { %496 = vadd.xlane.f32.xlu1 %v495_v16 }
 0x38f   : > { %v871_v17 = vpop.eup %870 }
 0x390   : > { %v607_v19 = vsel %vm203_vm1, %v871_v17, 0.0 }
 0x391   : > { %608 = vadd.xlane.f32.xlu0 %v607_v19 }
 0x39a   : > { %613 = vrot.lane.b32.xlu1 %v954_v18, %s893_s29 }
 0x3a7   : > { %501 = vrot.lane.b32.xlu0 %v954_v18, %s894_s30 }
 0x40a   : > { %v385_v20 = vpop.xlane.xlu0 %384 }
 0x40b   : > { %872 = vrcp.f32 %v385_v20 }
 0x412   : > { %v497_v21 = vpop.xlane.xlu1 %496 }
 0x413   : > { %874 = vrcp.f32 %v497_v21 }
 0x416   : > { %v614_v18 = vpop.permute.xlu1 %613 }
 0x417   : > { %v619_v31 = vsel %vm278_vm2, %v614_v18, 0 }
 0x418   : > { %v873_v22 = vpop.eup %872 }
 0x419   : > { %v387_v23 = vmul.f32 %v873_v22, %v867_v11 }
 0x41a   : > { %v609_v24 = vpop.xlane.xlu0 %608 }
 0x41b   : > { %876 = vrcp.f32 %v609_v24  ;;  %v388_v25 = vpack.c.bf16 %v387_v23, %v387_v23 }
 0x41d   : > { %813 = vmatmul.mubr.msk.bf16.vlgmr.msra.gmra.mxu0 %vm203_vm1, %v388_v25 }
 0x41e   : > { %v502_v26 = vpop.permute.xlu0 %501  ;;  %824 = vmatprep.mubr.msk.bf16.mxu0 %vm887_vm0, %v886_v0 }
 0x41f   : > { %v507_v27 = vsel %vm278_vm2, %v502_v26, 0 }
 0x420   : > { %v875_v28 = vpop.eup %874  ;;  %823 = vmatpush3.bf16.msra.mxu0 %v507_v27 }
 0x421   : > { %v499_v29 = vmul.f32 %v875_v28, %v869_v15  ;;  %834 = vmatprep.subr.bf16.mxu0 %v886_v0 }
 0x423   : > { %v500_v30 = vpack.c.bf16 %v499_v29, %v499_v29 }
 0x425   : > { %825 = vmatmul.mubr.msk.bf16.vlgmr.msra.gmra.mxu0 %vm203_vm1, %v500_v30 }
 0x426   : > { %835 = vmatpush3.bf16.msra.mxu0 %v619_v31  ;;  %836 = vmatprep.mubr.msk.bf16.mxu0 %vm887_vm0, %v886_v0 }
 0x428   : > { %v877_v32 = vpop.eup %876 }
 0x429   : > { %v611_v33 = vmul.f32 %v877_v32, %v871_v17 }
 0x42b   : > { %v612_v34 = vpack.c.bf16 %v611_v33, %v611_v33 }
 0x42d   : > { %837 = vmatmul.mubr.msk.bf16.vlgmr.msra.gmra.mxu0 %vm203_vm1, %v612_v34 }
 0x4dd   : > { %v431_v35 = vpop.f32.mrf.mxu0 }
 0x4de   : > { %662 = vrot.lane.b32.xlu1 %v431_v35, %s895_s4 }
 0x4df   : > { %v814_v36 = vpop.f32.mrf.mxu0 }
 0x4e1   : > { %v434_v37 = vpop.f32.mrf.mxu0 }
 0x4e3   : > { %v815_v38 = vpop.f32.mrf.mxu0 }
 0x4e5   : > { %v543_v39 = vpop.f32.mrf.mxu0 }
 0x4e6   : > { %666 = vrot.lane.b32.xlu0 %v543_v39, %s896_s5 }
 0x4e7   : > { %v826_v41 = vpop.f32.mrf.mxu0 }
 0x4e9   : > { %v546_v42 = vpop.f32.mrf.mxu0 }
 0x4eb   : > { %v827_v43 = vpop.f32.mrf.mxu0 }
 0x4ed   : > { %v655_v44 = vpop.f32.mrf.mxu0 }
 0x4ee   : > { %670 = vrot.lane.b32.xlu1 %v655_v44, %s897_s6 }
 0x4ef   : > { %v838_v0 = vpop.f32.mrf.mxu0 }
 0x4f1   : > { %v658_v45 = vpop.f32.mrf.mxu0 }
 0x4f3   : > { %v839_v46 = vpop.f32.mrf.mxu0 }
 0x550   : > { %v663_v47 = vpop.permute.xlu1 %662 }
 0x551   : > { %v673_v49 = vsel %vm203_vm1, %v978_v40, %v663_v47 }
 0x558   : > { %v667_v48 = vpop.permute.xlu0 %666 }
 0x559   : > { %v675_v50 = vsel %vm674_vm3, %v673_v49, %v667_v48 }
 0x560   : > { %v671_v51 = vpop.permute.xlu1 %670 }
 0x561   : > { %v677_v52 = vsel %vm676_vm4, %v675_v50, %v671_v51 }
 0x562   : > { %v678_v53 = vpack.c.bf16 %v677_v52, %v677_v52 }
 0x564   : > { %680 = vst.msk [vmem:[%s196_s9] sm:$0xf] %vm679_vm5, %v678_v53 }
 0x565 PF: > { %s13_s12 = sadd.s32 1, %s884_s12  }
 0x566   : > { %p10_p4 = scmp.ge.s32.totalorder %s13_s12, 4  }
 0x568   :  { %12 = sbr.rel (!%p10_p4) target bundleno = 1 (0x1), region = 68 }

</bundles_post_ra>
